<compile_context>
chip_gen: v7x
topology: tpu7x:2x2x1
jax: 0.10.0
libtpu: 0.0.40
codegen_flags: <defaults>
</compile_context>

<pallas_src>
import functools

import jax
import jax.numpy as jnp
from jax import lax
from jax.experimental import pallas as pl
from jax.experimental.pallas import tpu as pltpu


def _resblock_kernel(xb_ref, ht_ref, hb_ref, w1_ref, b1_ref, w2_ref, b2_ref,
                     o_ref, xf_ref, col_ref, mid_ref, *,
                     TR, W, C, K, res_scale, compute_dtype):
    """One (batch, row-tile) step, NCHW-native / transposed-GEMM formulation.

    xb_ref : (1, C, TR*W)        body rows of this tile (flattened H*W), f32
    ht_ref : (1, 1, C, 2p*W)     2p rows above the tile (zeros at image top)
    hb_ref : (1, 1, C, 2p*W)     2p rows below the tile (zeros at image bottom)
    w1_ref : (C, K*K*C)          conv1 weights: (cout) x (dy, dx, cin)
    b1_ref : (C, 1)              f32
    w2_ref : (C, K*K*C)
    b2_ref : (C, 1)
    o_ref  : (1, C, TR*W)        output rows, lane-dense (TR*W % 128 == 0)
    xf_ref : (C, (TR+4p)*W+2p)   flat input window scratch (compute_dtype)
    col_ref: (K*K*C, (TR+2p)*W)  transposed im2col scratch (pixels on lanes)
    mid_ref: (C, (TR+2p)*W+2p)   staged ReLU(conv1), flat, p-lane zero pads
    """
    p = K // 2
    TR2 = TR + 2 * p
    HALO = 2 * p * W
    BODY = TR * W
    N1 = TR2 * W
    f32 = jnp.float32
    cd = compute_dtype
    t = pl.program_id(1)
    n_t = pl.num_programs(1)

    # ---- assemble the flat input window along lanes:
    #      [p zeros | top halo rows | body rows | bottom halo rows | p zeros]
    xf_ref[:, 0:p] = jnp.zeros((C, p), cd)
    xf_ref[:, p:p + HALO] = ht_ref[0, 0].astype(cd)
    xf_ref[:, p + HALO:p + HALO + BODY] = xb_ref[0].astype(cd)
    xf_ref[:, p + HALO + BODY:p + 2 * HALO + BODY] = hb_ref[0, 0].astype(cd)
    xf_ref[:, p + 2 * HALO + BODY:] = jnp.zeros((C, p), cd)

    # Horizontal "SAME"-padding masks: keep lane i (image column i % W) for a
    # tap column-offset dx iff 0 <= (i % W) + dx - p < W.  dx == p: no mask.
    cidx = lax.broadcasted_iota(jnp.int32, (1, N1), 1) % W
    keep = {dx: (cidx >= (p - dx)) & (cidx < (W + p - dx))
            for dx in range(K) if dx != p}

    # ---- conv1: transposed im2col + one MXU GEMM (N = spatial pixels) ------
    for dy in range(K):
        for dx in range(K):
            tap = dy * K + dx
            slab = xf_ref[:, dy * W + dx:dy * W + dx + N1]          # (C, N1)
            if dx != p:
                slab = jnp.where(keep[dx], slab, jnp.zeros((), cd))
            col_ref[tap * C:(tap + 1) * C, :] = slab

    a1 = jnp.dot(w1_ref[...], col_ref[...], preferred_element_type=f32)
    h = jnp.maximum(a1 + b1_ref[...], 0.0)                          # (C, N1)

    # ---- stage ReLU(conv1); zero the rows falling in conv2's vertical
    #      "SAME" border at the image top / bottom (bias makes them nonzero).
    mid_ref[:, 0:p] = jnp.zeros((C, p), cd)
    mid_ref[:, p:p + N1] = h.astype(cd)
    mid_ref[:, p + N1:] = jnp.zeros((C, p), cd)

    @pl.when(t == 0)
    def _():
        mid_ref[:, p:p + p * W] = jnp.zeros((C, p * W), cd)

    @pl.when(t == n_t - 1)
    def _():
        mid_ref[:, p + (TR + p) * W:p + N1] = jnp.zeros((C, p * W), cd)

    # ---- conv2: same trick over the staged map; only the TR*W real pixels --
    for dy in range(K):
        for dx in range(K):
            tap = dy * K + dx
            slab = mid_ref[:, dy * W + dx:dy * W + dx + BODY]       # (C, BODY)
            if dx != p:
                slab = jnp.where(keep[dx][:, :BODY], slab, jnp.zeros((), cd))
            col_ref[tap * C:(tap + 1) * C, 0:BODY] = slab

    a2 = jnp.dot(w2_ref[...], col_ref[:, 0:BODY],
                 preferred_element_type=f32)                        # (C, BODY)
    res = (a2 + b2_ref[...]) * jnp.float32(res_scale)

    # ---- residual add from the already-resident body block; lane-dense store
    o_ref[0] = (res + xb_ref[0]).astype(o_ref.dtype)


def _vmem_budget_and_limit():
    """Generation-aware VMEM numbers (v5e/v6e: 128 MiB physical, v7x: 64 MiB)."""
    cap = 64 * 1024 * 1024
    try:
        info = pltpu.get_tpu_info()
        cap = int(getattr(info, "vmem_capacity_bytes", cap) or cap)
    except Exception:
        pass
    budget = (7 * cap) // 10                                  # working-set target
    limit = min(cap - 16 * 1024 * 1024, (17 * cap) // 20)     # scoped VMEM ask
    limit = max(limit, budget + 4 * 1024 * 1024)
    return budget, limit


def _choose_row_tile(H, W, C, K, compute_dtype, budget_bytes, batch):
    """Largest legal row tile whose per-step working set fits the budget."""
    p = K // 2
    cb = jnp.dtype(compute_dtype).itemsize

    def rup(x, m):
        return -(-x // m) * m

    def vmem_bytes(tr):
        n1 = (tr + 2 * p) * W
        body = C * rup(tr * W, 128) * 4                 # f32 in/out block
        halo = C * rup(2 * p * W, 128) * 4
        wts = 2 * (C * rup(K * K * C, 128) * cb + C * 512)
        scratch = (C * rup((tr + 4 * p) * W + 2 * p, 128) * cb     # xf
                   + rup(K * K * C, 16) * rup(n1, 128) * cb        # col
                   + C * rup(n1 + 2 * p, 128) * cb)                # mid
        # Only the pipelined input/output blocks are double-buffered; scratch
        # is single-buffered and constant-index weights are fetched once.
        return 2 * (2 * body + 2 * halo) + wts + scratch

    legal = [tr for tr in range(2 * p, H + 1)
             if H % tr == 0 and ((tr * W) % 128 == 0 or tr == H)]
    if not legal:
        legal = [H]
    fit = [tr for tr in legal if vmem_bytes(tr) <= budget_bytes]
    if not fit:
        return min(legal)
    if batch == 1:
        multi = [tr for tr in fit if H // tr >= 2]
        if multi:
            return max(multi)    # keep >=2 grid steps so both TCs get work
    return max(fit)


def resblock_pallas(x_nchw, w1, b1, w2, b2, res_scale=1.0, *,
                    row_tile=None, compute_dtype=jnp.bfloat16):
    """Fused EDSR ResBlock, NCHW in / NCHW out.

    x_nchw : (B, C, H, W) float32
    w1, w2 : (K, K, Cin, Cout) HWIO     b1, b2 : (C,)
    compute_dtype: bf16 (default, MXU-native operands, f32 accumulation) or
                   f32 (exact).
    """
    B, C, H, W = x_nchw.shape
    K = w1.shape[0]
    assert w1.shape == (K, K, C, C) and w2.shape == (K, K, C, C)
    assert K % 2 == 1 and K >= 3, "kernel_size must be odd and >= 3"
    p = K // 2

    budget, vmem_limit = _vmem_budget_and_limit()
    TR = row_tile if row_tile is not None else _choose_row_tile(
        H, W, C, K, compute_dtype, budget, B)
    assert H % TR == 0 and TR >= 2 * p, (H, TR)
    assert (TR * W) % 128 == 0 or TR == H, \
        "row tile must give a lane-dense (multiple-of-128) output slab"
    # TODO(synk): support H not divisible by the row tile via a masked edge tile.
    nT = H // TR
    HALO = 2 * p * W
    BODY = TR * W

    x = x_nchw.astype(jnp.float32)
    x_flat = x.reshape(B, C, H * W)          # contiguous reshape -> no HBM copy

    # Thin vertical-halo strips (2p rows above / below every tile, zeros at the
    # image border): ~2*2p/TR of the input, replacing the old full stacked copy.
    top = jnp.pad(x, ((0, 0), (0, 0), (2 * p, 0), (0, 0)))[:, :, :H, :]
    halo_top = jnp.transpose(
        top.reshape(B, C, nT, TR, W)[:, :, :, :2 * p, :],
        (0, 2, 1, 3, 4)).reshape(B, nT, C, HALO)
    bot = jnp.pad(x, ((0, 0), (0, 0), (0, 2 * p), (0, 0)))[:, :, 2 * p:, :]
    halo_bot = jnp.transpose(
        bot.reshape(B, C, nT, TR, W)[:, :, :, TR - 2 * p:, :],
        (0, 2, 1, 3, 4)).reshape(B, nT, C, HALO)

    # Weights in transposed-im2col form: (cout) x (dy, dx, cin).
    w1t = jnp.transpose(w1, (3, 0, 1, 2)).reshape(C, K * K * C).astype(compute_dtype)
    w2t = jnp.transpose(w2, (3, 0, 1, 2)).reshape(C, K * K * C).astype(compute_dtype)
    b1c = b1.reshape(C, 1).astype(jnp.float32)
    b2c = b2.reshape(C, 1).astype(jnp.float32)

    kern = functools.partial(
        _resblock_kernel, TR=TR, W=W, C=C, K=K,
        res_scale=float(res_scale), compute_dtype=compute_dtype)

    out_flat = pl.pallas_call(
        kern,
        out_shape=jax.ShapeDtypeStruct((B, C, H * W), jnp.float32),
        grid_spec=pltpu.PrefetchScalarGridSpec(
            num_scalar_prefetch=0,
            grid=(B, nT),
            in_specs=[
                pl.BlockSpec((1, C, BODY), lambda b, t: (b, 0, t)),
                pl.BlockSpec((1, 1, C, HALO), lambda b, t: (b, t, 0, 0)),
                pl.BlockSpec((1, 1, C, HALO), lambda b, t: (b, t, 0, 0)),
                # Constant index maps: weights / biases are fetched once.
                pl.BlockSpec((C, K * K * C), lambda b, t: (0, 0)),
                pl.BlockSpec((C, 1), lambda b, t: (0, 0)),
                pl.BlockSpec((C, K * K * C), lambda b, t: (0, 0)),
                pl.BlockSpec((C, 1), lambda b, t: (0, 0)),
            ],
            out_specs=pl.BlockSpec((1, C, BODY), lambda b, t: (b, 0, t)),
            scratch_shapes=[
                pltpu.VMEM((C, (TR + 4 * p) * W + 2 * p), compute_dtype),  # xf
                pltpu.VMEM((K * K * C, (TR + 2 * p) * W), compute_dtype),  # col
                pltpu.VMEM((C, (TR + 2 * p) * W + 2 * p), compute_dtype),  # mid
            ],
        ),
        compiler_params=pltpu.CompilerParams(
            dimension_semantics=("parallel", "parallel"),
            vmem_limit_bytes=int(vmem_limit)),
    )(x_flat, halo_top, halo_bot, w1t, b1c, w2t, b2c)

    return out_flat.reshape(B, C, H, W)


def resblock_reference(x_nchw, w1, b1, w2, b2, res_scale=1.0,
                       compute_dtype=jnp.float32):
    """Pure-JAX reference.  With compute_dtype=bfloat16 it emulates the
    kernel's operand quantization (bf16 GEMM operands, f32 accumulation)."""
    f32 = jnp.float32
    q = lambda a: a.astype(compute_dtype).astype(f32)
    x = jnp.transpose(x_nchw, (0, 2, 3, 1)).astype(f32)
    dn = lax.conv_dimension_numbers(x.shape, w1.shape, ("NHWC", "HWIO", "NHWC"))
    h = lax.conv_general_dilated(q(x), q(w1), (1, 1), "SAME",
                                 dimension_numbers=dn,
                                 precision=lax.Precision.HIGHEST) + b1
    h = jnp.maximum(h, 0.0)
    h = lax.conv_general_dilated(q(h), q(w2), (1, 1), "SAME",
                                 dimension_numbers=dn,
                                 precision=lax.Precision.HIGHEST) + b2
    y = h * res_scale + x
    return jnp.transpose(y, (0, 3, 1, 2))


if __name__ == "__main__":
    # EDSR-like small config: batch=2, n_feats=64 (keeps lanes / MXU busy),
    # 32x16 spatial, 3x3 kernel.
    B, C, H, W, K = 2, 64, 32, 16, 3
    key = jax.random.PRNGKey(0)
    kx, kw1, kb1, kw2, kb2 = jax.random.split(key, 5)

    x = jax.random.normal(kx, (B, C, H, W), dtype=jnp.float32)
    # Deterministic synthetic parameters (HWIO layout), not a checkpoint load.
    w1 = 0.1 * jax.random.normal(kw1, (K, K, C, C), dtype=jnp.float32)
    b1 = 0.1 * jax.random.normal(kb1, (C,), dtype=jnp.float32)
    w2 = 0.1 * jax.random.normal(kw2, (K, K, C, C), dtype=jnp.float32)
    b2 = 0.1 * jax.random.normal(kb2, (C,), dtype=jnp.float32)

    # 1) exact f32 path, explicit 8-row tiles: grid (2, 4) exercises first /
    #    interior / last row tiles and both megacore TensorCores.
    y32 = jax.block_until_ready(
        resblock_pallas(x, w1, b1, w2, b2, res_scale=1.0,
                        row_tile=8, compute_dtype=jnp.float32))
    ref32 = jax.block_until_ready(resblock_reference(x, w1, b1, w2, b2, 1.0))
    assert y32.shape == (B, C, H, W), y32.shape
    err32 = float(jnp.max(jnp.abs(y32 - ref32)))
    assert err32 < 2e-3, f"f32 path max abs err {err32}"

    # 2) default bf16-MXU path with the generation-aware row-tile chooser,
    #    checked against a reference that emulates bf16 operand quantization.
    ybf = jax.block_until_ready(
        resblock_pallas(x, w1, b1, w2, b2, res_scale=1.0))
    refbf = jax.block_until_ready(
        resblock_reference(x, w1, b1, w2, b2, 1.0, compute_dtype=jnp.bfloat16))
    errbf = float(jnp.max(jnp.abs(ybf - refbf)))
    assert errbf < 2e-2, f"bf16 path max abs err {errbf}"

    print("KERNEL_OK")
</pallas_src>

<mosaic_0001>
module attributes {stable_mosaic.version = 11 : i64} {
  func.func @_resblock_kernel(%arg0: i32, %arg1: i32, %arg2: memref<1x64x128xf32, #tpu.memory_space<vmem>>, %arg3: memref<1x1x64x32xf32, #tpu.memory_space<vmem>>, %arg4: memref<1x1x64x32xf32, #tpu.memory_space<vmem>>, %arg5: memref<64x576xf32, #tpu.memory_space<vmem>>, %arg6: memref<64x1xf32, #tpu.memory_space<vmem>>, %arg7: memref<64x576xf32, #tpu.memory_space<vmem>>, %arg8: memref<64x1xf32, #tpu.memory_space<vmem>>, %arg9: memref<1x64x128xf32, #tpu.memory_space<vmem>>, %arg10: memref<64x194xf32, #tpu.memory_space<vmem>>, %arg11: memref<576x160xf32, #tpu.memory_space<vmem>>, %arg12: memref<64x162xf32, #tpu.memory_space<vmem>>) attributes {dimension_semantics = [#tpu.dimension_semantics<parallel>, #tpu.dimension_semantics<parallel>], iteration_bounds = array<i64: 2, 4>, scalar_prefetch = 0 : i64, scratch_operands = 3 : i64, tpu.core_type = #tpu.core_type<tc>, window_params = [{transform_indices = @transform_0, window_bounds = array<i64: 1, 64, 128>}, {transform_indices = @transform_1, window_bounds = array<i64: 1, 1, 64, 32>}, {transform_indices = @transform_2, window_bounds = array<i64: 1, 1, 64, 32>}, {pipeline_mode = #tpu.pipeline_mode<synchronous>, transform_indices = @transform_3, window_bounds = array<i64: 64, 576>}, {pipeline_mode = #tpu.pipeline_mode<synchronous>, transform_indices = @transform_4, window_bounds = array<i64: 64, 1>}, {pipeline_mode = #tpu.pipeline_mode<synchronous>, transform_indices = @transform_5, window_bounds = array<i64: 64, 576>}, {pipeline_mode = #tpu.pipeline_mode<synchronous>, transform_indices = @transform_6, window_bounds = array<i64: 64, 1>}, {transform_indices = @transform_7, window_bounds = array<i64: 1, 64, 128>}]} {
    %cst = arith.constant 0.000000e+00 : f32
    %0 = vector.broadcast %cst : f32 to vector<64x1xf32>
    %c0 = arith.constant 0 : index
    %c0_0 = arith.constant 0 : index
    %1 = vector.load %arg10[%c0, %c0_0] : memref<64x194xf32, #tpu.memory_space<vmem>>, vector<64x1xf32>
    tpu.vector_store %arg10[%c0, %c0_0], %0 {strides = array<i32>} : memref<64x194xf32, #tpu.memory_space<vmem>>, vector<64x1xf32>,
    %c0_1 = arith.constant 0 : index
    %c0_2 = arith.constant 0 : index
    %c0_3 = arith.constant 0 : index
    %c0_4 = arith.constant 0 : index
    %2 = vector.load %arg3[%c0_1, %c0_2, %c0_3, %c0_4] : memref<1x1x64x32xf32, #tpu.memory_space<vmem>>, vector<1x1x64x32xf32>
    %3 = vector.shape_cast %2 : vector<1x1x64x32xf32> to vector<64x32xf32>
    %c0_5 = arith.constant 0 : index
    %c1 = arith.constant 1 : index
    %4 = vector.load %arg10[%c0_5, %c1] : memref<64x194xf32, #tpu.memory_space<vmem>>, vector<64x32xf32>
    tpu.vector_store %arg10[%c0_5, %c1], %3 {strides = array<i32>} : memref<64x194xf32, #tpu.memory_space<vmem>>, vector<64x32xf32>,
    %c0_6 = arith.constant 0 : index
    %c0_7 = arith.constant 0 : index
    %c0_8 = arith.constant 0 : index
    %5 = vector.load %arg2[%c0_6, %c0_7, %c0_8] : memref<1x64x128xf32, #tpu.memory_space<vmem>>, vector<1x64x128xf32>
    %6 = vector.shape_cast %5 : vector<1x64x128xf32> to vector<64x128xf32>
    %c0_9 = arith.constant 0 : index
    %c33 = arith.constant 33 : index
    %7 = vector.load %arg10[%c0_9, %c33] : memref<64x194xf32, #tpu.memory_space<vmem>>, vector<64x128xf32>
    tpu.vector_store %arg10[%c0_9, %c33], %6 {strides = array<i32>} : memref<64x194xf32, #tpu.memory_space<vmem>>, vector<64x128xf32>,
    %c0_10 = arith.constant 0 : index
    %c0_11 = arith.constant 0 : index
    %c0_12 = arith.constant 0 : index
    %c0_13 = arith.constant 0 : index
    %8 = vector.load %arg4[%c0_10, %c0_11, %c0_12, %c0_13] : memref<1x1x64x32xf32, #tpu.memory_space<vmem>>, vector<1x1x64x32xf32>
    %9 = vector.shape_cast %8 : vector<1x1x64x32xf32> to vector<64x32xf32>
    %c0_14 = arith.constant 0 : index
    %c161 = arith.constant 161 : index
    %10 = vector.load %arg10[%c0_14, %c161] : memref<64x194xf32, #tpu.memory_space<vmem>>, vector<64x32xf32>
    tpu.vector_store %arg10[%c0_14, %c161], %9 {strides = array<i32>} : memref<64x194xf32, #tpu.memory_space<vmem>>, vector<64x32xf32>,
    %cst_15 = arith.constant 0.000000e+00 : f32
    %11 = vector.broadcast %cst_15 : f32 to vector<64x1xf32>
    %c0_16 = arith.constant 0 : index
    %c193 = arith.constant 193 : index
    %12 = vector.load %arg10[%c0_16, %c193] : memref<64x194xf32, #tpu.memory_space<vmem>>, vector<64x1xf32>
    tpu.vector_store %arg10[%c0_16, %c193], %11 {strides = array<i32>} : memref<64x194xf32, #tpu.memory_space<vmem>>, vector<64x1xf32>,
    %13 = tpu.iota {dimensions = array<i32: 1>} : vector<1x160xi32>
    %c16_i32 = arith.constant 16 : i32
    %c0_i32 = arith.constant 0 : i32
    %14 = arith.cmpi eq, %c16_i32, %c0_i32 : i32
    %c1_i32 = arith.constant 1 : i32
    %15 = arith.select %14, %c1_i32, %c16_i32 : i32
    %16 = vector.broadcast %15 : i32 to vector<1x160xi32>
    %17 = arith.remsi %13, %16 : vector<1x160xi32>
    %c0_i32_17 = arith.constant 0 : i32
    %18 = vector.broadcast %c0_i32_17 : i32 to vector<1x160xi32>
    %19 = arith.cmpi ne, %17, %18 : vector<1x160xi32>
    %c0_i32_18 = arith.constant 0 : i32
    %20 = vector.broadcast %c0_i32_18 : i32 to vector<1x160xi32>
    %21 = arith.cmpi slt, %17, %20 : vector<1x160xi32>
    %c0_i32_19 = arith.constant 0 : i32
    %22 = arith.cmpi slt, %15, %c0_i32_19 : i32
    %23 = vector.broadcast %22 : i1 to vector<1x160xi1>
    %24 = vector.broadcast %23 : vector<1x160xi1> to vector<1x160xi1>
    %25 = arith.xori %21, %24 : vector<1x160xi1>
    %26 = arith.andi %25, %19 : vector<1x160xi1>
    %27 = vector.broadcast %15 : i32 to vector<1x160xi32>
    %28 = arith.addi %17, %27 : vector<1x160xi32>
    %29 = arith.select %26, %28, %17 : vector<1x160xi1>, vector<1x160xi32>
    %c1_i32_20 = arith.constant 1 : i32
    %30 = vector.broadcast %c1_i32_20 : i32 to vector<1x160xi32>
    %31 = arith.cmpi sge, %29, %30 : vector<1x160xi32>
    %c17_i32 = arith.constant 17 : i32
    %32 = vector.broadcast %c17_i32 : i32 to vector<1x160xi32>
    %33 = arith.cmpi slt, %29, %32 : vector<1x160xi32>
    %34 = arith.andi %31, %33 : vector<1x160xi1>
    %c-1_i32 = arith.constant -1 : i32
    %35 = vector.broadcast %c-1_i32 : i32 to vector<1x160xi32>
    %36 = arith.cmpi sge, %29, %35 : vector<1x160xi32>
    %c15_i32 = arith.constant 15 : i32
    %37 = vector.broadcast %c15_i32 : i32 to vector<1x160xi32>
    %38 = arith.cmpi slt, %29, %37 : vector<1x160xi32>
    %39 = arith.andi %36, %38 : vector<1x160xi1>
    %c0_21 = arith.constant 0 : index
    %c0_22 = arith.constant 0 : index
    %40 = vector.load %arg10[%c0_21, %c0_22] : memref<64x194xf32, #tpu.memory_space<vmem>>, vector<64x160xf32>
    %cst_23 = arith.constant 0.000000e+00 : f32
    %41 = vector.shape_cast %34 : vector<1x160xi1> to vector<1x160xi1>
    %42 = vector.broadcast %41 : vector<1x160xi1> to vector<64x160xi1>
    %43 = vector.broadcast %cst_23 : f32 to vector<64x160xf32>
    %44 = arith.select %42, %40, %43 : vector<64x160xi1>, vector<64x160xf32>
    %c0_24 = arith.constant 0 : index
    %c0_25 = arith.constant 0 : index
    %45 = vector.load %arg11[%c0_24, %c0_25] : memref<576x160xf32, #tpu.memory_space<vmem>>, vector<64x160xf32>
    tpu.vector_store %arg11[%c0_24, %c0_25], %44 {strides = array<i32>} : memref<576x160xf32, #tpu.memory_space<vmem>>, vector<64x160xf32>,
    %c0_26 = arith.constant 0 : index
    %c1_27 = arith.constant 1 : index
    %46 = vector.load %arg10[%c0_26, %c1_27] : memref<64x194xf32, #tpu.memory_space<vmem>>, vector<64x160xf32>
    %c64 = arith.constant 64 : index
    %c0_28 = arith.constant 0 : index
    %47 = vector.load %arg11[%c64, %c0_28] : memref<576x160xf32, #tpu.memory_space<vmem>>, vector<64x160xf32>
    tpu.vector_store %arg11[%c64, %c0_28], %46 {strides = array<i32>} : memref<576x160xf32, #tpu.memory_space<vmem>>, vector<64x160xf32>,
    %c0_29 = arith.constant 0 : index
    %c2 = arith.constant 2 : index
    %48 = vector.load %arg10[%c0_29, %c2] : memref<64x194xf32, #tpu.memory_space<vmem>>, vector<64x160xf32>
    %cst_30 = arith.constant 0.000000e+00 : f32
    %49 = vector.shape_cast %39 : vector<1x160xi1> to vector<1x160xi1>
    %50 = vector.broadcast %49 : vector<1x160xi1> to vector<64x160xi1>
    %51 = vector.broadcast %cst_30 : f32 to vector<64x160xf32>
    %52 = arith.select %50, %48, %51 : vector<64x160xi1>, vector<64x160xf32>
    %c128 = arith.constant 128 : index
    %c0_31 = arith.constant 0 : index
    %53 = vector.load %arg11[%c128, %c0_31] : memref<576x160xf32, #tpu.memory_space<vmem>>, vector<64x160xf32>
    tpu.vector_store %arg11[%c128, %c0_31], %52 {strides = array<i32>} : memref<576x160xf32, #tpu.memory_space<vmem>>, vector<64x160xf32>,
    %c0_32 = arith.constant 0 : index
    %c16 = arith.constant 16 : index
    %54 = vector.load %arg10[%c0_32, %c16] : memref<64x194xf32, #tpu.memory_space<vmem>>, vector<64x160xf32>
    %cst_33 = arith.constant 0.000000e+00 : f32
    %55 = vector.shape_cast %34 : vector<1x160xi1> to vector<1x160xi1>
    %56 = vector.broadcast %55 : vector<1x160xi1> to vector<64x160xi1>
    %57 = vector.broadcast %cst_33 : f32 to vector<64x160xf32>
    %58 = arith.select %56, %54, %57 : vector<64x160xi1>, vector<64x160xf32>
    %c192 = arith.constant 192 : index
    %c0_34 = arith.constant 0 : index
    %59 = vector.load %arg11[%c192, %c0_34] : memref<576x160xf32, #tpu.memory_space<vmem>>, vector<64x160xf32>
    tpu.vector_store %arg11[%c192, %c0_34], %58 {strides = array<i32>} : memref<576x160xf32, #tpu.memory_space<vmem>>, vector<64x160xf32>,
    %c0_35 = arith.constant 0 : index
    %c17 = arith.constant 17 : index
    %60 = vector.load %arg10[%c0_35, %c17] : memref<64x194xf32, #tpu.memory_space<vmem>>, vector<64x160xf32>
    %c256 = arith.constant 256 : index
    %c0_36 = arith.constant 0 : index
    %61 = vector.load %arg11[%c256, %c0_36] : memref<576x160xf32, #tpu.memory_space<vmem>>, vector<64x160xf32>
    tpu.vector_store %arg11[%c256, %c0_36], %60 {strides = array<i32>} : memref<576x160xf32, #tpu.memory_space<vmem>>, vector<64x160xf32>,
    %c0_37 = arith.constant 0 : index
    %c18 = arith.constant 18 : index
    %62 = vector.load %arg10[%c0_37, %c18] : memref<64x194xf32, #tpu.memory_space<vmem>>, vector<64x160xf32>
    %cst_38 = arith.constant 0.000000e+00 : f32
    %63 = vector.shape_cast %39 : vector<1x160xi1> to vector<1x160xi1>
    %64 = vector.broadcast %63 : vector<1x160xi1> to vector<64x160xi1>
    %65 = vector.broadcast %cst_38 : f32 to vector<64x160xf32>
    %66 = arith.select %64, %62, %65 : vector<64x160xi1>, vector<64x160xf32>
    %c320 = arith.constant 320 : index
    %c0_39 = arith.constant 0 : index
    %67 = vector.load %arg11[%c320, %c0_39] : memref<576x160xf32, #tpu.memory_space<vmem>>, vector<64x160xf32>
    tpu.vector_store %arg11[%c320, %c0_39], %66 {strides = array<i32>} : memref<576x160xf32, #tpu.memory_space<vmem>>, vector<64x160xf32>,
    %c0_40 = arith.constant 0 : index
    %c32 = arith.constant 32 : index
    %68 = vector.load %arg10[%c0_40, %c32] : memref<64x194xf32, #tpu.memory_space<vmem>>, vector<64x160xf32>
    %cst_41 = arith.constant 0.000000e+00 : f32
    %69 = vector.shape_cast %34 : vector<1x160xi1> to vector<1x160xi1>
    %70 = vector.broadcast %69 : vector<1x160xi1> to vector<64x160xi1>
    %71 = vector.broadcast %cst_41 : f32 to vector<64x160xf32>
    %72 = arith.select %70, %68, %71 : vector<64x160xi1>, vector<64x160xf32>
    %c384 = arith.constant 384 : index
    %c0_42 = arith.constant 0 : index
    %73 = vector.load %arg11[%c384, %c0_42] : memref<576x160xf32, #tpu.memory_space<vmem>>, vector<64x160xf32>
    tpu.vector_store %arg11[%c384, %c0_42], %72 {strides = array<i32>} : memref<576x160xf32, #tpu.memory_space<vmem>>, vector<64x160xf32>,
    %c0_43 = arith.constant 0 : index
    %c33_44 = arith.constant 33 : index
    %74 = vector.load %arg10[%c0_43, %c33_44] : memref<64x194xf32, #tpu.memory_space<vmem>>, vector<64x160xf32>
    %c448 = arith.constant 448 : index
    %c0_45 = arith.constant 0 : index
    %75 = vector.load %arg11[%c448, %c0_45] : memref<576x160xf32, #tpu.memory_space<vmem>>, vector<64x160xf32>
    tpu.vector_store %arg11[%c448, %c0_45], %74 {strides = array<i32>} : memref<576x160xf32, #tpu.memory_space<vmem>>, vector<64x160xf32>,
    %c0_46 = arith.constant 0 : index
    %c34 = arith.constant 34 : index
    %76 = vector.load %arg10[%c0_46, %c34] : memref<64x194xf32, #tpu.memory_space<vmem>>, vector<64x160xf32>
    %cst_47 = arith.constant 0.000000e+00 : f32
    %77 = vector.shape_cast %39 : vector<1x160xi1> to vector<1x160xi1>
    %78 = vector.broadcast %77 : vector<1x160xi1> to vector<64x160xi1>
    %79 = vector.broadcast %cst_47 : f32 to vector<64x160xf32>
    %80 = arith.select %78, %76, %79 : vector<64x160xi1>, vector<64x160xf32>
    %c512 = arith.constant 512 : index
    %c0_48 = arith.constant 0 : index
    %81 = vector.load %arg11[%c512, %c0_48] : memref<576x160xf32, #tpu.memory_space<vmem>>, vector<64x160xf32>
    tpu.vector_store %arg11[%c512, %c0_48], %80 {strides = array<i32>} : memref<576x160xf32, #tpu.memory_space<vmem>>, vector<64x160xf32>,
    %c0_49 = arith.constant 0 : index
    %c0_50 = arith.constant 0 : index
    %82 = vector.load %arg5[%c0_49, %c0_50] : memref<64x576xf32, #tpu.memory_space<vmem>>, vector<64x576xf32>
    %c0_51 = arith.constant 0 : index
    %c0_52 = arith.constant 0 : index
    %83 = vector.load %arg11[%c0_51, %c0_52] : memref<576x160xf32, #tpu.memory_space<vmem>>, vector<576x160xf32>
    %cst_53 = arith.constant dense<0.000000e+00> : vector<64x160xf32>
    %84 = tpu.matmul %82, %83, %cst_53 {dimension_numbers = #tpu.dot_dimension_numbers<[1], [0], [0], [1], [0, 0, 1, 1], [], []>} : vector<64x576xf32>, vector<576x160xf32>, vector<64x160xf32> -> vector<64x160xf32>
    %c0_54 = arith.constant 0 : index
    %c0_55 = arith.constant 0 : index
    %85 = vector.load %arg6[%c0_54, %c0_55] : memref<64x1xf32, #tpu.memory_space<vmem>>, vector<64x1xf32>
    %86 = vector.broadcast %85 : vector<64x1xf32> to vector<64x160xf32>
    %87 = arith.addf %84, %86 : vector<64x160xf32>
    %cst_56 = arith.constant 0.000000e+00 : f32
    %88 = vector.broadcast %cst_56 : f32 to vector<64x160xf32>
    %89 = arith.maximumf %87, %88 : vector<64x160xf32>
    %cst_57 = arith.constant 0.000000e+00 : f32
    %90 = vector.broadcast %cst_57 : f32 to vector<64x1xf32>
    %c0_58 = arith.constant 0 : index
    %c0_59 = arith.constant 0 : index
    %91 = vector.load %arg12[%c0_58, %c0_59] : memref<64x162xf32, #tpu.memory_space<vmem>>, vector<64x1xf32>
    tpu.vector_store %arg12[%c0_58, %c0_59], %90 {strides = array<i32>} : memref<64x162xf32, #tpu.memory_space<vmem>>, vector<64x1xf32>,
    %c0_60 = arith.constant 0 : index
    %c1_61 = arith.constant 1 : index
    %92 = vector.load %arg12[%c0_60, %c1_61] : memref<64x162xf32, #tpu.memory_space<vmem>>, vector<64x160xf32>
    tpu.vector_store %arg12[%c0_60, %c1_61], %89 {strides = array<i32>} : memref<64x162xf32, #tpu.memory_space<vmem>>, vector<64x160xf32>,
    %cst_62 = arith.constant 0.000000e+00 : f32
    %93 = vector.broadcast %cst_62 : f32 to vector<64x1xf32>
    %c0_63 = arith.constant 0 : index
    %c161_64 = arith.constant 161 : index
    %94 = vector.load %arg12[%c0_63, %c161_64] : memref<64x162xf32, #tpu.memory_space<vmem>>, vector<64x1xf32>
    tpu.vector_store %arg12[%c0_63, %c161_64], %93 {strides = array<i32>} : memref<64x162xf32, #tpu.memory_space<vmem>>, vector<64x1xf32>,
    %c0_i32_65 = arith.constant 0 : i32
    %95 = arith.cmpi eq, %arg1, %c0_i32_65 : i32
    %96 = arith.extui %95 : i1 to i32
    %c0_i32_66 = arith.constant 0 : i32
    %97 = arith.cmpi ne, %96, %c0_i32_66 : i32
    scf.if %97 {
      %cst_124 = arith.constant 0.000000e+00 : f32
      %163 = vector.broadcast %cst_124 : f32 to vector<64x16xf32>
      %c0_125 = arith.constant 0 : index
      %c1_126 = arith.constant 1 : index
      %164 = vector.load %arg12[%c0_125, %c1_126] : memref<64x162xf32, #tpu.memory_space<vmem>>, vector<64x16xf32>
      tpu.vector_store %arg12[%c0_125, %c1_126], %163 {strides = array<i32>} : memref<64x162xf32, #tpu.memory_space<vmem>>, vector<64x16xf32>,
    } else {
    }
    %c3_i32 = arith.constant 3 : i32
    %98 = arith.cmpi eq, %arg1, %c3_i32 : i32
    %99 = arith.extui %98 : i1 to i32
    %c0_i32_67 = arith.constant 0 : i32
    %100 = arith.cmpi ne, %99, %c0_i32_67 : i32
    scf.if %100 {
      %cst_124 = arith.constant 0.000000e+00 : f32
      %163 = vector.broadcast %cst_124 : f32 to vector<64x16xf32>
      %c0_125 = arith.constant 0 : index
      %c145 = arith.constant 145 : index
      %164 = vector.load %arg12[%c0_125, %c145] : memref<64x162xf32, #tpu.memory_space<vmem>>, vector<64x16xf32>
      tpu.vector_store %arg12[%c0_125, %c145], %163 {strides = array<i32>} : memref<64x162xf32, #tpu.memory_space<vmem>>, vector<64x16xf32>,
    } else {
    }
    %c0_68 = arith.constant 0 : index
    %c0_69 = arith.constant 0 : index
    %101 = vector.load %arg12[%c0_68, %c0_69] : memref<64x162xf32, #tpu.memory_space<vmem>>, vector<64x128xf32>
    %102 = vector.extract_strided_slice %34 {offsets = [0, 0], sizes = [1, 128], strides = [1, 1]} : vector<1x160xi1> to vector<1x128xi1>
    %cst_70 = arith.constant 0.000000e+00 : f32
    %103 = vector.shape_cast %102 : vector<1x128xi1> to vector<1x128xi1>
    %104 = vector.broadcast %103 : vector<1x128xi1> to vector<64x128xi1>
    %105 = vector.broadcast %cst_70 : f32 to vector<64x128xf32>
    %106 = arith.select %104, %101, %105 : vector<64x128xi1>, vector<64x128xf32>
    %c0_71 = arith.constant 0 : index
    %c0_72 = arith.constant 0 : index
    %107 = vector.load %arg11[%c0_71, %c0_72] : memref<576x160xf32, #tpu.memory_space<vmem>>, vector<64x128xf32>
    tpu.vector_store %arg11[%c0_71, %c0_72], %106 {strides = array<i32>} : memref<576x160xf32, #tpu.memory_space<vmem>>, vector<64x128xf32>,
    %c0_73 = arith.constant 0 : index
    %c1_74 = arith.constant 1 : index
    %108 = vector.load %arg12[%c0_73, %c1_74] : memref<64x162xf32, #tpu.memory_space<vmem>>, vector<64x128xf32>
    %c64_75 = arith.constant 64 : index
    %c0_76 = arith.constant 0 : index
    %109 = vector.load %arg11[%c64_75, %c0_76] : memref<576x160xf32, #tpu.memory_space<vmem>>, vector<64x128xf32>
    tpu.vector_store %arg11[%c64_75, %c0_76], %108 {strides = array<i32>} : memref<576x160xf32, #tpu.memory_space<vmem>>, vector<64x128xf32>,
    %c0_77 = arith.constant 0 : index
    %c2_78 = arith.constant 2 : index
    %110 = vector.load %arg12[%c0_77, %c2_78] : memref<64x162xf32, #tpu.memory_space<vmem>>, vector<64x128xf32>
    %111 = vector.extract_strided_slice %39 {offsets = [0, 0], sizes = [1, 128], strides = [1, 1]} : vector<1x160xi1> to vector<1x128xi1>
    %cst_79 = arith.constant 0.000000e+00 : f32
    %112 = vector.shape_cast %111 : vector<1x128xi1> to vector<1x128xi1>
    %113 = vector.broadcast %112 : vector<1x128xi1> to vector<64x128xi1>
    %114 = vector.broadcast %cst_79 : f32 to vector<64x128xf32>
    %115 = arith.select %113, %110, %114 : vector<64x128xi1>, vector<64x128xf32>
    %c128_80 = arith.constant 128 : index
    %c0_81 = arith.constant 0 : index
    %116 = vector.load %arg11[%c128_80, %c0_81] : memref<576x160xf32, #tpu.memory_space<vmem>>, vector<64x128xf32>
    tpu.vector_store %arg11[%c128_80, %c0_81], %115 {strides = array<i32>} : memref<576x160xf32, #tpu.memory_space<vmem>>, vector<64x128xf32>,
    %c0_82 = arith.constant 0 : index
    %c16_83 = arith.constant 16 : index
    %117 = vector.load %arg12[%c0_82, %c16_83] : memref<64x162xf32, #tpu.memory_space<vmem>>, vector<64x128xf32>
    %118 = vector.extract_strided_slice %34 {offsets = [0, 0], sizes = [1, 128], strides = [1, 1]} : vector<1x160xi1> to vector<1x128xi1>
    %cst_84 = arith.constant 0.000000e+00 : f32
    %119 = vector.shape_cast %118 : vector<1x128xi1> to vector<1x128xi1>
    %120 = vector.broadcast %119 : vector<1x128xi1> to vector<64x128xi1>
    %121 = vector.broadcast %cst_84 : f32 to vector<64x128xf32>
    %122 = arith.select %120, %117, %121 : vector<64x128xi1>, vector<64x128xf32>
    %c192_85 = arith.constant 192 : index
    %c0_86 = arith.constant 0 : index
    %123 = vector.load %arg11[%c192_85, %c0_86] : memref<576x160xf32, #tpu.memory_space<vmem>>, vector<64x128xf32>
    tpu.vector_store %arg11[%c192_85, %c0_86], %122 {strides = array<i32>} : memref<576x160xf32, #tpu.memory_space<vmem>>, vector<64x128xf32>,
    %c0_87 = arith.constant 0 : index
    %c17_88 = arith.constant 17 : index
    %124 = vector.load %arg12[%c0_87, %c17_88] : memref<64x162xf32, #tpu.memory_space<vmem>>, vector<64x128xf32>
    %c256_89 = arith.constant 256 : index
    %c0_90 = arith.constant 0 : index
    %125 = vector.load %arg11[%c256_89, %c0_90] : memref<576x160xf32, #tpu.memory_space<vmem>>, vector<64x128xf32>
    tpu.vector_store %arg11[%c256_89, %c0_90], %124 {strides = array<i32>} : memref<576x160xf32, #tpu.memory_space<vmem>>, vector<64x128xf32>,
    %c0_91 = arith.constant 0 : index
    %c18_92 = arith.constant 18 : index
    %126 = vector.load %arg12[%c0_91, %c18_92] : memref<64x162xf32, #tpu.memory_space<vmem>>, vector<64x128xf32>
    %127 = vector.extract_strided_slice %39 {offsets = [0, 0], sizes = [1, 128], strides = [1, 1]} : vector<1x160xi1> to vector<1x128xi1>
    %cst_93 = arith.constant 0.000000e+00 : f32
    %128 = vector.shape_cast %127 : vector<1x128xi1> to vector<1x128xi1>
    %129 = vector.broadcast %128 : vector<1x128xi1> to vector<64x128xi1>
    %130 = vector.broadcast %cst_93 : f32 to vector<64x128xf32>
    %131 = arith.select %129, %126, %130 : vector<64x128xi1>, vector<64x128xf32>
    %c320_94 = arith.constant 320 : index
    %c0_95 = arith.constant 0 : index
    %132 = vector.load %arg11[%c320_94, %c0_95] : memref<576x160xf32, #tpu.memory_space<vmem>>, vector<64x128xf32>
    tpu.vector_store %arg11[%c320_94, %c0_95], %131 {strides = array<i32>} : memref<576x160xf32, #tpu.memory_space<vmem>>, vector<64x128xf32>,
    %c0_96 = arith.constant 0 : index
    %c32_97 = arith.constant 32 : index
    %133 = vector.load %arg12[%c0_96, %c32_97] : memref<64x162xf32, #tpu.memory_space<vmem>>, vector<64x128xf32>
    %134 = vector.extract_strided_slice %34 {offsets = [0, 0], sizes = [1, 128], strides = [1, 1]} : vector<1x160xi1> to vector<1x128xi1>
    %cst_98 = arith.constant 0.000000e+00 : f32
    %135 = vector.shape_cast %134 : vector<1x128xi1> to vector<1x128xi1>
    %136 = vector.broadcast %135 : vector<1x128xi1> to vector<64x128xi1>
    %137 = vector.broadcast %cst_98 : f32 to vector<64x128xf32>
    %138 = arith.select %136, %133, %137 : vector<64x128xi1>, vector<64x128xf32>
    %c384_99 = arith.constant 384 : index
    %c0_100 = arith.constant 0 : index
    %139 = vector.load %arg11[%c384_99, %c0_100] : memref<576x160xf32, #tpu.memory_space<vmem>>, vector<64x128xf32>
    tpu.vector_store %arg11[%c384_99, %c0_100], %138 {strides = array<i32>} : memref<576x160xf32, #tpu.memory_space<vmem>>, vector<64x128xf32>,
    %c0_101 = arith.constant 0 : index
    %c33_102 = arith.constant 33 : index
    %140 = vector.load %arg12[%c0_101, %c33_102] : memref<64x162xf32, #tpu.memory_space<vmem>>, vector<64x128xf32>
    %c448_103 = arith.constant 448 : index
    %c0_104 = arith.constant 0 : index
    %141 = vector.load %arg11[%c448_103, %c0_104] : memref<576x160xf32, #tpu.memory_space<vmem>>, vector<64x128xf32>
    tpu.vector_store %arg11[%c448_103, %c0_104], %140 {strides = array<i32>} : memref<576x160xf32, #tpu.memory_space<vmem>>, vector<64x128xf32>,
    %c0_105 = arith.constant 0 : index
    %c34_106 = arith.constant 34 : index
    %142 = vector.load %arg12[%c0_105, %c34_106] : memref<64x162xf32, #tpu.memory_space<vmem>>, vector<64x128xf32>
    %143 = vector.extract_strided_slice %39 {offsets = [0, 0], sizes = [1, 128], strides = [1, 1]} : vector<1x160xi1> to vector<1x128xi1>
    %cst_107 = arith.constant 0.000000e+00 : f32
    %144 = vector.shape_cast %143 : vector<1x128xi1> to vector<1x128xi1>
    %145 = vector.broadcast %144 : vector<1x128xi1> to vector<64x128xi1>
    %146 = vector.broadcast %cst_107 : f32 to vector<64x128xf32>
    %147 = arith.select %145, %142, %146 : vector<64x128xi1>, vector<64x128xf32>
    %c512_108 = arith.constant 512 : index
    %c0_109 = arith.constant 0 : index
    %148 = vector.load %arg11[%c512_108, %c0_109] : memref<576x160xf32, #tpu.memory_space<vmem>>, vector<64x128xf32>
    tpu.vector_store %arg11[%c512_108, %c0_109], %147 {strides = array<i32>} : memref<576x160xf32, #tpu.memory_space<vmem>>, vector<64x128xf32>,
    %c0_110 = arith.constant 0 : index
    %c0_111 = arith.constant 0 : index
    %149 = vector.load %arg7[%c0_110, %c0_111] : memref<64x576xf32, #tpu.memory_space<vmem>>, vector<64x576xf32>
    %c0_112 = arith.constant 0 : index
    %c0_113 = arith.constant 0 : index
    %150 = vector.load %arg11[%c0_112, %c0_113] : memref<576x160xf32, #tpu.memory_space<vmem>>, vector<576x128xf32>
    %cst_114 = arith.constant dense<0.000000e+00> : vector<64x128xf32>
    %151 = tpu.matmul %149, %150, %cst_114 {dimension_numbers = #tpu.dot_dimension_numbers<[1], [0], [0], [1], [0, 0, 1, 1], [], []>} : vector<64x576xf32>, vector<576x128xf32>, vector<64x128xf32> -> vector<64x128xf32>
    %c0_115 = arith.constant 0 : index
    %c0_116 = arith.constant 0 : index
    %152 = vector.load %arg8[%c0_115, %c0_116] : memref<64x1xf32, #tpu.memory_space<vmem>>, vector<64x1xf32>
    %153 = vector.broadcast %152 : vector<64x1xf32> to vector<64x128xf32>
    %154 = arith.addf %151, %153 : vector<64x128xf32>
    %cst_117 = arith.constant 1.000000e+00 : f32
    %155 = vector.broadcast %cst_117 : f32 to vector<64x128xf32>
    %156 = arith.mulf %154, %155 : vector<64x128xf32>
    %c0_118 = arith.constant 0 : index
    %c0_119 = arith.constant 0 : index
    %c0_120 = arith.constant 0 : index
    %157 = vector.load %arg2[%c0_118, %c0_119, %c0_120] : memref<1x64x128xf32, #tpu.memory_space<vmem>>, vector<1x64x128xf32>
    %158 = vector.shape_cast %157 : vector<1x64x128xf32> to vector<64x128xf32>
    %159 = arith.addf %156, %158 : vector<64x128xf32>
    %c0_121 = arith.constant 0 : index
    %c0_122 = arith.constant 0 : index
    %c0_123 = arith.constant 0 : index
    %160 = vector.load %arg9[%c0_121, %c0_122, %c0_123] : memref<1x64x128xf32, #tpu.memory_space<vmem>>, vector<1x64x128xf32>
    %161 = vector.shape_cast %160 : vector<1x64x128xf32> to vector<64x128xf32>
    %162 = vector.shape_cast %159 : vector<64x128xf32> to vector<1x64x128xf32>
    tpu.vector_store %arg9[%c0_121, %c0_122, %c0_123], %162 {strides = array<i32>} : memref<1x64x128xf32, #tpu.memory_space<vmem>>, vector<1x64x128xf32>,
    return
  }
  func.func @transform_0(%arg0: i32, %arg1: i32) -> (i32, i32, i32) {
    %c0_i32 = arith.constant 0 : i32
    %c0_i32_0 = arith.constant 0 : i32
    return %arg0, %c0_i32, %arg1 : i32, i32, i32
  }
  func.func @transform_1(%arg0: i32, %arg1: i32) -> (i32, i32, i32, i32) {
    %c0_i32 = arith.constant 0 : i32
    %c0_i32_0 = arith.constant 0 : i32
    %c0_i32_1 = arith.constant 0 : i32
    return %arg0, %arg1, %c0_i32, %c0_i32_0 : i32, i32, i32, i32
  }
  func.func @transform_2(%arg0: i32, %arg1: i32) -> (i32, i32, i32, i32) {
    %c0_i32 = arith.constant 0 : i32
    %c0_i32_0 = arith.constant 0 : i32
    %c0_i32_1 = arith.constant 0 : i32
    return %arg0, %arg1, %c0_i32, %c0_i32_0 : i32, i32, i32, i32
  }
  func.func @transform_3(%arg0: i32, %arg1: i32) -> (i32, i32) {
    %c0_i32 = arith.constant 0 : i32
    %c0_i32_0 = arith.constant 0 : i32
    %c0_i32_1 = arith.constant 0 : i32
    return %c0_i32, %c0_i32_0 : i32, i32
  }
  func.func @transform_4(%arg0: i32, %arg1: i32) -> (i32, i32) {
    %c0_i32 = arith.constant 0 : i32
    %c0_i32_0 = arith.constant 0 : i32
    %c0_i32_1 = arith.constant 0 : i32
    return %c0_i32, %c0_i32_0 : i32, i32
  }
  func.func @transform_5(%arg0: i32, %arg1: i32) -> (i32, i32) {
    %c0_i32 = arith.constant 0 : i32
    %c0_i32_0 = arith.constant 0 : i32
    %c0_i32_1 = arith.constant 0 : i32
    return %c0_i32, %c0_i32_0 : i32, i32
  }
  func.func @transform_6(%arg0: i32, %arg1: i32) -> (i32, i32) {
    %c0_i32 = arith.constant 0 : i32
    %c0_i32_0 = arith.constant 0 : i32
    %c0_i32_1 = arith.constant 0 : i32
    return %c0_i32, %c0_i32_0 : i32, i32
  }
  func.func @transform_7(%arg0: i32, %arg1: i32) -> (i32, i32, i32) {
    %c0_i32 = arith.constant 0 : i32
    %c0_i32_0 = arith.constant 0 : i32
    return %arg0, %c0_i32, %arg1 : i32, i32, i32
  }
}

</mosaic_0001>

<bundles_post_ra>
// kernel: tpu_custom_call.1
= control target key start
LH: loop header
LB: loop body
LE: loop exit
PB: predicated region body
PF: predicated region fallthrough
CT: control target
= control target key end

     0   :  { %s6366_s0 = inlined_call_operand.vmem [shape: f32[2,64,512], index: 0, kind: input, shape index: {}]   ;;  %s6367_s1 = inlined_call_operand.vmem [shape: f32[2,4,64,32], index: 1, kind: input, shape index: {}]   ;;  %s6368_s2 = inlined_call_operand.vmem [shape: f32[2,4,64,32], index: 2, kind: input, shape index: {}]   ;;  %s6369_s3 = inlined_call_operand.vmem [shape: f32[64,576], index: 3, kind: input, shape index: {}]   ;;  %s6370_s4 = inlined_call_operand.vmem [shape: f32[64,1], index: 4, kind: input, shape index: {}]   ;;  %s6371_s5 = inlined_call_operand.vmem [shape: f32[64,576], index: 5, kind: input, shape index: {}]   ;;  %s6372_s6 = inlined_call_operand.vmem [shape: f32[64,1], index: 6, kind: input, shape index: {}]   ;;  %s6373_s7 = inlined_call_operand.hbm [shape: f32[2,64,512], index: 7, kind: output, shape index: {}]  }
   0x1   :  { %6387 = sst [smem:[#allocation13_spill]] %s6366_s0 }
   0x2   :  { %12 = vsyncpa [#allocation7], 0 }
   0x3   :  { %14 = vsyncpa [#allocation7 + $0x1], 0  ;;  %s4659_s24 = smov 0   ;;  %s4661_s25 = smov 0  }
   0x4   :  { %s4663_s26 = smov 0   ;;  %s4665_s27 = smov 0  }
   0x5   :  { %s4667_s28 = smov 0   ;;  %s4669_s29 = smov 0  }
   0x6   :  { %s4671_s30 = smov 0   ;;  %s4673_s8 = smov 0  }
   0x7 LB: > { %6388 = sst [smem:[#allocation9_spill]] %s4591_s29  ;;  %s3790_s9 = sadd.s32 4294967295, %s4599_s8   ;;  %s4599_s8 = sphi %s4673_s8, %s20_s8   ;;  %s4595_s30 = sphi %s4671_s30, %s6416_s30   ;;  %s4591_s29 = sphi %s4669_s29, %s6415_s29   ;;  %s4587_s28 = sphi %s4667_s28, %s6414_s28   ;;  %s4583_s27 = sphi %s4665_s27, %s6413_s27   ;;  %s4579_s26 = sphi %s4663_s26, %s6419_s26   ;;  %s4575_s25 = sphi %s4661_s25, %s6418_s25   ;;  %s4571_s24 = sphi %s4659_s24, %s6417_s24  }
   0x8   : > { %6389 = sst [smem:[#allocation10_spill]] %s4595_s30  ;;  %s3791_s10 = sadd.s32 4294967294, %s4599_s8  }
   0x9   : > { %s29_s11 = sadd.s32 1, %s4591_s29  ;;  %s32_s12 = sadd.s32 1, %s4595_s30 }
   0xa   : > { %p30_p0 = scmp.ge.s32.totalorder %s29_s11, 4  ;;  %p48_p1 = scmp.ne.s32.totalorder %s4579_s26, %s4575_s25 }
   0xb   : > { %p49_p2 = scmp.eq.s32.totalorder %s4599_s8, 0  ;;  %p220_p5 = scmp.eq.s32.totalorder %s3790_s9, 7 }
   0xc   : > { %s6421_s11 = smov (%p30_p0, %s29_s11), 0  ;;  %s6423_s12 = smov (!%p30_p0, %s32_s12), %s4595_s30 }
   0xd   : > { %6390 = sst [smem:[#allocation11_spill]] %s6421_s11  ;;  %s37_s13 = ssub.s32 %s4591_s29, %s6421_s11 }
   0xe   : > { %p4711_p3 = por %p49_p2, %p48_p1  ;;  %p34_p4 = scmp.ge.s32.totalorder %s6423_s12, 2 }
   0xf   : > { %p225_p6 = scmp.ne.s32.totalorder %s4575_s25, %s4571_s24  ;;  %p226_p7 = scmp.eq.s32.totalorder %s3791_s10, 7 }
  0x10   : > { %s6425_s12 = smov (%p34_p4, %s6423_s12), 0  ;;  %p4719_p8 = por %p220_p5, %p48_p1 }
  0x11   : > { %6392 = sst [smem:[#allocation12_spill]] %s6425_s12  ;;  %p4723_p9 = por %p226_p7, %p225_p6 }
  0x12   : > { %s36_s17 = ssub.s32 %s4595_s30, %s6425_s12  ;;  %s41_s19 = sadd.s32 1, %s4579_s26 }
  0x13   : > { %s38_s18 = sor.u32 %s37_s13, %s36_s17  ;;  %p3793_p11 = scmp.ge.s32.totalorder %s4599_s8, 8 }
  0x14   : > { %p39_p10 = scmp.eq.s32.totalorder %s38_s18, 0 }
  0x15   : > { %254 = sbr.rel (%p3793_p11) target bundleno = 46 (0x2e), region = 32 }
  0x16   : > { %s4731_s20 = scalar_select %p39_p10, %s4579_s26, %s41_s19  }
  0x1c   : > { %257 = sbr.rel (!%p4711_p3) target bundleno = 46 (0x2e), region = 36  ;;  %s259_s21 = sand.u32 (%p4711_p3), 1, %s4579_s26  }
  0x1d   : > { %s3795_s22 = sshll.u32 (%p4711_p3), %s4595_s30, 5  ;;  %s3794_s23 = sshll.u32 (%p4711_p3), %s259_s21, 6 }
  0x1e   : > { %s263_s9 = sadd.s32 (%p4711_p3), %s4591_s29, %s3795_s22  ;;  %s6395_s0 = sld [smem:[#allocation13_spill]] (%p4711_p3) }
  0x1f   : > { %s3796_s10 = sshll.u32 (%p4711_p3), %s263_s9, 3  ;;  %s261_s18 = scalar_lea.vmem (%p4711_p3), [#allocation5], %s3794_s23 }
  0x24   : > { %s265_s17 = scalar_lea.vmem %s6395_s0, %s3796_s10 }
  0x25   : > { %v307_v0 = vld [vmem:[%s265_s17] sm:$0xff] }
  0x26   : > { %v309_v1 = vld [vmem:[%s265_s17 + $0x20] sm:$0xff]  ;;  %308 = vst [vmem:[%s261_s18] sm:$0xff] %v307_v0 }
  0x27   : > { %v311_v2 = vld [vmem:[%s265_s17 + $0x40] sm:$0xff]  ;;  %310 = vst [vmem:[%s261_s18 + $0x8] sm:$0xff] %v309_v1 }
  0x28   : > { %312 = vst [vmem:[%s261_s18 + $0x10] sm:$0xff] %v311_v2  ;;  %v313_v3 = vld [vmem:[%s265_s17 + $0x60] sm:$0xff] }
  0x29   : > { %v315_v4 = vld [vmem:[%s265_s17 + $0x80] sm:$0xff]  ;;  %314 = vst [vmem:[%s261_s18 + $0x18] sm:$0xff] %v313_v3 }
  0x2a   : > { %v317_v5 = vld [vmem:[%s265_s17 + $0xa0] sm:$0xff]  ;;  %316 = vst [vmem:[%s261_s18 + $0x20] sm:$0xff] %v315_v4 }
  0x2b   : > { %318 = vst [vmem:[%s261_s18 + $0x28] sm:$0xff] %v317_v5  ;;  %v319_v6 = vld [vmem:[%s265_s17 + $0xc0] sm:$0xff] }
  0x2c   : > { %v321_v7 = vld [vmem:[%s265_s17 + $0xe0] sm:$0xff]  ;;  %320 = vst [vmem:[%s261_s18 + $0x30] sm:$0xff] %v319_v6 }
  0x2d   : > { %322 = vst [vmem:[%s261_s18 + $0x38] sm:$0xff] %v321_v7 }
  0x2e PF: > { %p3797_p12 = scmp.ge.s32.totalorder %s4599_s8, 1  ;;  %p351_p13 = scmp.lt.s32.totalorder %s4599_s8, 9 }
  0x30   : > { %p352_p0 = pnand %p3797_p12, %p351_p13 }
  0x31   : > { %s6375_s12 = sand.u32 (!%p352_p0), 1, %s4575_s25   ;;  %vm425_vm0 = vcmask (!%p352_p0), 7168   ;;  %p407_p1 = scmp.lt.s32.totalorder (!%p352_p0), %s4587_s28, 1  ;;  %v4601_v8 = vmov (!%p352_p0), 0.0   ;;  %vm525_vm1 = vcmask (!%p352_p0), 269312   ;;  %v599_v34 = vlaneseq (!%p352_p0) }
  0x32   : > { %355 = sbr.rel (%p352_p0) target bundleno = 1580 (0x62c), region = 82  ;;  %s4747_s14 = sshll.u32 (!%p352_p0), %s6375_s12, 6  ;;  %426 = vst.msk [vmem:[#allocation2] sm:$0xff] (!%p352_p0), %vm425_vm0, %v4601_v8  ;;  %427 = vst.msk [vmem:[#allocation2 + $0x10] sm:$0xff] (!%p352_p0), %vm425_vm0, %v4601_v8  ;;  %2162 = vmatprep.mubr.f32.mxu1 (!%p352_p0), %v4601_v8  ;;  %vm474_vm2 = vcmask (!%p352_p0), 269320   ;;  %vm581_vm3 = vcmask (!%p352_p0), 531720  }
  0x33   : > { %428 = vst.msk [vmem:[#allocation2 + $0x20] sm:$0xff] (!%p352_p0), %vm425_vm0, %v4601_v8  ;;  %429 = vst.msk [vmem:[#allocation2 + $0x30] sm:$0xff] (!%p352_p0), %vm425_vm0, %v4601_v8  ;;  %s4784_s19 = scalar_lea.vmem (!%p352_p0), [#allocation5], %s4747_s14  ;;  %s4602_s22 = smov (!%p352_p0), 33   ;;  %v4851_v36 = vand.u32 (!%p352_p0), 127, %v599_v34  ;;  %vm523_vm4 = vcmask (!%p352_p0), 1047816  }
  0x34   : > { %430 = vst.msk [vmem:[#allocation2 + $0x40] sm:$0xff] (!%p352_p0), %vm425_vm0, %v4601_v8  ;;  %431 = vst.msk [vmem:[#allocation2 + $0x50] sm:$0xff] (!%p352_p0), %vm425_vm0, %v4601_v8  ;;  %v483_v9 = vld [vmem:[%s4784_s19] sm:$0xff] (!%p352_p0)  ;;  %p409_p2 = scmp.lt.s32.totalorder (!%p352_p0), %s4583_s27, 3  ;;  %v484_v10 = vld [vmem:[%s4784_s19 + $0x8] sm:$0xff] (!%p352_p0)  ;;  %vm590_vm5 = vcmask (!%p352_p0), 540168  }
  0x35   : > { %432 = vst.msk [vmem:[#allocation2 + $0x60] sm:$0xff] (!%p352_p0), %vm425_vm0, %v4601_v8  ;;  %433 = vst.msk [vmem:[#allocation2 + $0x70] sm:$0xff] (!%p352_p0), %vm425_vm0, %v4601_v8  ;;  %499 = vrot.lane.b32.xlu0 (!%p352_p0), %v483_v9, %s4602_s22  ;;  %v485_v14 = vld [vmem:[%s4784_s19 + $0x10] sm:$0xff] (!%p352_p0)  ;;  %v486_v17 = vld [vmem:[%s4784_s19 + $0x18] sm:$0xff] (!%p352_p0)  ;;  %v4854_v37 = vadd.s32 (!%p352_p0), 128, %v4851_v36  ;;  %v606_v40 = vand.u32 (!%p352_p0), 15, %v4851_v36 }
  0x36   : > { %2227 = vst.msk [vmem:[#allocation4] sm:$0xff] (!%p352_p0), %vm425_vm0, %v4601_v8  ;;  %2228 = vst.msk [vmem:[#allocation4 + $0x10] sm:$0xff] (!%p352_p0), %vm425_vm0, %v4601_v8  ;;  %v487_v20 = vld [vmem:[%s4784_s19 + $0x20] sm:$0xff] (!%p352_p0)  ;;  %v488_v23 = vld [vmem:[%s4784_s19 + $0x28] sm:$0xff] (!%p352_p0)  ;;  %vm675_vm8 = vcmask (!%p352_p0), 261120   ;;  %s4606_s30 = smov (!%p352_p0), 112  }
  0x37   : > { %2229 = vst.msk [vmem:[#allocation4 + $0x20] sm:$0xff] (!%p352_p0), %vm425_vm0, %v4601_v8  ;;  %2230 = vst.msk [vmem:[#allocation4 + $0x30] sm:$0xff] (!%p352_p0), %vm425_vm0, %v4601_v8  ;;  %v489_v26 = vld [vmem:[%s4784_s19 + $0x30] sm:$0xff] (!%p352_p0)  ;;  %v490_v29 = vld [vmem:[%s4784_s19 + $0x38] sm:$0xff] (!%p352_p0)  ;;  %v613_v41 = vand.u32 (!%p352_p0), 15, %v4854_v37  ;;  %vm4868_vm6 = vcmp.ge.s32.totalorder (!%p352_p0), %v606_v40, 1 }
  0x38   : > { %2231 = vst.msk [vmem:[#allocation4 + $0x40] sm:$0xff] (!%p352_p0), %vm425_vm0, %v4601_v8  ;;  %2232 = vst.msk [vmem:[#allocation4 + $0x50] sm:$0xff] (!%p352_p0), %vm425_vm0, %v4601_v8  ;;  %s6385_s11 = smov (!%p352_p0), 111   ;;  %vm755_vm10 = vcmask (!%p352_p0), 1039360   ;;  %vm864_vm12 = vcmask (!%p352_p0), 1031168   ;;  %vm5180_vm13 = vcmp.lt.s32.totalorder (!%p352_p0), %v606_v40, 15 }
  0x39   : > { %2233 = vst.msk [vmem:[#allocation4 + $0x60] sm:$0xff] %vm425_vm0, %v4601_v8  ;;  %2234 = vst.msk [vmem:[#allocation4 + $0x70] sm:$0xff] %vm425_vm0, %v4601_v8  ;;  %s408_s21 = scalar_select %p407_p1, %s4587_s28, 1  ;;  %501 = vrot.lane.b32.xlu0 %v484_v10, %s4602_s22  ;;  %vm4874_vm7 = vcmp.ge.s32.totalorder %v613_v41, 1  ;;  %vm5174_vm11 = vcmp.lt.s32.totalorder %v613_v41, 15  ;;  %vm985_vm15 = vcmask 916480  }
  0x3a   : > { %s410_s9 = scalar_select %p409_p2, %s4583_s27, 3  ;;  %vm4952_vm9 = vmpackc.low %vm4868_vm6, %vm4868_vm6  ;;  %vm1558_vm6 = vcmask 769024  }
  0x3b   : > { %s3801_s23 = sshll.u32 %s408_s21, 5  ;;  %s4603_s21 = smov 1   ;;  %vm5222_vm14 = vmpackc.low %vm5180_vm13, %vm5180_vm13 }
  0x3c   : > { %s3800_s10 = sshll.u32 %s410_s9, 3  ;;  %s4609_s9 = smov 96  }
  0x3d   : > { %s413_s13 = sadd.s32 %s3801_s23, %s3800_s10  ;;  %s6379_s23 = smov 110  }
  0x3e   : > { %s3802_s17 = sshll.u32 %s413_s13, 3  ;;  %s6383_s10 = smov 95  }
  0x3f   : > { %s4798_s0 = scalar_lea.vmem %s6367_s1, %s3802_s17  ;;  %s4803_s29 = scalar_lea.vmem %s6368_s2, %s3802_s17 }
  0x40   : > { %v434_v11 = vld [vmem:[%s4798_s0] sm:$0xff]  ;;  %v435_v13 = vld [vmem:[%s4798_s0 + $0x8] sm:$0xff]  ;;  %v436_v16 = vld [vmem:[%s4798_s0 + $0x10] sm:$0xff]  ;;  %s6381_s13 = smov 94   ;;  %p3814_p3 = scmp.ne.s32.totalorder %s4583_s27, 0 }
  0x41   : > { %v541_v12 = vld [vmem:[%s4803_s29] sm:$0xff]  ;;  %450 = vrot.lane.b32.xlu1 %v434_v11, %s4603_s21  ;;  %v542_v15 = vld [vmem:[%s4803_s29 + $0x8] sm:$0xff]  ;;  %v543_v18 = vld [vmem:[%s4803_s29 + $0x10] sm:$0xff]  ;;  %vm2337_vm13 = vcmask (!%p3814_p3), 138248  }
  0x42   : > { %557 = vrot.lane.b32.xlu0 %v541_v12, %s4602_s22  ;;  %v437_v19 = vld [vmem:[%s4798_s0 + $0x18] sm:$0xff]  ;;  %v438_v22 = vld [vmem:[%s4798_s0 + $0x20] sm:$0xff]  ;;  %v439_v25 = vld [vmem:[%s4798_s0 + $0x28] sm:$0xff] }
  0x43   : > { %v544_v21 = vld [vmem:[%s4803_s29 + $0x18] sm:$0xff]  ;;  %v545_v24 = vld [vmem:[%s4803_s29 + $0x20] sm:$0xff]  ;;  %v546_v27 = vld [vmem:[%s4803_s29 + $0x28] sm:$0xff] }
  0x44   : > { %v440_v28 = vld [vmem:[%s4798_s0 + $0x30] sm:$0xff]  ;;  %v441_v31 = vld [vmem:[%s4798_s0 + $0x38] sm:$0xff]  ;;  %s4604_s0 = smov 127  }
  0x45   : > { %452 = vrot.lane.b32.xlu1 %v435_v13, %s4603_s21  ;;  %v547_v30 = vld [vmem:[%s4803_s29 + $0x30] sm:$0xff]  ;;  %v548_v32 = vld [vmem:[%s4803_s29 + $0x38] sm:$0xff]  ;;  %s4605_s29 = smov 126  }
  0x46   : > { %503 = vrot.lane.b32.xlu0 %v485_v14, %s4602_s22 }
  0x49   : > { %559 = vrot.lane.b32.xlu1 %v542_v15, %s4602_s22 }
  0x4a   : > { %454 = vrot.lane.b32.xlu0 %v436_v16, %s4603_s21 }
  0x4d   : > { %505 = vrot.lane.b32.xlu1 %v486_v17, %s4602_s22 }
  0x4e   : > { %561 = vrot.lane.b32.xlu0 %v543_v18, %s4602_s22 }
  0x51   : > { %456 = vrot.lane.b32.xlu1 %v437_v19, %s4603_s21 }
  0x52   : > { %507 = vrot.lane.b32.xlu0 %v487_v20, %s4602_s22 }
  0x55   : > { %563 = vrot.lane.b32.xlu1 %v544_v21, %s4602_s22 }
  0x56   : > { %458 = vrot.lane.b32.xlu0 %v438_v22, %s4603_s21 }
  0x59   : > { %509 = vrot.lane.b32.xlu1 %v488_v23, %s4602_s22 }
  0x5a   : > { %565 = vrot.lane.b32.xlu0 %v545_v24, %s4602_s22 }
  0x5d   : > { %460 = vrot.lane.b32.xlu1 %v439_v25, %s4603_s21 }
  0x5e   : > { %511 = vrot.lane.b32.xlu0 %v489_v26, %s4602_s22 }
  0x61   : > { %567 = vrot.lane.b32.xlu1 %v546_v27, %s4602_s22 }
  0x62   : > { %462 = vrot.lane.b32.xlu0 %v440_v28, %s4603_s21 }
  0x65   : > { %513 = vrot.lane.b32.xlu1 %v490_v29, %s4602_s22 }
  0x66   : > { %569 = vrot.lane.b32.xlu0 %v547_v30, %s4602_s22 }
  0x69   : > { %464 = vrot.lane.b32.xlu1 %v441_v31, %s4603_s21 }
  0x6d   : > { %571 = vrot.lane.b32.xlu1 %v548_v32, %s4602_s22 }
  0xa7   : > { %v500_v33 = vpop.permute.xlu0 %499 }
  0xa8   : > { %526 = vst.msk [vmem:[#allocation2 + $0x8] sm:$0xff] %vm525_vm1, %v500_v33 }
  0xab   : > { %v502_v35 = vpop.permute.xlu0 %501 }
  0xac   : > { %528 = vst.msk [vmem:[#allocation2 + $0x18] sm:$0xff] %vm525_vm1, %v502_v35 }
  0xb3   : > { %v451_v38 = vpop.permute.xlu1 %450 }
  0xb4   : > { %v558_v39 = vpop.permute.xlu0 %557  ;;  %475 = vst.msk [vmem:[#allocation2] sm:$0xff] %vm474_vm2, %v451_v38 }
  0xb5   : > { %582 = vst.msk [vmem:[#allocation2 + $0x8] sm:$0xff] %vm581_vm3, %v558_v39 }
  0xb6   : > { %524 = vst.msk [vmem:[#allocation2] sm:$0xff] %vm523_vm4, %v500_v33 }
  0xb7   : > { %591 = vst.msk [vmem:[#allocation2 + $0x8] sm:$0xff] %vm590_vm5, %v4601_v8  ;;  %v453_v42 = vpop.permute.xlu1 %452 }
  0xb8   : > { %v504_v43 = vpop.permute.xlu0 %503  ;;  %476 = vst.msk [vmem:[#allocation2 + $0x10] sm:$0xff] %vm474_vm2, %v453_v42 }
  0xb9   : > { %530 = vst.msk [vmem:[#allocation2 + $0x28] sm:$0xff] %vm525_vm1, %v504_v43 }
  0xba   : > { %527 = vst.msk [vmem:[#allocation2 + $0x10] sm:$0xff] %vm523_vm4, %v502_v35 }
  0xbb   : > { %v560_v46 = vpop.permute.xlu1 %559 }
  0xbc   : > { %v455_v47 = vpop.permute.xlu0 %454  ;;  %583 = vst.msk [vmem:[#allocation2 + $0x18] sm:$0xff] %vm581_vm3, %v560_v46 }
  0xbd   : > { %v4879_v48 = vld [vmem:[#allocation2] sm:$0xff]  ;;  %477 = vst.msk [vmem:[#allocation2 + $0x20] sm:$0xff] %vm474_vm2, %v455_v47  ;;  %v1616_v47 = vld [vmem:[%s6369_s3 + $0x8] sm:$0xff] }
  0xbe   : > { %v4882_v49 = vld [vmem:[#allocation2 + $0x8] sm:$0xff]  ;;  %592 = vst.msk [vmem:[#allocation2 + $0x18] sm:$0xff] %vm590_vm5, %v4601_v8  ;;  %723 = vrot.lane.b32.xlu0 %v4879_v48, %s4604_s0  ;;  %1936 = vmatprep.mubr.f32.mxu0 %v1616_v47 }
  0xbf   : > { %529 = vst.msk [vmem:[#allocation2 + $0x20] sm:$0xff] %vm523_vm4, %v504_v43  ;;  %725 = vrot.lane.b32.xlu1 %v4882_v49, %s4604_s0  ;;  %v659_v50 = vsel %vm4874_vm7, %v4882_v49, 0.0  ;;  %v506_v51 = vpop.permute.xlu1 %505 }
  0xc0   : > { %676 = vst.msk [vmem:[#allocation3 + $0x8] sm:$0xff] %vm675_vm8, %v659_v50  ;;  %v562_v52 = vpop.permute.xlu0 %561 }
  0xc1   : > { %532 = vst.msk [vmem:[#allocation2 + $0x38] sm:$0xff] %vm525_vm1, %v506_v51  ;;  %v4896_v53 = vld [vmem:[#allocation2 + $0x10] sm:$0xff] }
  0xc2   : > { %584 = vst.msk [vmem:[#allocation2 + $0x28] sm:$0xff] %vm581_vm3, %v562_v52  ;;  %727 = vrot.lane.b32.xlu0 %v4896_v53, %s4604_s0  ;;  %v4350_v12 = vpack.c.bf16 %v4896_v53, %v4879_v48 }
  0xc3   : > { %593 = vst.msk [vmem:[#allocation2 + $0x28] sm:$0xff] %vm590_vm5, %v4601_v8  ;;  %v457_v54 = vpop.permute.xlu1 %456 }
  0xc4   : > { %v508_v55 = vpop.permute.xlu0 %507  ;;  %478 = vst.msk [vmem:[#allocation2 + $0x30] sm:$0xff] %vm474_vm2, %v457_v54 }
  0xc5   : > { %v4906_v57 = vld [vmem:[#allocation2 + $0x18] sm:$0xff]  ;;  %534 = vst.msk [vmem:[#allocation2 + $0x48] sm:$0xff] %vm525_vm1, %v508_v55 }
  0xc6   : > { %v4903_v56 = vld [vmem:[#allocation2 + $0x20] sm:$0xff]  ;;  %531 = vst.msk [vmem:[#allocation2 + $0x30] sm:$0xff] %vm523_vm4, %v506_v51  ;;  %729 = vrot.lane.b32.xlu1 %v4906_v57, %s4604_s0  ;;  %v661_v58 = vsel %vm4874_vm7, %v4906_v57, 0.0 }
  0xc7   : > { %731 = vrot.lane.b32.xlu0 %v4903_v56, %s4604_s0  ;;  %678 = vst.msk [vmem:[#allocation3 + $0x18] sm:$0xff] %vm675_vm8, %v661_v58  ;;  %v564_v59 = vpop.permute.xlu1 %563  ;;  %v1656_v1 = vld [vmem:[#allocation3 + $0x8] sm:$0xff] }
  0xc8   : > { %v459_v60 = vpop.permute.xlu0 %458  ;;  %585 = vst.msk [vmem:[#allocation2 + $0x38] sm:$0xff] %vm581_vm3, %v564_v59 }
  0xc9   : > { %479 = vst.msk [vmem:[#allocation2 + $0x40] sm:$0xff] %vm474_vm2, %v459_v60 }
  0xca   : > { %v4918_v61 = vld [vmem:[#allocation2 + $0x28] sm:$0xff]  ;;  %594 = vst.msk [vmem:[#allocation2 + $0x38] sm:$0xff] %vm590_vm5, %v4601_v8 }
  0xcb   : > { %v663_v62 = vsel %vm4874_vm7, %v4918_v61, 0.0  ;;  %533 = vst.msk [vmem:[#allocation2 + $0x40] sm:$0xff] %vm523_vm4, %v508_v55  ;;  %733 = vrot.lane.b32.xlu1 %v4918_v61, %s4604_s0  ;;  %v510_v63 = vpop.permute.xlu1 %509 }
  0xcc   : > { %680 = vst.msk [vmem:[#allocation3 + $0x28] sm:$0xff] %vm675_vm8, %v663_v62  ;;  %v566_v0 = vpop.permute.xlu0 %565 }
  0xcd   : > { %v4931_v2 = vld [vmem:[#allocation2 + $0x30] sm:$0xff]  ;;  %536 = vst.msk [vmem:[#allocation2 + $0x58] sm:$0xff] %vm525_vm1, %v510_v63 }
  0xce   : > { %586 = vst.msk [vmem:[#allocation2 + $0x48] sm:$0xff] %vm581_vm3, %v566_v0  ;;  %735 = vrot.lane.b32.xlu0 %v4931_v2, %s4604_s0  ;;  %v1658_v3 = vld [vmem:[#allocation3 + $0x18] sm:$0xff]  ;;  %v4353_v27 = vpack.c.bf16 %v4931_v2, %v4903_v56 }
  0xcf   : > { %595 = vst.msk [vmem:[#allocation2 + $0x48] sm:$0xff] %vm590_vm5, %v4601_v8  ;;  %v3985_v4 = vpack.c.bf16 %v1658_v3, %v1656_v1  ;;  %v461_v5 = vpop.permute.xlu1 %460 }
  0xd0   : > { %v512_v6 = vpop.permute.xlu0 %511  ;;  %480 = vst.msk [vmem:[#allocation2 + $0x50] sm:$0xff] %vm474_vm2, %v461_v5 }
  0xd1   : > { %v4939_v7 = vld [vmem:[#allocation2 + $0x38] sm:$0xff]  ;;  %3986 = vmatprep.subr.bf16.mxu0 %v3985_v4  ;;  %538 = vst.msk [vmem:[#allocation2 + $0x68] sm:$0xff] %vm525_vm1, %v512_v6 }
  0xd2   : > { %v4941_v9 = vld [vmem:[#allocation2 + $0x40] sm:$0xff]  ;;  %v665_v10 = vsel %vm4874_vm7, %v4939_v7, 0.0  ;;  %535 = vst.msk [vmem:[#allocation2 + $0x50] sm:$0xff] %vm523_vm4, %v510_v63  ;;  %4351 = vmatpush1.bf16.msk.msra.mxu0 %vm4952_vm9, %v4350_v12  ;;  %737 = vrot.lane.b32.xlu1 %v4939_v7, %s4604_s0 }
  0xd3   : > { %682 = vst.msk [vmem:[#allocation3 + $0x38] sm:$0xff] %vm675_vm8, %v665_v10  ;;  %739 = vrot.lane.b32.xlu0 %v4941_v9, %s4604_s0  ;;  %v568_v13 = vpop.permute.xlu1 %567  ;;  %v1660_v19 = vld [vmem:[#allocation3 + $0x28] sm:$0xff] }
  0xd4   : > { %v463_v14 = vpop.permute.xlu0 %462  ;;  %587 = vst.msk [vmem:[#allocation2 + $0x58] sm:$0xff] %vm581_vm3, %v568_v13 }
  0xd5   : > { %481 = vst.msk [vmem:[#allocation2 + $0x60] sm:$0xff] %vm474_vm2, %v463_v14 }
  0xd6   : > { %v4965_v15 = vld [vmem:[#allocation2 + $0x48] sm:$0xff]  ;;  %596 = vst.msk [vmem:[#allocation2 + $0x58] sm:$0xff] %vm590_vm5, %v4601_v8 }
  0xd7   : > { %v667_v16 = vsel %vm4874_vm7, %v4965_v15, 0.0  ;;  %537 = vst.msk [vmem:[#allocation2 + $0x60] sm:$0xff] %vm523_vm4, %v512_v6  ;;  %741 = vrot.lane.b32.xlu1 %v4965_v15, %s4604_s0  ;;  %v514_v17 = vpop.permute.xlu1 %513 }
  0xd8   : > { %684 = vst.msk [vmem:[#allocation3 + $0x48] sm:$0xff] %vm675_vm8, %v667_v16  ;;  %v570_v18 = vpop.permute.xlu0 %569 }
  0xd9   : > { %v4978_v20 = vld [vmem:[#allocation2 + $0x50] sm:$0xff]  ;;  %540 = vst.msk [vmem:[#allocation2 + $0x78] sm:$0xff] %vm525_vm1, %v514_v17 }
  0xda   : > { %588 = vst.msk [vmem:[#allocation2 + $0x68] sm:$0xff] %vm581_vm3, %v570_v18  ;;  %743 = vrot.lane.b32.xlu0 %v4978_v20, %s4604_s0  ;;  %v1662_v21 = vld [vmem:[#allocation3 + $0x38] sm:$0xff]  ;;  %v4356_v39 = vpack.c.bf16 %v4978_v20, %v4941_v9 }
  0xdb   : > { %597 = vst.msk [vmem:[#allocation2 + $0x68] sm:$0xff] %vm590_vm5, %v4601_v8  ;;  %v3989_v22 = vpack.c.bf16 %v1662_v21, %v1660_v19  ;;  %v465_v23 = vpop.permute.xlu1 %464 }
  0xdc   : > { %482 = vst.msk [vmem:[#allocation2 + $0x70] sm:$0xff] %vm474_vm2, %v465_v23  ;;  %vm1106_vm2 = vcmask 908288  }
  0xdd   : > { %v4986_v24 = vld [vmem:[#allocation2 + $0x58] sm:$0xff]  ;;  %3990 = vmatprep.subr.bf16.mxu0 %v3989_v22  ;;  %539 = vst.msk [vmem:[#allocation2 + $0x70] sm:$0xff] %vm523_vm4, %v514_v17  ;;  %vm1332_vm4 = vcmask 785408  }
  0xde   : > { %v4988_v25 = vld [vmem:[#allocation2 + $0x60] sm:$0xff]  ;;  %v669_v26 = vsel %vm4874_vm7, %v4986_v24, 0.0  ;;  %4354 = vmatpush1.bf16.msk.msra.mxu0 %vm4952_vm9, %v4353_v27  ;;  %745 = vrot.lane.b32.xlu1 %v4986_v24, %s4604_s0 }
  0xdf   : > { %686 = vst.msk [vmem:[#allocation3 + $0x58] sm:$0xff] %vm675_vm8, %v669_v26  ;;  %747 = vrot.lane.b32.xlu0 %v4988_v25, %s4604_s0  ;;  %v572_v28 = vpop.permute.xlu1 %571  ;;  %v1664_v31 = vld [vmem:[#allocation3 + $0x48] sm:$0xff] }
  0xe0   : > { %589 = vst.msk [vmem:[#allocation2 + $0x78] sm:$0xff] %vm581_vm3, %v572_v28  ;;  %vm1211_vm3 = vcmask 900096  }
  0xe1   : > { %598 = vst.msk [vmem:[#allocation2 + $0x78] sm:$0xff] %vm590_vm5, %v4601_v8  ;;  %vm1453_vm5 = vcmask 777216  }
  0xe2   : > { %v5004_v29 = vld [vmem:[#allocation2 + $0x68] sm:$0xff] }
  0xe3   : > { %v671_v30 = vsel %vm4874_vm7, %v5004_v29, 0.0  ;;  %749 = vrot.lane.b32.xlu1 %v5004_v29, %s4604_s0 }
  0xe4   : > { %688 = vst.msk [vmem:[#allocation3 + $0x68] sm:$0xff] %vm675_vm8, %v671_v30  ;;  %v5015_v32 = vld [vmem:[#allocation2 + $0x70] sm:$0xff] }
  0xe5   : > { %751 = vrot.lane.b32.xlu0 %v5015_v32, %s4604_s0  ;;  %v4359_v46 = vpack.c.bf16 %v5015_v32, %v4988_v25 }
  0xe6   : > { %v1666_v33 = vld [vmem:[#allocation3 + $0x58] sm:$0xff] }
  0xe7   : > { %v3993_v34 = vpack.c.bf16 %v1666_v33, %v1664_v31 }
  0xe8   : > { %v5019_v35 = vld [vmem:[#allocation2 + $0x78] sm:$0xff] }
  0xe9   : > { %3994 = vmatprep.subr.bf16.mxu0 %v3993_v34  ;;  %v673_v38 = vsel %vm4874_vm7, %v5019_v35, 0.0  ;;  %832 = vrot.lane.b32.xlu0 %v4879_v48, %s4605_s29 }
  0xea   : > { %4357 = vmatpush1.bf16.msk.msra.mxu0 %vm4952_vm9, %v4356_v39  ;;  %690 = vst.msk [vmem:[#allocation3 + $0x78] sm:$0xff] %vm675_vm8, %v673_v38  ;;  %753 = vrot.lane.b32.xlu1 %v5019_v35, %s4604_s0 }
  0xeb   : > { %v1668_v42 = vld [vmem:[#allocation3 + $0x68] sm:$0xff] }
  0xed   : > { %836 = vrot.lane.b32.xlu0 %v4896_v53, %s4605_s29 }
  0xee   : > { %834 = vrot.lane.b32.xlu1 %v4882_v49, %s4605_s29 }
  0xf1   : > { %840 = vrot.lane.b32.xlu0 %v4903_v56, %s4605_s29  ;;  %v1670_v43 = vld [vmem:[#allocation3 + $0x78] sm:$0xff] }
  0xf2   : > { %838 = vrot.lane.b32.xlu1 %v4906_v57, %s4605_s29  ;;  %v3997_v44 = vpack.c.bf16 %v1670_v43, %v1668_v42  ;;  %v1622_v43 = vld [vmem:[%s6369_s3 + $0x38] sm:$0xff] }
  0xf4   : > { %3998 = vmatprep.subr.bf16.mxu0 %v3997_v44 }
  0xf5   : > { %844 = vrot.lane.b32.xlu0 %v4931_v2, %s4605_s29  ;;  %4360 = vmatpush1.bf16.msk.msra.mxu0 %vm4952_vm9, %v4359_v46 }
  0xf6   : > { %842 = vrot.lane.b32.xlu1 %v4918_v61, %s4605_s29 }
  0xf9   : > { %848 = vrot.lane.b32.xlu0 %v4941_v9, %s4605_s29 }
  0xfa   : > { %846 = vrot.lane.b32.xlu1 %v4939_v7, %s4605_s29 }
  0xfd   : > { %852 = vrot.lane.b32.xlu0 %v4978_v20, %s4605_s29 }
  0xfe   : > { %850 = vrot.lane.b32.xlu1 %v4965_v15, %s4605_s29 }
 0x101   : > { %856 = vrot.lane.b32.xlu0 %v4988_v25, %s4605_s29 }
 0x102   : > { %854 = vrot.lane.b32.xlu1 %v4986_v24, %s4605_s29 }
 0x105   : > { %860 = vrot.lane.b32.xlu0 %v5015_v32, %s4605_s29 }
 0x106   : > { %858 = vrot.lane.b32.xlu1 %v5004_v29, %s4605_s29 }
 0x109   : > { %953 = vrot.lane.b32.xlu0 %v4879_v48, %s4606_s30 }
 0x10a   : > { %862 = vrot.lane.b32.xlu1 %v5019_v35, %s4605_s29 }
 0x10d   : > { %957 = vrot.lane.b32.xlu0 %v4896_v53, %s4606_s30 }
 0x10e   : > { %955 = vrot.lane.b32.xlu1 %v4882_v49, %s4606_s30 }
 0x111   : > { %961 = vrot.lane.b32.xlu0 %v4903_v56, %s4606_s30 }
 0x112   : > { %959 = vrot.lane.b32.xlu1 %v4906_v57, %s4606_s30 }
 0x115   : > { %965 = vrot.lane.b32.xlu0 %v4931_v2, %s4606_s30 }
 0x116   : > { %963 = vrot.lane.b32.xlu1 %v4918_v61, %s4606_s30 }
 0x119   : > { %969 = vrot.lane.b32.xlu0 %v4941_v9, %s4606_s30 }
 0x11a   : > { %967 = vrot.lane.b32.xlu1 %v4939_v7, %s4606_s30 }
 0x11d   : > { %973 = vrot.lane.b32.xlu0 %v4978_v20, %s4606_s30 }
 0x11e   : > { %971 = vrot.lane.b32.xlu1 %v4965_v15, %s4606_s30 }
 0x121   : > { %977 = vrot.lane.b32.xlu0 %v4988_v25, %s4606_s30 }
 0x122   : > { %975 = vrot.lane.b32.xlu1 %v4986_v24, %s4606_s30 }
 0x125   : > { %981 = vrot.lane.b32.xlu0 %v5015_v32, %s4606_s30 }
 0x126   : > { %979 = vrot.lane.b32.xlu1 %v5004_v29, %s4606_s30 }
 0x129   : > { %1074 = vrot.lane.b32.xlu0 %v4879_v48, %s6385_s11 }
 0x12a   : > { %983 = vrot.lane.b32.xlu1 %v5019_v35, %s4606_s30 }
 0x12d   : > { %1078 = vrot.lane.b32.xlu0 %v4896_v53, %s6385_s11 }
 0x12e   : > { %1076 = vrot.lane.b32.xlu1 %v4882_v49, %s6385_s11 }
 0x130   : > { %v724_v50 = vpop.permute.xlu0 %723 }
 0x131   : > { %v726_v51 = vpop.permute.xlu1 %725  ;;  %1082 = vrot.lane.b32.xlu0 %v4903_v56, %s6385_s11 }
 0x132   : > { %v756_v52 = vsel %vm755_vm10, %v724_v50, %v726_v51  ;;  %781 = vst.msk [vmem:[#allocation3 + $0x88] sm:$0xff] %vm675_vm8, %v726_v51  ;;  %1080 = vrot.lane.b32.xlu1 %v4906_v57, %s6385_s11 }
 0x134   : > { %v728_v54 = vpop.permute.xlu0 %727 }
 0x135   : > { %1086 = vrot.lane.b32.xlu0 %v4931_v2, %s6385_s11 }
 0x136   : > { %1084 = vrot.lane.b32.xlu1 %v4918_v61, %s6385_s11 }
 0x138   : > { %v730_v55 = vpop.permute.xlu1 %729 }
 0x139   : > { %v757_v58 = vsel %vm755_vm10, %v728_v54, %v730_v55  ;;  %783 = vst.msk [vmem:[#allocation3 + $0x98] sm:$0xff] %vm675_vm8, %v730_v55  ;;  %1090 = vrot.lane.b32.xlu0 %v4941_v9, %s6385_s11  ;;  %v732_v59 = vpop.permute.xlu0 %731  ;;  %v1672_v63 = vld [vmem:[#allocation3 + $0x88] sm:$0xff] }
 0x13a   : > { %1088 = vrot.lane.b32.xlu1 %v4939_v7, %s6385_s11  ;;  %v4003_v3 = vpack.c.bf16 %v757_v58, %v756_v52 }
 0x13d   : > { %v734_v60 = vpop.permute.xlu1 %733  ;;  %1094 = vrot.lane.b32.xlu0 %v4978_v20, %s6385_s11 }
 0x13e   : > { %v758_v62 = vsel %vm755_vm10, %v732_v59, %v734_v60  ;;  %785 = vst.msk [vmem:[#allocation3 + $0xa8] sm:$0xff] %vm675_vm8, %v734_v60  ;;  %1092 = vrot.lane.b32.xlu1 %v4965_v15, %s6385_s11 }
 0x140   : > { %v1674_v0 = vld [vmem:[#allocation3 + $0x98] sm:$0xff]  ;;  %v736_v4 = vpop.permute.xlu0 %735 }
 0x141   : > { %v4001_v1 = vpack.c.bf16 %v1674_v0, %v1672_v63  ;;  %1098 = vrot.lane.b32.xlu0 %v4988_v25, %s6385_s11 }
 0x142   : > { %1096 = vrot.lane.b32.xlu1 %v4986_v24, %s6385_s11 }
 0x143   : > { %4002 = vmatprep.subr.bf16.mxu0 %v4001_v1 }
 0x144   : > { %v738_v5 = vpop.permute.xlu1 %737  ;;  %4004 = vmatpush1.bf16.msra.mxu0 %v4003_v3 }
 0x145   : > { %v759_v6 = vsel %vm755_vm10, %v736_v4, %v738_v5  ;;  %787 = vst.msk [vmem:[#allocation3 + $0xb8] sm:$0xff] %vm675_vm8, %v738_v5  ;;  %1102 = vrot.lane.b32.xlu0 %v5015_v32, %s6385_s11  ;;  %v740_v10 = vpop.permute.xlu0 %739  ;;  %v1676_v14 = vld [vmem:[#allocation3 + $0xa8] sm:$0xff] }
 0x146   : > { %1100 = vrot.lane.b32.xlu1 %v5004_v29, %s6385_s11  ;;  %v4007_v19 = vpack.c.bf16 %v759_v6, %v758_v62 }
 0x149   : > { %v742_v12 = vpop.permute.xlu1 %741  ;;  %1179 = vrot.lane.b32.xlu0 %v4879_v48, %s6379_s23 }
 0x14a   : > { %v760_v13 = vsel %vm755_vm10, %v740_v10, %v742_v12  ;;  %789 = vst.msk [vmem:[#allocation3 + $0xc8] sm:$0xff] %vm675_vm8, %v742_v12  ;;  %1104 = vrot.lane.b32.xlu1 %v5019_v35, %s6385_s11 }
 0x14c   : > { %v1678_v16 = vld [vmem:[#allocation3 + $0xb8] sm:$0xff]  ;;  %v744_v18 = vpop.permute.xlu0 %743 }
 0x14d   : > { %v4005_v17 = vpack.c.bf16 %v1678_v16, %v1676_v14  ;;  %1183 = vrot.lane.b32.xlu0 %v4896_v53, %s6379_s23 }
 0x14e   : > { %1181 = vrot.lane.b32.xlu1 %v4882_v49, %s6379_s23 }
 0x14f   : > { %4006 = vmatprep.subr.bf16.mxu0 %v4005_v17 }
 0x150   : > { %v746_v21 = vpop.permute.xlu1 %745  ;;  %4008 = vmatpush1.bf16.msra.mxu0 %v4007_v19 }
 0x151   : > { %v761_v22 = vsel %vm755_vm10, %v744_v18, %v746_v21  ;;  %791 = vst.msk [vmem:[#allocation3 + $0xd8] sm:$0xff] %vm675_vm8, %v746_v21  ;;  %1187 = vrot.lane.b32.xlu0 %v4903_v56, %s6379_s23  ;;  %v748_v23 = vpop.permute.xlu0 %747  ;;  %v1680_v28 = vld [vmem:[#allocation3 + $0xc8] sm:$0xff] }
 0x152   : > { %1185 = vrot.lane.b32.xlu1 %v4906_v57, %s6379_s23  ;;  %v4011_v34 = vpack.c.bf16 %v761_v22, %v760_v13 }
 0x155   : > { %v750_v26 = vpop.permute.xlu1 %749  ;;  %1191 = vrot.lane.b32.xlu0 %v4931_v2, %s6379_s23 }
 0x156   : > { %v762_v27 = vsel %vm755_vm10, %v748_v23, %v750_v26  ;;  %793 = vst.msk [vmem:[#allocation3 + $0xe8] sm:$0xff] %vm675_vm8, %v750_v26  ;;  %1189 = vrot.lane.b32.xlu1 %v4918_v61, %s6379_s23 }
 0x157   : > { %v752_v30 = vpop.permute.xlu0 %751 }
 0x158   : > { %v1682_v31 = vld [vmem:[#allocation3 + $0xd8] sm:$0xff] }
 0x159   : > { %v4009_v33 = vpack.c.bf16 %v1682_v31, %v1680_v28  ;;  %1195 = vrot.lane.b32.xlu0 %v4941_v9, %s6379_s23 }
 0x15a   : > { %1193 = vrot.lane.b32.xlu1 %v4939_v7, %s6379_s23 }
 0x15b   : > { %4010 = vmatprep.subr.bf16.mxu0 %v4009_v33  ;;  %v833_v38 = vpop.permute.xlu0 %832 }
 0x15c   : > { %4012 = vmatpush1.bf16.msra.mxu0 %v4011_v34  ;;  %v754_v39 = vpop.permute.xlu1 %753 }
 0x15d   : > { %v763_v42 = vsel %vm755_vm10, %v752_v30, %v754_v39  ;;  %795 = vst.msk [vmem:[#allocation3 + $0xf8] sm:$0xff] %vm675_vm8, %v754_v39  ;;  %1199 = vrot.lane.b32.xlu0 %v4978_v20, %s6379_s23  ;;  %v1684_v40 = vld [vmem:[#allocation3 + $0xe8] sm:$0xff] }
 0x15e   : > { %1197 = vrot.lane.b32.xlu1 %v4965_v15, %s6379_s23  ;;  %v4015_v58 = vpack.c.bf16 %v763_v42, %v762_v27 }
 0x15f   : > { %v837_v46 = vpop.permute.xlu0 %836 }
 0x160   : > { %v835_v47 = vpop.permute.xlu1 %834 }
 0x161   : > { %v865_v50 = vsel %vm864_vm12, %v833_v38, %v835_v47  ;;  %v890_v51 = vsel %vm5174_vm11, %v835_v47, 0.0  ;;  %1203 = vrot.lane.b32.xlu0 %v4988_v25, %s6379_s23 }
 0x162   : > { %906 = vst.msk [vmem:[#allocation3 + $0x108] sm:$0xff] %vm675_vm8, %v890_v51  ;;  %1201 = vrot.lane.b32.xlu1 %v4986_v24, %s6379_s23 }
 0x163   : > { %v841_v36 = vpop.permute.xlu0 %840 }
 0x164   : > { %v839_v37 = vpop.permute.xlu1 %838  ;;  %v1686_v41 = vld [vmem:[#allocation3 + $0xf8] sm:$0xff] }
 0x165   : > { %v866_v52 = vsel %vm864_vm12, %v837_v46, %v839_v37  ;;  %v892_v54 = vsel %vm5174_vm11, %v839_v37, 0.0  ;;  %1207 = vrot.lane.b32.xlu0 %v5015_v32, %s6379_s23  ;;  %v4013_v55 = vpack.c.bf16 %v1686_v41, %v1684_v40  ;;  %v1389_v37 = vld [vmem:[#allocation2] sm:$0xff] }
 0x166   : > { %908 = vst.msk [vmem:[#allocation3 + $0x118] sm:$0xff] %vm675_vm8, %v892_v54  ;;  %1205 = vrot.lane.b32.xlu1 %v5004_v29, %s6379_s23  ;;  %v4362_v16 = vpack.c.bf16 %v866_v52, %v865_v50 }
 0x167   : > { %4014 = vmatprep.subr.bf16.mxu0 %v4013_v55  ;;  %v845_v59 = vpop.permute.xlu0 %844  ;;  %v1391_v55 = vld [vmem:[#allocation2 + $0x10] sm:$0xff] }
 0x168   : > { %v843_v60 = vpop.permute.xlu1 %842  ;;  %4016 = vmatpush1.bf16.msra.mxu0 %v4015_v58 }
 0x169   : > { %v867_v62 = vsel %vm864_vm12, %v841_v36, %v843_v60  ;;  %v894_v63 = vsel %vm5174_vm11, %v843_v60, 0.0  ;;  %1300 = vrot.lane.b32.xlu0 %v4879_v48, %s4609_s9  ;;  %v1688_v5 = vld [vmem:[#allocation3 + $0x108] sm:$0xff] }
 0x16a   : > { %910 = vst.msk [vmem:[#allocation3 + $0x128] sm:$0xff] %vm675_vm8, %v894_v63  ;;  %1209 = vrot.lane.b32.xlu1 %v5019_v35, %s6379_s23 }
 0x16b   : > { %v849_v0 = vpop.permute.xlu0 %848 }
 0x16c   : > { %v847_v1 = vpop.permute.xlu1 %846 }
 0x16d   : > { %v868_v3 = vsel %vm864_vm12, %v845_v59, %v847_v1  ;;  %v896_v4 = vsel %vm5174_vm11, %v847_v1, 0.0  ;;  %1304 = vrot.lane.b32.xlu0 %v4896_v53, %s4609_s9  ;;  %v1690_v6 = vld [vmem:[#allocation3 + $0x118] sm:$0xff] }
 0x16e   : > { %912 = vst.msk [vmem:[#allocation3 + $0x138] sm:$0xff] %vm675_vm8, %v896_v4  ;;  %1302 = vrot.lane.b32.xlu1 %v4882_v49, %s4609_s9  ;;  %v4017_v48 = vpack.c.bf16 %v1690_v6, %v1688_v5  ;;  %v4365_v28 = vpack.c.bf16 %v868_v3, %v867_v62 }
 0x16f   : > { %v853_v10 = vpop.permute.xlu0 %852 }
 0x170   : > { %v851_v12 = vpop.permute.xlu1 %850  ;;  %4018 = vmatprep.subr.bf16.mxu0 %v4017_v48 }
 0x171   : > { %v869_v13 = vsel %vm864_vm12, %v849_v0, %v851_v12  ;;  %v898_v14 = vsel %vm5174_vm11, %v851_v12, 0.0  ;;  %4363 = vmatpush1.bf16.msk.msra.mxu0 %vm5222_vm14, %v4362_v16  ;;  %1308 = vrot.lane.b32.xlu0 %v4903_v56, %s4609_s9  ;;  %v1692_v21 = vld [vmem:[#allocation3 + $0x128] sm:$0xff] }
 0x172   : > { %914 = vst.msk [vmem:[#allocation3 + $0x148] sm:$0xff] %vm675_vm8, %v898_v14  ;;  %1306 = vrot.lane.b32.xlu1 %v4906_v57, %s4609_s9 }
 0x173   : > { %v857_v49 = vpop.permute.xlu0 %856 }
 0x174   : > { %v855_v17 = vpop.permute.xlu1 %854 }
 0x175   : > { %v870_v18 = vsel %vm864_vm12, %v853_v10, %v855_v17  ;;  %v900_v19 = vsel %vm5174_vm11, %v855_v17, 0.0  ;;  %1312 = vrot.lane.b32.xlu0 %v4931_v2, %s4609_s9  ;;  %v1694_v22 = vld [vmem:[#allocation3 + $0x138] sm:$0xff] }
 0x176   : > { %916 = vst.msk [vmem:[#allocation3 + $0x158] sm:$0xff] %vm675_vm8, %v900_v19  ;;  %1310 = vrot.lane.b32.xlu1 %v4918_v61, %s4609_s9  ;;  %v4021_v56 = vpack.c.bf16 %v1694_v22, %v1692_v21  ;;  %v4368_v44 = vpack.c.bf16 %v870_v18, %v869_v13  ;;  %v1393_v18 = vld [vmem:[#allocation2 + $0x20] sm:$0xff] }
 0x177   : > { %v861_v23 = vpop.permute.xlu0 %860 }
 0x178   : > { %v859_v57 = vpop.permute.xlu1 %858  ;;  %4022 = vmatprep.subr.bf16.mxu0 %v4021_v56 }
 0x179   : > { %v871_v26 = vsel %vm864_vm12, %v857_v49, %v859_v57  ;;  %v902_v27 = vsel %vm5174_vm11, %v859_v57, 0.0  ;;  %4366 = vmatpush1.bf16.msk.msra.mxu0 %vm5222_vm14, %v4365_v28  ;;  %1316 = vrot.lane.b32.xlu0 %v4941_v9, %s4609_s9  ;;  %v1696_v33 = vld [vmem:[#allocation3 + $0x148] sm:$0xff] }
 0x17a   : > { %918 = vst.msk [vmem:[#allocation3 + $0x168] sm:$0xff] %vm675_vm8, %v902_v27  ;;  %1314 = vrot.lane.b32.xlu1 %v4939_v7, %s4609_s9 }
 0x17b   : > { %v954_v61 = vpop.permute.xlu0 %953 }
 0x17c   : > { %v863_v2 = vpop.permute.xlu1 %862 }
 0x17d   : > { %v872_v30 = vsel %vm864_vm12, %v861_v23, %v863_v2  ;;  %v904_v31 = vsel %vm5174_vm11, %v863_v2, 0.0  ;;  %1320 = vrot.lane.b32.xlu0 %v4978_v20, %s4609_s9  ;;  %v1698_v34 = vld [vmem:[#allocation3 + $0x158] sm:$0xff]  ;;  %v1394_v23 = vld [vmem:[#allocation2 + $0x28] sm:$0xff] }
 0x17e   : > { %920 = vst.msk [vmem:[#allocation3 + $0x178] sm:$0xff] %vm675_vm8, %v904_v31  ;;  %1318 = vrot.lane.b32.xlu1 %v4965_v15, %s4609_s9  ;;  %v4025_v9 = vpack.c.bf16 %v1698_v34, %v1696_v33  ;;  %v4371_v52 = vpack.c.bf16 %v872_v30, %v871_v26  ;;  %v1395_v26 = vld [vmem:[#allocation2 + $0x30] sm:$0xff]  ;;  %v1396_v33 = vld [vmem:[#allocation2 + $0x38] sm:$0xff] }
 0x17f   : > { %v958_v7 = vpop.permute.xlu0 %957 }
 0x180   : > { %v956_v38 = vpop.permute.xlu1 %955  ;;  %4026 = vmatprep.subr.bf16.mxu0 %v4025_v9 }
 0x181   : > { %v986_v39 = vsel %vm985_vm15, %v954_v61, %v956_v38  ;;  %v1011_v42 = vsel %vm4874_vm7, %v956_v38, 0.0  ;;  %4369 = vmatpush1.bf16.msk.msra.mxu0 %vm5222_vm14, %v4368_v44  ;;  %1324 = vrot.lane.b32.xlu0 %v4988_v25, %s4609_s9  ;;  %v1700_v50 = vld [vmem:[#allocation3 + $0x168] sm:$0xff] }
 0x182   : > { %1027 = vst.msk [vmem:[#allocation3 + $0x188] sm:$0xff] %vm675_vm8, %v1011_v42  ;;  %1322 = vrot.lane.b32.xlu1 %v4986_v24, %s4609_s9 }
 0x183   : > { %v962_v15 = vpop.permute.xlu0 %961 }
 0x184   : > { %v960_v20 = vpop.permute.xlu1 %959 }
 0x185   : > { %v987_v46 = vsel %vm985_vm15, %v958_v7, %v960_v20  ;;  %v1013_v47 = vsel %vm4874_vm7, %v960_v20, 0.0  ;;  %1328 = vrot.lane.b32.xlu0 %v5015_v32, %s4609_s9  ;;  %v1702_v51 = vld [vmem:[#allocation3 + $0x178] sm:$0xff]  ;;  %v1390_v32 = vld [vmem:[#allocation2 + $0x8] sm:$0xff] }
 0x186   : > { %1029 = vst.msk [vmem:[#allocation3 + $0x198] sm:$0xff] %vm675_vm8, %v1013_v47  ;;  %1326 = vrot.lane.b32.xlu1 %v5004_v29, %s4609_s9  ;;  %v4029_v25 = vpack.c.bf16 %v1702_v51, %v1700_v50  ;;  %v4374_v5 = vpack.c.bf16 %v987_v46, %v986_v39  ;;  %v1397_v50 = vld [vmem:[#allocation2 + $0x40] sm:$0xff] }
 0x187   : > { %v966_v36 = vpop.permute.xlu0 %965 }
 0x188   : > { %v964_v24 = vpop.permute.xlu1 %963  ;;  %4030 = vmatprep.subr.bf16.mxu0 %v4029_v25 }
 0x189   : > { %v988_v40 = vsel %vm985_vm15, %v962_v15, %v964_v24  ;;  %v1015_v41 = vsel %vm4874_vm7, %v964_v24, 0.0  ;;  %4372 = vmatpush1.bf16.msk.msra.mxu0 %vm5222_vm14, %v4371_v52  ;;  %1421 = vrot.lane.b32.xlu0 %v1389_v37, %s6383_s10  ;;  %v1704_v60 = vld [vmem:[#allocation3 + $0x188] sm:$0xff]  ;;  %v1621_v24 = vld [vmem:[%s6369_s3 + $0x30] sm:$0xff] }
 0x18a   : > { %1031 = vst.msk [vmem:[#allocation3 + $0x1a8] sm:$0xff] %vm675_vm8, %v1015_v41  ;;  %1330 = vrot.lane.b32.xlu1 %v5019_v35, %s4609_s9  ;;  %v1392_v35 = vld [vmem:[#allocation2 + $0x18] sm:$0xff]  ;;  %v1399_v52 = vld [vmem:[#allocation2 + $0x50] sm:$0xff] }
 0x18b   : > { %v970_v29 = vpop.permute.xlu0 %969 }
 0x18c   : > { %v968_v54 = vpop.permute.xlu1 %967 }
 0x18d   : > { %v989_v58 = vsel %vm985_vm15, %v966_v36, %v968_v54  ;;  %v1017_v59 = vsel %vm4874_vm7, %v968_v54, 0.0  ;;  %1425 = vrot.lane.b32.xlu0 %v1391_v55, %s6383_s10  ;;  %v1706_v62 = vld [vmem:[#allocation3 + $0x198] sm:$0xff]  ;;  %v1615_v36 = vld [vmem:[%s6369_s3] sm:$0xff] }
 0x18e   : > { %1033 = vst.msk [vmem:[#allocation3 + $0x1b8] sm:$0xff] %vm675_vm8, %v1017_v59  ;;  %1423 = vrot.lane.b32.xlu1 %v1390_v32, %s6383_s10  ;;  %v4033_v63 = vpack.c.bf16 %v1706_v62, %v1704_v60  ;;  %v4377_v22 = vpack.c.bf16 %v989_v58, %v988_v40  ;;  %v1398_v40 = vld [vmem:[#allocation2 + $0x48] sm:$0xff]  ;;  %v1400_v62 = vld [vmem:[#allocation2 + $0x58] sm:$0xff] }
 0x18f   : > { %v974_v0 = vpop.permute.xlu0 %973  ;;  %v1620_v59 = vld [vmem:[%s6369_s3 + $0x28] sm:$0xff] }
 0x190   : > { %v972_v1 = vpop.permute.xlu1 %971  ;;  %4034 = vmatprep.subr.bf16.mxu0 %v4033_v63  ;;  %v1626_v63 = vld [vmem:[%s6369_s3 + $0x58] sm:$0xff] }
 0x191   : > { %v990_v3 = vsel %vm985_vm15, %v970_v29, %v972_v1  ;;  %v1019_v4 = vsel %vm4874_vm7, %v972_v1, 0.0  ;;  %4375 = vmatpush1.bf16.msk.msra.mxu0 %vm4952_vm9, %v4374_v5  ;;  %1526 = vrot.lane.b32.xlu0 %v1389_v37, %s6381_s13  ;;  %v1708_v13 = vld [vmem:[#allocation3 + $0x1a8] sm:$0xff]  ;;  %v1625_v1 = vld [vmem:[%s6369_s3 + $0x50] sm:$0xff] }
 0x192   : > { %1035 = vst.msk [vmem:[#allocation3 + $0x1c8] sm:$0xff] %vm675_vm8, %v1019_v4  ;;  %1427 = vrot.lane.b32.xlu1 %v1392_v35, %s6383_s10  ;;  %v1631_v4 = vld [vmem:[%s6369_s3 + $0x80] sm:$0xff] }
 0x193   : > { %v978_v6 = vpop.permute.xlu0 %977 }
 0x194   : > { %v976_v48 = vpop.permute.xlu1 %975 }
 0x195   : > { %v991_v10 = vsel %vm985_vm15, %v974_v0, %v976_v48  ;;  %v1021_v12 = vsel %vm4874_vm7, %v976_v48, 0.0  ;;  %1530 = vrot.lane.b32.xlu0 %v1391_v55, %s6381_s13  ;;  %v1710_v14 = vld [vmem:[#allocation3 + $0x1b8] sm:$0xff] }
 0x196   : > { %1037 = vst.msk [vmem:[#allocation3 + $0x1d8] sm:$0xff] %vm675_vm8, %v1021_v12  ;;  %1528 = vrot.lane.b32.xlu1 %v1390_v32, %s6381_s13  ;;  %v4037_v16 = vpack.c.bf16 %v1710_v14, %v1708_v13  ;;  %v4380_v7 = vpack.c.bf16 %v991_v10, %v990_v3  ;;  %v1630_v14 = vld [vmem:[%s6369_s3 + $0x78] sm:$0xff] }
 0x197   : > { %v982_v49 = vpop.permute.xlu0 %981 }
 0x198   : > { %v980_v17 = vpop.permute.xlu1 %979  ;;  %4038 = vmatprep.subr.bf16.mxu0 %v4037_v16 }
 0x199   : > { %v992_v19 = vsel %vm985_vm15, %v978_v6, %v980_v17  ;;  %v1023_v21 = vsel %vm4874_vm7, %v980_v17, 0.0  ;;  %4378 = vmatpush1.bf16.msk.msra.mxu0 %vm4952_vm9, %v4377_v22  ;;  %1429 = vrot.lane.b32.xlu0 %v1393_v18, %s6383_s10  ;;  %v1712_v61 = vld [vmem:[#allocation3 + $0x1c8] sm:$0xff] }
 0x19a   : > { %1039 = vst.msk [vmem:[#allocation3 + $0x1e8] sm:$0xff] %vm675_vm8, %v1023_v21  ;;  %1532 = vrot.lane.b32.xlu1 %v1392_v35, %s6381_s13  ;;  %v1635_v21 = vld [vmem:[%s6369_s3 + $0xa0] sm:$0xff] }
 0x19b   : > { %v1075_v56 = vpop.permute.xlu0 %1074 }
 0x19c   : > { %v984_v57 = vpop.permute.xlu1 %983 }
 0x19d   : > { %v993_v27 = vsel %vm985_vm15, %v982_v49, %v984_v57  ;;  %v1025_v28 = vsel %vm4874_vm7, %v984_v57, 0.0  ;;  %1433 = vrot.lane.b32.xlu0 %v1395_v26, %s6383_s10  ;;  %v1714_v2 = vld [vmem:[#allocation3 + $0x1d8] sm:$0xff]  ;;  %v1636_v49 = vld [vmem:[%s6369_s3 + $0xa8] sm:$0xff] }
 0x19e   : > { %1041 = vst.msk [vmem:[#allocation3 + $0x1f8] sm:$0xff] %vm675_vm8, %v1025_v28  ;;  %1431 = vrot.lane.b32.xlu1 %v1394_v23, %s6383_s10  ;;  %v4041_v30 = vpack.c.bf16 %v1714_v2, %v1712_v61  ;;  %v4383_v25 = vpack.c.bf16 %v993_v27, %v992_v19 }
 0x19f   : > { %v1079_v31 = vpop.permute.xlu0 %1078 }
 0x1a0   : > { %v1077_v34 = vpop.permute.xlu1 %1076  ;;  %4042 = vmatprep.subr.bf16.mxu0 %v4041_v30 }
 0x1a1   : > { %v1107_v9 = vsel %vm1106_vm2, %v1075_v56, %v1077_v34  ;;  %1132 = vst.msk [vmem:[#allocation3 + $0x208] sm:$0xff] %vm675_vm8, %v1077_v34  ;;  %4381 = vmatpush1.bf16.msk.msra.mxu0 %vm4952_vm9, %v4380_v7  ;;  %1534 = vrot.lane.b32.xlu0 %v1393_v18, %s6381_s13  ;;  %v1716_v44 = vld [vmem:[#allocation3 + $0x1e8] sm:$0xff]  ;;  %v1401_v18 = vld [vmem:[#allocation2 + $0x60] sm:$0xff]  ;;  %v1404_v34 = vld [vmem:[#allocation2 + $0x78] sm:$0xff] }
 0x1a2   : > { %1435 = vrot.lane.b32.xlu1 %v1396_v33, %s6383_s10  ;;  %v1402_v56 = vld [vmem:[#allocation2 + $0x68] sm:$0xff] }
 0x1a3   : > { %v1083_v38 = vpop.permute.xlu0 %1082 }
 0x1a4   : > { %v1081_v39 = vpop.permute.xlu1 %1080 }
 0x1a5   : > { %v1108_v42 = vsel %vm1106_vm2, %v1079_v31, %v1081_v39  ;;  %1134 = vst.msk [vmem:[#allocation3 + $0x218] sm:$0xff] %vm675_vm8, %v1081_v39  ;;  %1538 = vrot.lane.b32.xlu0 %v1395_v26, %s6381_s13  ;;  %v1718_v15 = vld [vmem:[#allocation3 + $0x1f8] sm:$0xff]  ;;  %v1403_v26 = vld [vmem:[#allocation2 + $0x70] sm:$0xff]  ;;  %v1640_v31 = vld [vmem:[%s6369_s3 + $0xc8] sm:$0xff] }
 0x1a6   : > { %1536 = vrot.lane.b32.xlu1 %v1394_v23, %s6381_s13  ;;  %v4045_v20 = vpack.c.bf16 %v1718_v15, %v1716_v44  ;;  %v4051_v58 = vpack.c.bf16 %v1108_v42, %v1107_v9  ;;  %v1641_v23 = vld [vmem:[%s6369_s3 + $0xd0] sm:$0xff]  ;;  %v1646_v9 = vld [vmem:[%s6369_s3 + $0xf8] sm:$0xff]  ;;  %v1651_v15 = vld [vmem:[%s6369_s3 + $0x120] sm:$0xff] }
 0x1a7   : > { %v1087_v46 = vpop.permute.xlu0 %1086  ;;  %v1645_v42 = vld [vmem:[%s6369_s3 + $0xf0] sm:$0xff] }
 0x1a8   : > { %v1085_v47 = vpop.permute.xlu1 %1084  ;;  %4046 = vmatprep.subr.bf16.mxu0 %v4045_v20  ;;  %v1720_v29 = vld [vmem:[#allocation3 + $0x208] sm:$0xff] }
 0x1a9   : > { %v1109_v51 = vsel %vm1106_vm2, %v1083_v38, %v1085_v47  ;;  %1136 = vst.msk [vmem:[#allocation3 + $0x228] sm:$0xff] %vm675_vm8, %v1085_v47  ;;  %4384 = vmatpush1.bf16.msk.msra.mxu0 %vm4952_vm9, %v4383_v25  ;;  %1437 = vrot.lane.b32.xlu0 %v1397_v50, %s6383_s10 }
 0x1aa   : > { %1540 = vrot.lane.b32.xlu1 %v1396_v33, %s6381_s13 }
 0x1ab   : > { %v1091_v37 = vpop.permute.xlu0 %1090 }
 0x1ac   : > { %v1089_v41 = vpop.permute.xlu1 %1088  ;;  %v1722_v32 = vld [vmem:[#allocation3 + $0x218] sm:$0xff]  ;;  %1937 = vmatmul.mubr.f32.vlgmr.msra.gmra.mrb[0].mxu0 %v1615_v36 }
 0x1ad   : > { %v1110_v54 = vsel %vm1106_vm2, %v1087_v46, %v1089_v41  ;;  %1138 = vst.msk [vmem:[#allocation3 + $0x238] sm:$0xff] %vm675_vm8, %v1089_v41  ;;  %1441 = vrot.lane.b32.xlu0 %v1399_v52, %s6383_s10  ;;  %v4049_v55 = vpack.c.bf16 %v1722_v32, %v1720_v29  ;;  %1942 = vmatprep.mubr.f32.mxu0 %v1621_v24  ;;  %v1650_v24 = vld [vmem:[%s6369_s3 + $0x118] sm:$0xff] }
 0x1ae   : > { %1439 = vrot.lane.b32.xlu1 %v1398_v40, %s6383_s10  ;;  %v4055_v13 = vpack.c.bf16 %v1110_v54, %v1109_v51 }
 0x1af   : > { %4050 = vmatprep.subr.bf16.mxu0 %v4049_v55  ;;  %v1095_v60 = vpop.permute.xlu0 %1094 }
 0x1b0   : > { %v1093_v0 = vpop.permute.xlu1 %1092  ;;  %4052 = vmatpush1.bf16.msra.mxu0 %v4051_v58  ;;  %v1724_v6 = vld [vmem:[#allocation3 + $0x228] sm:$0xff] }
 0x1b1   : > { %v1111_v35 = vsel %vm1106_vm2, %v1091_v37, %v1093_v0  ;;  %1140 = vst.msk [vmem:[#allocation3 + $0x248] sm:$0xff] %vm675_vm8, %v1093_v0  ;;  %1542 = vrot.lane.b32.xlu0 %v1397_v50, %s6381_s13  ;;  %1943 = vmatmul.mubr.f32.gmra.mrb[2].mxu0 %v1620_v59 }
 0x1b2   : > { %1443 = vrot.lane.b32.xlu1 %v1400_v62, %s6383_s10  ;;  %1948 = vmatprep.mubr.f32.mxu0 %v1626_v63 }
 0x1b3   : > { %v1099_v3 = vpop.permute.xlu0 %1098 }
 0x1b4   : > { %v1097_v5 = vpop.permute.xlu1 %1096  ;;  %v1726_v48 = vld [vmem:[#allocation3 + $0x238] sm:$0xff] }
 0x1b5   : > { %v1112_v10 = vsel %vm1106_vm2, %v1095_v60, %v1097_v5  ;;  %1142 = vst.msk [vmem:[#allocation3 + $0x258] sm:$0xff] %vm675_vm8, %v1097_v5  ;;  %1546 = vrot.lane.b32.xlu0 %v1399_v52, %s6381_s13  ;;  %v4053_v12 = vpack.c.bf16 %v1726_v48, %v1724_v6  ;;  %1949 = vmatmul.mubr.f32.gmra.mrb[4].mxu0 %v1625_v1 }
 0x1b6   : > { %1544 = vrot.lane.b32.xlu1 %v1398_v40, %s6381_s13  ;;  %1954 = vmatprep.mubr.f32.mxu0 %v1631_v4  ;;  %v4059_v30 = vpack.c.bf16 %v1112_v10, %v1111_v35  ;;  %v1618_v40 = vld [vmem:[%s6369_s3 + $0x18] sm:$0xff] }
 0x1b7   : > { %4054 = vmatprep.subr.bf16.mxu0 %v4053_v12  ;;  %v1103_v16 = vpop.permute.xlu0 %1102 }
 0x1b8   : > { %v1101_v17 = vpop.permute.xlu1 %1100  ;;  %4056 = vmatpush1.bf16.msra.mxu0 %v4055_v13  ;;  %v1728_v27 = vld [vmem:[#allocation3 + $0x248] sm:$0xff] }
 0x1b9   : > { %v1113_v19 = vsel %vm1106_vm2, %v1099_v3, %v1101_v17  ;;  %1144 = vst.msk [vmem:[#allocation3 + $0x268] sm:$0xff] %vm675_vm8, %v1101_v17  ;;  %1445 = vrot.lane.b32.xlu0 %v1401_v18, %s6383_s10  ;;  %1955 = vmatmul.mubr.f32.gmra.mrb[6].mxu0 %v1630_v14 }
 0x1ba   : > { %1548 = vrot.lane.b32.xlu1 %v1400_v62, %s6381_s13  ;;  %1960 = vmatprep.mubr.f32.mxu0 %v1636_v49 }
 0x1bb   : > { %v1180_v22 = vpop.permute.xlu0 %1179 }
 0x1bc   : > { %v1105_v57 = vpop.permute.xlu1 %1104  ;;  %v1730_v28 = vld [vmem:[#allocation3 + $0x258] sm:$0xff] }
 0x1bd   : > { %v1114_v61 = vsel %vm1106_vm2, %v1103_v16, %v1105_v57  ;;  %1146 = vst.msk [vmem:[#allocation3 + $0x278] sm:$0xff] %vm675_vm8, %v1105_v57  ;;  %1449 = vrot.lane.b32.xlu0 %v1403_v26, %s6383_s10  ;;  %v4057_v2 = vpack.c.bf16 %v1730_v28, %v1728_v27  ;;  %1961 = vmatmul.mubr.f32.gmra.mrb[8].mxu0 %v1635_v21 }
 0x1be   : > { %1447 = vrot.lane.b32.xlu1 %v1402_v56, %s6383_s10  ;;  %1966 = vmatprep.mubr.f32.mxu0 %v1641_v23  ;;  %v4063_v36 = vpack.c.bf16 %v1114_v61, %v1113_v19 }
 0x1bf   : > { %4058 = vmatprep.subr.bf16.mxu0 %v4057_v2  ;;  %v1184_v33 = vpop.permute.xlu0 %1183 }
 0x1c0   : > { %v1182_v7 = vpop.permute.xlu1 %1181  ;;  %4060 = vmatpush1.bf16.msra.mxu0 %v4059_v30  ;;  %v1732_v46 = vld [vmem:[#allocation3 + $0x268] sm:$0xff] }
 0x1c1   : > { %v1212_v38 = vsel %vm1211_vm3, %v1180_v22, %v1182_v7  ;;  %v1237_v39 = vsel %vm5174_vm11, %v1182_v7, 0.0  ;;  %1550 = vrot.lane.b32.xlu0 %v1401_v18, %s6381_s13  ;;  %1967 = vmatmul.mubr.f32.gmra.mrb[10].mxu0 %v1640_v31 }
 0x1c2   : > { %1253 = vst.msk [vmem:[#allocation3 + $0x288] sm:$0xff] %vm675_vm8, %v1237_v39  ;;  %1451 = vrot.lane.b32.xlu1 %v1404_v34, %s6383_s10  ;;  %1972 = vmatprep.mubr.f32.mxu0 %v1646_v9 }
 0x1c3   : > { %v1188_v44 = vpop.permute.xlu0 %1187 }
 0x1c4   : > { %v1186_v20 = vpop.permute.xlu1 %1185  ;;  %v1734_v47 = vld [vmem:[#allocation3 + $0x278] sm:$0xff] }
 0x1c5   : > { %v1213_v50 = vsel %vm1211_vm3, %v1184_v33, %v1186_v20  ;;  %v1239_v51 = vsel %vm5174_vm11, %v1186_v20, 0.0  ;;  %1554 = vrot.lane.b32.xlu0 %v1403_v26, %s6381_s13  ;;  %v4061_v25 = vpack.c.bf16 %v1734_v47, %v1732_v46  ;;  %1973 = vmatmul.mubr.f32.gmra.mrb[12].mxu0 %v1645_v42  ;;  %v1800_v20 = vld [vmem:[%s6370_s4 + $0x8] sm:$0xff] }
 0x1c6   : > { %1255 = vst.msk [vmem:[#allocation3 + $0x298] sm:$0xff] %vm675_vm8, %v1239_v51  ;;  %1552 = vrot.lane.b32.xlu1 %v1402_v56, %s6381_s13  ;;  %1978 = vmatprep.mubr.f32.mxu0 %v1651_v15  ;;  %v4386_v3 = vpack.c.bf16 %v1213_v50, %v1212_v38  ;;  %v1799_v15 = vld [vmem:[%s6370_s4] sm:$0xff]  ;;  %v4612_v51 = vmov 0  }
 0x1c7   : > { %4062 = vmatprep.subr.bf16.mxu0 %v4061_v25  ;;  %v1192_v37 = vpop.permute.xlu0 %1191  ;;  %4345 = vset.pattern.permute.xlu0 %v4612_v51 }
 0x1c8   : > { %v1190_v41 = vpop.permute.xlu1 %1189  ;;  %4064 = vmatpush1.bf16.msra.mxu0 %v4063_v36  ;;  %4346 = vset.pattern.permute.xlu1 %v4612_v51  ;;  %v1802_v36 = vld [vmem:[%s6370_s4 + $0x18] sm:$0xff] }
 0x1c9   : > { %v1214_v52 = vsel %vm1211_vm3, %v1188_v44, %v1190_v41  ;;  %v1241_v29 = vsel %vm5174_vm11, %v1190_v41, 0.0  ;;  %1979 = vmatmul.mubr.f32.gmra.mrb[14].mxu0 %v1650_v24  ;;  %v1736_v59 = vld [vmem:[#allocation3 + $0x288] sm:$0xff]  ;;  %1809 = vperm.xlu0 %4345, %v1799_v15  }
 0x1ca   : > { %1257 = vst.msk [vmem:[#allocation3 + $0x2a8] sm:$0xff] %vm675_vm8, %v1241_v29  ;;  %1556 = vrot.lane.b32.xlu1 %v1404_v34, %s6381_s13  ;;  %2049 = vmatprep.mubr.f32.mxu0 %v1618_v40 }
 0x1cb   : > { %v1196_v32 = vpop.permute.xlu0 %1195 }
 0x1cc   : > { %v1194_v54 = vpop.permute.xlu1 %1193 }
 0x1cd   : > { %v1215_v55 = vsel %vm1211_vm3, %v1192_v37, %v1194_v54  ;;  %v1243_v58 = vsel %vm5174_vm11, %v1194_v54, 0.0  ;;  %v1738_v60 = vld [vmem:[#allocation3 + $0x298] sm:$0xff]  ;;  %v1801_v37 = vld [vmem:[%s6370_s4 + $0x10] sm:$0xff]  ;;  %1824 = vperm.xlu0 %4345, %v1802_v36  }
 0x1ce   : > { %1259 = vst.msk [vmem:[#allocation3 + $0x2b8] sm:$0xff] %vm675_vm8, %v1243_v58  ;;  %v4065_v62 = vpack.c.bf16 %v1738_v60, %v1736_v59  ;;  %v4389_v18 = vpack.c.bf16 %v1215_v55, %v1214_v52  ;;  %1814 = vperm.xlu1 %4346, %v1800_v20   ;;  %v1804_v55 = vld [vmem:[%s6370_s4 + $0x28] sm:$0xff]  ;;  %v1803_v59 = vld [vmem:[%s6370_s4 + $0x20] sm:$0xff] }
 0x1cf   : > { %v1200_v63 = vpop.permute.xlu0 %1199 }
 0x1d0   : > { %v1198_v0 = vpop.permute.xlu1 %1197  ;;  %4066 = vmatprep.subr.bf16.mxu0 %v4065_v62 }
 0x1d1   : > { %v1216_v35 = vsel %vm1211_vm3, %v1196_v32, %v1198_v0  ;;  %v1245_v1 = vsel %vm5174_vm11, %v1198_v0, 0.0  ;;  %4387 = vmatpush1.bf16.msk.msra.mxu0 %vm5222_vm14, %v4386_v3  ;;  %v1740_v10 = vld [vmem:[#allocation3 + $0x2a8] sm:$0xff]  ;;  %1834 = vperm.xlu0 %4345, %v1804_v55   ;;  %v1805_v3 = vld [vmem:[%s6370_s4 + $0x30] sm:$0xff] }
 0x1d2   : > { %1261 = vst.msk [vmem:[#allocation3 + $0x2c8] sm:$0xff] %vm675_vm8, %v1245_v1  ;;  %1819 = vperm.xlu1 %4346, %v1801_v37  }
 0x1d3   : > { %v1204_v4 = vpop.permute.xlu0 %1203 }
 0x1d4   : > { %v1202_v5 = vpop.permute.xlu1 %1201 }
 0x1d5   : > { %v1217_v6 = vsel %vm1211_vm3, %v1200_v63, %v1202_v5  ;;  %v1247_v48 = vsel %vm5174_vm11, %v1202_v5, 0.0  ;;  %v1742_v12 = vld [vmem:[#allocation3 + $0x2b8] sm:$0xff] }
 0x1d6   : > { %1263 = vst.msk [vmem:[#allocation3 + $0x2d8] sm:$0xff] %vm675_vm8, %v1247_v48  ;;  %v4069_v13 = vpack.c.bf16 %v1742_v12, %v1740_v10  ;;  %v4392_v30 = vpack.c.bf16 %v1217_v6, %v1216_v35  ;;  %1829 = vperm.xlu1 %4346, %v1803_v59   ;;  %v1806_v35 = vld [vmem:[%s6370_s4 + $0x38] sm:$0xff] }
 0x1d7   : > { %v1208_v14 = vpop.permute.xlu0 %1207  ;;  %1844 = vperm.xlu0 %4345, %v1806_v35  }
 0x1d8   : > { %v1206_v16 = vpop.permute.xlu1 %1205  ;;  %4070 = vmatprep.subr.bf16.mxu0 %v4069_v13 }
 0x1d9   : > { %v1218_v49 = vsel %vm1211_vm3, %v1204_v4, %v1206_v16  ;;  %v1249_v17 = vsel %vm5174_vm11, %v1206_v16, 0.0  ;;  %4390 = vmatpush1.bf16.msk.msra.mxu0 %vm5222_vm14, %v4389_v18  ;;  %v1744_v23 = vld [vmem:[#allocation3 + $0x2c8] sm:$0xff] }
 0x1da   : > { %1265 = vst.msk [vmem:[#allocation3 + $0x2e8] sm:$0xff] %vm675_vm8, %v1249_v17  ;;  %1839 = vperm.xlu1 %4346, %v1805_v3  }
 0x1db   : > { %v1301_v19 = vpop.permute.xlu0 %1300 }
 0x1dc   : > { %v1210_v21 = vpop.permute.xlu1 %1209 }
 0x1dd   : > { %v1219_v22 = vsel %vm1211_vm3, %v1208_v14, %v1210_v21  ;;  %v1251_v56 = vsel %vm5174_vm11, %v1210_v21, 0.0  ;;  %v1746_v57 = vld [vmem:[#allocation3 + $0x2d8] sm:$0xff] }
 0x1de   : > { %1267 = vst.msk [vmem:[#allocation3 + $0x2f8] sm:$0xff] %vm675_vm8, %v1251_v56  ;;  %v4073_v26 = vpack.c.bf16 %v1746_v57, %v1744_v23  ;;  %v4395_v50 = vpack.c.bf16 %v1219_v22, %v1218_v49 }
 0x1df   : > { %v1305_v27 = vpop.permute.xlu0 %1304 }
 0x1e0   : > { %v1303_v28 = vpop.permute.xlu1 %1302  ;;  %4074 = vmatprep.subr.bf16.mxu0 %v4073_v26 }
 0x1e1   : > { %v1333_v61 = vsel %vm1332_vm4, %v1301_v19, %v1303_v28  ;;  %v1358_v2 = vsel %vm4874_vm7, %v1303_v28, 0.0  ;;  %4393 = vmatpush1.bf16.msk.msra.mxu0 %vm5222_vm14, %v4392_v30  ;;  %v1748_v7 = vld [vmem:[#allocation3 + $0x2e8] sm:$0xff] }
 0x1e2   : > { %1374 = vst.msk [vmem:[#allocation3 + $0x308] sm:$0xff] %vm675_vm8, %v1358_v2 }
 0x1e3   : > { %v1309_v31 = vpop.permute.xlu0 %1308 }
 0x1e4   : > { %v1307_v33 = vpop.permute.xlu1 %1306 }
 0x1e5   : > { %v1334_v34 = vsel %vm1332_vm4, %v1305_v27, %v1307_v33  ;;  %v1360_v9 = vsel %vm4874_vm7, %v1307_v33, 0.0  ;;  %v1750_v38 = vld [vmem:[#allocation3 + $0x2f8] sm:$0xff] }
 0x1e6   : > { %1376 = vst.msk [vmem:[#allocation3 + $0x318] sm:$0xff] %vm675_vm8, %v1360_v9  ;;  %v4077_v39 = vpack.c.bf16 %v1750_v38, %v1748_v7  ;;  %v4398_v63 = vpack.c.bf16 %v1334_v34, %v1333_v61 }
 0x1e7   : > { %v1313_v42 = vpop.permute.xlu0 %1312 }
 0x1e8   : > { %v1311_v44 = vpop.permute.xlu1 %1310  ;;  %4078 = vmatprep.subr.bf16.mxu0 %v4077_v39 }
 0x1e9   : > { %v1335_v46 = vsel %vm1332_vm4, %v1309_v31, %v1311_v44  ;;  %v1362_v47 = vsel %vm4874_vm7, %v1311_v44, 0.0  ;;  %4396 = vmatpush1.bf16.msk.msra.mxu0 %vm5222_vm14, %v4395_v50  ;;  %v1752_v52 = vld [vmem:[#allocation3 + $0x308] sm:$0xff] }
 0x1ea   : > { %1378 = vst.msk [vmem:[#allocation3 + $0x328] sm:$0xff] %vm675_vm8, %v1362_v47 }
 0x1eb   : > { %v1317_v25 = vpop.permute.xlu0 %1316 }
 0x1ec   : > { %v1315_v24 = vpop.permute.xlu1 %1314 }
 0x1ed   : > { %v1336_v40 = vsel %vm1332_vm4, %v1313_v42, %v1315_v24  ;;  %v1364_v41 = vsel %vm4874_vm7, %v1315_v24, 0.0  ;;  %v1754_v29 = vld [vmem:[#allocation3 + $0x318] sm:$0xff] }
 0x1ee   : > { %1380 = vst.msk [vmem:[#allocation3 + $0x338] sm:$0xff] %vm675_vm8, %v1364_v41  ;;  %v4081_v32 = vpack.c.bf16 %v1754_v29, %v1752_v52  ;;  %v4401_v49 = vpack.c.bf16 %v1336_v40, %v1335_v46 }
 0x1ef   : > { %v1321_v54 = vpop.permute.xlu0 %1320 }
 0x1f0   : > { %v1319_v58 = vpop.permute.xlu1 %1318  ;;  %4082 = vmatprep.subr.bf16.mxu0 %v4081_v32 }
 0x1f1   : > { %v1337_v60 = vsel %vm1332_vm4, %v1317_v25, %v1319_v58  ;;  %v1366_v62 = vsel %vm4874_vm7, %v1319_v58, 0.0  ;;  %4399 = vmatpush1.bf16.msk.msra.mxu0 %vm4952_vm9, %v4398_v63  ;;  %v1756_v6 = vld [vmem:[#allocation3 + $0x328] sm:$0xff] }
 0x1f2   : > { %1382 = vst.msk [vmem:[#allocation3 + $0x348] sm:$0xff] %vm675_vm8, %v1366_v62 }
 0x1f3   : > { %v1325_v0 = vpop.permute.xlu0 %1324 }
 0x1f4   : > { %v1323_v1 = vpop.permute.xlu1 %1322 }
 0x1f5   : > { %v1338_v4 = vsel %vm1332_vm4, %v1321_v54, %v1323_v1  ;;  %v1368_v5 = vsel %vm4874_vm7, %v1323_v1, 0.0  ;;  %v1758_v48 = vld [vmem:[#allocation3 + $0x338] sm:$0xff] }
 0x1f6   : > { %1384 = vst.msk [vmem:[#allocation3 + $0x358] sm:$0xff] %vm675_vm8, %v1368_v5  ;;  %v4085_v10 = vpack.c.bf16 %v1758_v48, %v1756_v6  ;;  %v4404_v28 = vpack.c.bf16 %v1338_v4, %v1337_v60 }
 0x1f7   : > { %v1329_v12 = vpop.permute.xlu0 %1328 }
 0x1f8   : > { %v1327_v13 = vpop.permute.xlu1 %1326  ;;  %4086 = vmatprep.subr.bf16.mxu0 %v4085_v10 }
 0x1f9   : > { %v1339_v14 = vsel %vm1332_vm4, %v1325_v0, %v1327_v13  ;;  %v1370_v16 = vsel %vm4874_vm7, %v1327_v13, 0.0  ;;  %4402 = vmatpush1.bf16.msk.msra.mxu0 %vm4952_vm9, %v4401_v49  ;;  %v1760_v22 = vld [vmem:[#allocation3 + $0x348] sm:$0xff] }
 0x1fa   : > { %1386 = vst.msk [vmem:[#allocation3 + $0x368] sm:$0xff] %vm675_vm8, %v1370_v16 }
 0x1fb   : > { %v1422_v17 = vpop.permute.xlu0 %1421 }
 0x1fc   : > { %v1331_v18 = vpop.permute.xlu1 %1330 }
 0x1fd   : > { %v1340_v19 = vsel %vm1332_vm4, %v1329_v12, %v1331_v18  ;;  %v1372_v21 = vsel %vm4874_vm7, %v1331_v18, 0.0  ;;  %v1762_v56 = vld [vmem:[#allocation3 + $0x358] sm:$0xff]  ;;  %vm1847_vm7 = vcmask 523264  }
 0x1fe   : > { %1388 = vst.msk [vmem:[#allocation3 + $0x378] sm:$0xff] %vm675_vm8, %v1372_v21  ;;  %v4089_v23 = vpack.c.bf16 %v1762_v56, %v1760_v22  ;;  %v4407_v39 = vpack.c.bf16 %v1340_v19, %v1339_v14 }
 0x1ff   : > { %v1426_v57 = vpop.permute.xlu0 %1425 }
 0x200   : > { %v1424_v26 = vpop.permute.xlu1 %1423  ;;  %4090 = vmatprep.subr.bf16.mxu0 %v4089_v23 }
 0x201   : > { %v1454_v27 = vsel %vm1453_vm5, %v1422_v17, %v1424_v26  ;;  %1479 = vst.msk [vmem:[#allocation3 + $0x388] sm:$0xff] %vm675_vm8, %v1424_v26  ;;  %4405 = vmatpush1.bf16.msk.msra.mxu0 %vm4952_vm9, %v4404_v28  ;;  %v1764_v30 = vld [vmem:[#allocation3 + $0x368] sm:$0xff] }
 0x203   : > { %v1527_v61 = vpop.permute.xlu0 %1526 }
 0x204   : > { %v1428_v45 = vpop.permute.xlu1 %1427 }
 0x205   : > { %v1455_v2 = vsel %vm1453_vm5, %v1426_v57, %v1428_v45  ;;  %1481 = vst.msk [vmem:[#allocation3 + $0x398] sm:$0xff] %vm675_vm8, %v1428_v45  ;;  %v1766_v31 = vld [vmem:[#allocation3 + $0x378] sm:$0xff] }
 0x206   : > { %v4093_v33 = vpack.c.bf16 %v1766_v31, %v1764_v30  ;;  %v4099_v25 = vpack.c.bf16 %v1455_v2, %v1454_v27 }
 0x207   : > { %v1531_v34 = vpop.permute.xlu0 %1530 }
 0x208   : > { %v1529_v9 = vpop.permute.xlu1 %1528  ;;  %4094 = vmatprep.subr.bf16.mxu0 %v4093_v33  ;;  %v1768_v15 = vld [vmem:[#allocation3 + $0x388] sm:$0xff] }
 0x209   : > { %v1559_v7 = vsel %vm1558_vm6, %v1527_v61, %v1529_v9  ;;  %v1584_v38 = vsel %vm5174_vm11, %v1529_v9, 0.0  ;;  %4408 = vmatpush1.bf16.msk.msra.mxu0 %vm4952_vm9, %v4407_v39 }
 0x20a   : > { %1600 = vst.msk [vmem:[#allocation3 + $0x408] sm:$0xff] %vm675_vm8, %v1584_v38 }
 0x20b   : > { %v1430_v42 = vpop.permute.xlu0 %1429 }
 0x20c   : > { %v1533_v44 = vpop.permute.xlu1 %1532  ;;  %v1770_v20 = vld [vmem:[#allocation3 + $0x398] sm:$0xff] }
 0x20d   : > { %v1560_v46 = vsel %vm1558_vm6, %v1531_v34, %v1533_v44  ;;  %v1586_v47 = vsel %vm5174_vm11, %v1533_v44, 0.0  ;;  %v4097_v50 = vpack.c.bf16 %v1770_v20, %v1768_v15 }
 0x20e   : > { %1602 = vst.msk [vmem:[#allocation3 + $0x418] sm:$0xff] %vm675_vm8, %v1586_v47  ;;  %v4410_v62 = vpack.c.bf16 %v1560_v46, %v1559_v7 }
 0x20f   : > { %4098 = vmatprep.subr.bf16.mxu0 %v4097_v50  ;;  %v1434_v36 = vpop.permute.xlu0 %1433 }
 0x210   : > { %v1432_v24 = vpop.permute.xlu1 %1431  ;;  %4100 = vmatpush1.bf16.msra.mxu0 %v4099_v25 }
 0x211   : > { %v1456_v37 = vsel %vm1453_vm5, %v1430_v42, %v1432_v24  ;;  %1483 = vst.msk [vmem:[#allocation3 + $0x3a8] sm:$0xff] %vm675_vm8, %v1432_v24  ;;  %v1784_v29 = vld [vmem:[#allocation3 + $0x408] sm:$0xff] }
 0x213   : > { %v1535_v40 = vpop.permute.xlu0 %1534 }
 0x214   : > { %v1436_v41 = vpop.permute.xlu1 %1435 }
 0x215   : > { %v1457_v52 = vsel %vm1453_vm5, %v1434_v36, %v1436_v41  ;;  %1485 = vst.msk [vmem:[#allocation3 + $0x3b8] sm:$0xff] %vm675_vm8, %v1436_v41  ;;  %v1786_v32 = vld [vmem:[#allocation3 + $0x418] sm:$0xff] }
 0x216   : > { %v4113_v54 = vpack.c.bf16 %v1786_v32, %v1784_v29  ;;  %v4103_v6 = vpack.c.bf16 %v1457_v52, %v1456_v37  ;;  %v1617_v29 = vld [vmem:[%s6369_s3 + $0x10] sm:$0xff]  ;;  %v1623_v32 = vld [vmem:[%s6369_s3 + $0x40] sm:$0xff] }
 0x217   : > { %v1539_v55 = vpop.permute.xlu0 %1538 }
 0x218   : > { %4114 = vmatprep.subr.bf16.mxu1 %v4113_v54  ;;  %v1537_v58 = vpop.permute.xlu1 %1536  ;;  %v1772_v35 = vld [vmem:[#allocation3 + $0x3a8] sm:$0xff] }
 0x219   : > { %v1561_v59 = vsel %vm1558_vm6, %v1535_v40, %v1537_v58  ;;  %v1588_v60 = vsel %vm5174_vm11, %v1537_v58, 0.0  ;;  %4411 = vmatpush1.bf16.msk.msra.mxu1 %vm5222_vm14, %v4410_v62  ;;  %v1628_v58 = vld [vmem:[%s6369_s3 + $0x68] sm:$0xff] }
 0x21a   : > { %1604 = vst.msk [vmem:[#allocation3 + $0x428] sm:$0xff] %vm675_vm8, %v1588_v60  ;;  %v1627_v60 = vld [vmem:[%s6369_s3 + $0x60] sm:$0xff] }
 0x21b   : > { %v1438_v63 = vpop.permute.xlu0 %1437 }
 0x21c   : > { %v1541_v0 = vpop.permute.xlu1 %1540  ;;  %v1774_v1 = vld [vmem:[#allocation3 + $0x3b8] sm:$0xff] }
 0x21d   : > { %v1562_v3 = vsel %vm1558_vm6, %v1539_v55, %v1541_v0  ;;  %v1590_v4 = vsel %vm5174_vm11, %v1541_v0, 0.0  ;;  %v4101_v5 = vpack.c.bf16 %v1774_v1, %v1772_v35  ;;  %v1633_v0 = vld [vmem:[%s6369_s3 + $0x90] sm:$0xff]  ;;  %v1632_v35 = vld [vmem:[%s6369_s3 + $0x88] sm:$0xff] }
 0x21e   : > { %1606 = vst.msk [vmem:[#allocation3 + $0x438] sm:$0xff] %vm675_vm8, %v1590_v4  ;;  %v4413_v23 = vpack.c.bf16 %v1562_v3, %v1561_v59  ;;  %v1624_v1 = vld [vmem:[%s6369_s3 + $0x48] sm:$0xff]  ;;  %v1638_v3 = vld [vmem:[%s6369_s3 + $0xb8] sm:$0xff]  ;;  %v1637_v4 = vld [vmem:[%s6369_s3 + $0xb0] sm:$0xff] }
 0x21f   : > { %4102 = vmatprep.subr.bf16.mxu0 %v4101_v5  ;;  %v1442_v48 = vpop.permute.xlu0 %1441  ;;  %v1629_v5 = vld [vmem:[%s6369_s3 + $0x70] sm:$0xff] }
 0x220   : > { %v1440_v10 = vpop.permute.xlu1 %1439  ;;  %4104 = vmatpush1.bf16.msra.mxu0 %v4103_v6  ;;  %v1643_v6 = vld [vmem:[%s6369_s3 + $0xe0] sm:$0xff] }
 0x221   : > { %v1458_v12 = vsel %vm1453_vm5, %v1438_v63, %v1440_v10  ;;  %1487 = vst.msk [vmem:[#allocation3 + $0x3c8] sm:$0xff] %vm675_vm8, %v1440_v10  ;;  %v1788_v49 = vld [vmem:[#allocation3 + $0x428] sm:$0xff]  ;;  %v1619_v63 = vld [vmem:[%s6369_s3 + $0x20] sm:$0xff]  ;;  %v1634_v10 = vld [vmem:[%s6369_s3 + $0x98] sm:$0xff] }
 0x223   : > { %v1543_v13 = vpop.permute.xlu0 %1542 }
 0x224   : > { %v1444_v14 = vpop.permute.xlu1 %1443 }
 0x225   : > { %v1459_v16 = vsel %vm1453_vm5, %v1442_v48, %v1444_v14  ;;  %1489 = vst.msk [vmem:[#allocation3 + $0x3d8] sm:$0xff] %vm675_vm8, %v1444_v14  ;;  %v1790_v17 = vld [vmem:[#allocation3 + $0x438] sm:$0xff]  ;;  %v1639_v14 = vld [vmem:[%s6369_s3 + $0xc0] sm:$0xff] }
 0x226   : > { %v4117_v18 = vpack.c.bf16 %v1790_v17, %v1788_v49  ;;  %v4107_v30 = vpack.c.bf16 %v1459_v16, %v1458_v12  ;;  %v1642_v48 = vld [vmem:[%s6369_s3 + $0xd8] sm:$0xff]  ;;  %v1648_v12 = vld [vmem:[%s6369_s3 + $0x108] sm:$0xff]  ;;  %v1653_v16 = vld [vmem:[%s6369_s3 + $0x130] sm:$0xff] }
 0x227   : > { %v1547_v19 = vpop.permute.xlu0 %1546  ;;  %v1652_v49 = vld [vmem:[%s6369_s3 + $0x128] sm:$0xff] }
 0x228   : > { %v1545_v21 = vpop.permute.xlu1 %1544  ;;  %4118 = vmatprep.subr.bf16.mxu1 %v4117_v18  ;;  %v1776_v27 = vld [vmem:[#allocation3 + $0x3c8] sm:$0xff]  ;;  %v1649_v18 = vld [vmem:[%s6369_s3 + $0x110] sm:$0xff] }
 0x229   : > { %v1563_v22 = vsel %vm1558_vm6, %v1543_v13, %v1545_v21  ;;  %v1592_v56 = vsel %vm5174_vm11, %v1545_v21, 0.0  ;;  %4414 = vmatpush1.bf16.msk.msra.mxu1 %vm5222_vm14, %v4413_v23  ;;  %v1647_v13 = vld [vmem:[%s6369_s3 + $0x100] sm:$0xff]  ;;  %v1644_v17 = vld [vmem:[%s6369_s3 + $0xe8] sm:$0xff] }
 0x22a   : > { %1608 = vst.msk [vmem:[#allocation3 + $0x448] sm:$0xff] %vm675_vm8, %v1592_v56 }
 0x22b   : > { %v1446_v57 = vpop.permute.xlu0 %1445 }
 0x22c   : > { %v1549_v26 = vpop.permute.xlu1 %1548  ;;  %v1778_v28 = vld [vmem:[#allocation3 + $0x3d8] sm:$0xff] }
 0x22d   : > { %v1564_v61 = vsel %vm1558_vm6, %v1547_v19, %v1549_v26  ;;  %v1594_v45 = vsel %vm5174_vm11, %v1549_v26, 0.0  ;;  %v4105_v2 = vpack.c.bf16 %v1778_v28, %v1776_v27  ;;  %v1654_v19 = vld [vmem:[%s6369_s3 + $0x138] sm:$0xff] }
 0x22e   : > { %1610 = vst.msk [vmem:[#allocation3 + $0x458] sm:$0xff] %vm675_vm8, %v1594_v45  ;;  %v4416_v47 = vpack.c.bf16 %v1564_v61, %v1563_v22 }
 0x22f   : > { %4106 = vmatprep.subr.bf16.mxu0 %v4105_v2  ;;  %v1450_v33 = vpop.permute.xlu0 %1449 }
 0x230   : > { %v1448_v31 = vpop.permute.xlu1 %1447  ;;  %4108 = vmatpush1.bf16.msra.mxu0 %v4107_v30 }
 0x231   : > { %v1460_v34 = vsel %vm1453_vm5, %v1446_v57, %v1448_v31  ;;  %1491 = vst.msk [vmem:[#allocation3 + $0x3e8] sm:$0xff] %vm675_vm8, %v1448_v31  ;;  %v1792_v38 = vld [vmem:[#allocation3 + $0x448] sm:$0xff] }
 0x233   : > { %v1551_v42 = vpop.permute.xlu0 %1550 }
 0x234   : > { %v1452_v9 = vpop.permute.xlu1 %1451 }
 0x235   : > { %v1461_v7 = vsel %vm1453_vm5, %v1450_v33, %v1452_v9  ;;  %1493 = vst.msk [vmem:[#allocation3 + $0x3f8] sm:$0xff] %vm675_vm8, %v1452_v9  ;;  %v1794_v39 = vld [vmem:[#allocation3 + $0x458] sm:$0xff] }
 0x236   : > { %v4121_v44 = vpack.c.bf16 %v1794_v39, %v1792_v38  ;;  %v4111_v52 = vpack.c.bf16 %v1461_v7, %v1460_v34 }
 0x237   : > { %v1555_v50 = vpop.permute.xlu0 %1554 }
 0x238   : > { %v1553_v15 = vpop.permute.xlu1 %1552  ;;  %4122 = vmatprep.subr.bf16.mxu1 %v4121_v44  ;;  %v1780_v36 = vld [vmem:[#allocation3 + $0x3e8] sm:$0xff] }
 0x239   : > { %v1565_v20 = vsel %vm1558_vm6, %v1551_v42, %v1553_v15  ;;  %v1596_v46 = vsel %vm5174_vm11, %v1553_v15, 0.0  ;;  %4417 = vmatpush1.bf16.msk.msra.mxu1 %vm5222_vm14, %v4416_v47 }
 0x23a   : > { %1612 = vst.msk [vmem:[#allocation3 + $0x468] sm:$0xff] %vm675_vm8, %v1596_v46 }
 0x23c   : > { %v1557_v25 = vpop.permute.xlu1 %1556  ;;  %v1782_v24 = vld [vmem:[#allocation3 + $0x3f8] sm:$0xff] }
 0x23d   : > { %v1566_v37 = vsel %vm1558_vm6, %v1555_v50, %v1557_v25  ;;  %v1598_v40 = vsel %vm5174_vm11, %v1557_v25, 0.0  ;;  %v4109_v41 = vpack.c.bf16 %v1782_v24, %v1780_v36  ;;  %vm2324_vm11 = vcmask 277768  }
 0x23e   : > { %1614 = vst.msk [vmem:[#allocation3 + $0x478] sm:$0xff] %vm675_vm8, %v1598_v40  ;;  %v4419_v62 = vpack.c.bf16 %v1566_v37, %v1565_v20  ;;  %vm2307_vm8 = vcmask 1047560  }
 0x23f   : > { %4110 = vmatprep.subr.bf16.mxu0 %v4109_v41 }
 0x240   : > { %4112 = vmatpush1.bf16.msra.mxu0 %v4111_v52 }
 0x241   : > { %v1796_v54 = vld [vmem:[#allocation3 + $0x468] sm:$0xff] }
 0x243   : > { %2050 = vmatmul.mubr.f32.vlgmr.msra.gmra.mrb[0].mxu0 %v1617_v29 }
 0x244   : > { %2055 = vmatprep.mubr.f32.mxu0 %v1623_v32 }
 0x245   : > { %v1798_v55 = vld [vmem:[#allocation3 + $0x478] sm:$0xff] }
 0x246   : > { %v4125_v59 = vpack.c.bf16 %v1798_v55, %v1796_v54 }
 0x247   : > { %2056 = vmatmul.mubr.f32.gmra.mrb[2].mxu0 %v1622_v43 }
 0x248   : > { %4126 = vmatprep.subr.bf16.mxu1 %v4125_v59  ;;  %2061 = vmatprep.mubr.f32.mxu0 %v1628_v58  ;;  %v1810_v57 = vpop.permute.xlu0 %1809 }
 0x249   : > { %4420 = vmatpush1.bf16.msk.msra.mxu1 %vm5222_vm14, %v4419_v62 }
 0x24b   : > { %2062 = vmatmul.mubr.f32.gmra.mrb[4].mxu0 %v1627_v60 }
 0x24c   : > { %3806 = vmatmul.mubr.msk.f32.vlgmr.msra.gmra.mrb[0].mxu1 %vm1847_vm7, %v1619_v63  ;;  %2067 = vmatprep.mubr.f32.mxu0 %v1633_v0  ;;  %v1825_v32 = vpop.permute.xlu0 %1824 }
 0x24d   : > { %2168 = vmatprep.mubr.f32.mxu1 %v4601_v8  ;;  %v1815_v26 = vpop.permute.xlu1 %1814 }
 0x24f   : > { %2068 = vmatmul.mubr.f32.gmra.mrb[6].mxu0 %v1632_v35 }
 0x250   : > { %3807 = vmatmul.mubr.msk.f32.gmra.mrb[2].mxu1 %vm1847_vm7, %v1624_v1  ;;  %2073 = vmatprep.mubr.f32.mxu0 %v1638_v3 }
 0x251   : > { %2174 = vmatprep.mubr.f32.mxu1 %v4601_v8  ;;  %v1820_v46 = vpop.permute.xlu1 %1819 }
 0x253   : > { %2074 = vmatmul.mubr.f32.gmra.mrb[8].mxu0 %v1637_v4 }
 0x254   : > { %3808 = vmatmul.mubr.msk.f32.gmra.mrb[4].mxu1 %vm1847_vm7, %v1629_v5  ;;  %2079 = vmatprep.mubr.f32.mxu0 %v1643_v6 }
 0x255   : > { %2180 = vmatprep.mubr.f32.mxu1 %v4601_v8  ;;  %v1830_v1 = vpop.permute.xlu1 %1829 }
 0x257   : > { %2080 = vmatmul.mubr.f32.gmra.mrb[10].mxu0 %v1642_v48 }
 0x258   : > { %3809 = vmatmul.mubr.msk.f32.gmra.mrb[6].mxu1 %vm1847_vm7, %v1634_v10  ;;  %2085 = vmatprep.mubr.f32.mxu0 %v1648_v12 }
 0x259   : > { %2186 = vmatprep.mubr.f32.mxu1 %v4601_v8 }
 0x25b   : > { %2086 = vmatmul.mubr.f32.gmra.mrb[12].mxu0 %v1647_v13 }
 0x25c   : > { %3810 = vmatmul.mubr.msk.f32.gmra.mrb[8].mxu1 %vm1847_vm7, %v1639_v14  ;;  %2091 = vmatprep.mubr.f32.mxu0 %v1653_v16 }
 0x25d   : > { %2192 = vmatprep.mubr.f32.mxu1 %v4601_v8 }
 0x25f   : > { %2092 = vmatmul.mubr.f32.gmra.mrb[14].mxu0 %v1652_v49  ;;  %v1835_v49 = vpop.permute.xlu0 %1834 }
 0x260   : > { %3811 = vmatmul.mubr.msk.f32.gmra.mrb[10].mxu1 %vm1847_vm7, %v1644_v17 }
 0x261   : > { %2198 = vmatprep.mubr.f32.mxu1 %v4601_v8 }
 0x264   : > { %3812 = vmatmul.mubr.msk.f32.gmra.mrb[12].mxu1 %vm1847_vm7, %v1649_v18 }
 0x265   : > { %2204 = vmatprep.mubr.f32.mxu1 %v4601_v8 }
 0x268   : > { %3813 = vmatmul.mubr.msk.f32.gmra.mrb[14].mxu1 %vm1847_vm7, %v1654_v19 }
 0x316   : > { %v2051_v21 = vpop.f32.mrb[0].mxu0 }
 0x317   : > { %v2053_v22 = vpop.f32.mrb[1].mxu0  ;;  %v4209_v27 = vadd.f32 %v2051_v21, %v1810_v57 }
 0x318   : > { %v4211_v61 = vadd.f32 %v2053_v22, %v1810_v57 }
 0x31a   : > { %v2057_v56 = vpop.f32.mrb[2].mxu0 }
 0x31b   : > { %v2059_v23 = vpop.f32.mrb[3].mxu0  ;;  %v4213_v34 = vadd.f32 %v2057_v56, %v1815_v26 }
 0x31c   : > { %v4215_v38 = vadd.f32 %v2059_v23, %v1815_v26 }
 0x31e   : > { %v2063_v28 = vpop.f32.mrb[4].mxu0 }
 0x31f   : > { %v2065_v45 = vpop.f32.mrb[5].mxu0  ;;  %v2164_v2 = vpop.f32.mrb[0].mxu1  ;;  %v4217_v50 = vadd.f32 %v2063_v28, %v1820_v46 }
 0x320   : > { %v4210_v30 = vadd.f32 %v4209_v27, %v2164_v2  ;;  %v2166_v31 = vpop.f32.mrb[1].mxu1  ;;  %v4219_v24 = vadd.f32 %v2065_v45, %v1820_v46  ;;  %v1840_v28 = vpop.permute.xlu1 %1839 }
 0x321   : > { %v4212_v33 = vadd.f32 %v4211_v61, %v2166_v31 }
 0x322   : > { %v2211_v9 = vmax.f32 %v4210_v30, 0.0  ;;  %v2069_v7 = vpop.f32.mrb[6].mxu0 }
 0x323   : > { %v2212_v39 = vmax.f32 %v4212_v33, 0.0  ;;  %v2071_v42 = vpop.f32.mrb[7].mxu0  ;;  %v2170_v44 = vpop.f32.mrb[2].mxu1  ;;  %v4221_v54 = vadd.f32 %v2069_v7, %v1825_v32 }
 0x324   : > { %v4214_v15 = vadd.f32 %v4213_v34, %v2170_v44  ;;  %v2172_v20 = vpop.f32.mrb[3].mxu1  ;;  %2251 = vrot.lane.b32.xlu1 %v2211_v9, %s4603_s21  ;;  %v4223_v59 = vadd.f32 %v2071_v42, %v1825_v32  ;;  %v1845_v7 = vpop.permute.xlu0 %1844 }
 0x325   : > { %v4216_v47 = vadd.f32 %v4215_v38, %v2172_v20  ;;  %2253 = vrot.lane.b32.xlu0 %v2212_v39, %s4603_s21 }
 0x326   : > { %v2213_v25 = vmax.f32 %v4214_v15, 0.0  ;;  %v2075_v36 = vpop.f32.mrb[8].mxu0 }
 0x327   : > { %v2214_v37 = vmax.f32 %v4216_v47, 0.0  ;;  %v2077_v40 = vpop.f32.mrb[9].mxu0  ;;  %v2176_v41 = vpop.f32.mrb[4].mxu1  ;;  %v4225_v4 = vadd.f32 %v2075_v36, %v1830_v1 }
 0x328   : > { %v4218_v52 = vadd.f32 %v4217_v50, %v2176_v41  ;;  %v2178_v29 = vpop.f32.mrb[5].mxu1  ;;  %2255 = vrot.lane.b32.xlu1 %v2213_v25, %s4603_s21  ;;  %v4227_v48 = vadd.f32 %v2077_v40, %v1830_v1 }
 0x329   : > { %v4220_v43 = vadd.f32 %v4219_v24, %v2178_v29  ;;  %2257 = vrot.lane.b32.xlu0 %v2214_v37, %s4603_s21 }
 0x32a   : > { %v2215_v55 = vmax.f32 %v4218_v52, 0.0  ;;  %v2081_v58 = vpop.f32.mrb[10].mxu0 }
 0x32b   : > { %v2216_v60 = vmax.f32 %v4220_v43, 0.0  ;;  %v2083_v62 = vpop.f32.mrb[11].mxu0  ;;  %v2182_v63 = vpop.f32.mrb[6].mxu1  ;;  %v4229_v18 = vadd.f32 %v2081_v58, %v1835_v49 }
 0x32c   : > { %v4222_v0 = vadd.f32 %v4221_v54, %v2182_v63  ;;  %v2184_v35 = vpop.f32.mrb[7].mxu1  ;;  %2259 = vrot.lane.b32.xlu1 %v2215_v55, %s4603_s21  ;;  %v4231_v22 = vadd.f32 %v2083_v62, %v1835_v49 }
 0x32d   : > { %v4224_v3 = vadd.f32 %v4223_v59, %v2184_v35  ;;  %2261 = vrot.lane.b32.xlu0 %v2216_v60, %s4603_s21 }
 0x32e   : > { %v2217_v5 = vmax.f32 %v4222_v0, 0.0  ;;  %v2087_v6 = vpop.f32.mrb[12].mxu0 }
 0x32f   : > { %v2218_v10 = vmax.f32 %v4224_v3, 0.0  ;;  %v2089_v12 = vpop.f32.mrb[13].mxu0  ;;  %v2188_v13 = vpop.f32.mrb[8].mxu1  ;;  %v4233_v45 = vadd.f32 %v2087_v6, %v1840_v28 }
 0x330   : > { %v4226_v14 = vadd.f32 %v4225_v4, %v2188_v13  ;;  %v2190_v16 = vpop.f32.mrb[9].mxu1  ;;  %2263 = vrot.lane.b32.xlu1 %v2217_v5, %s4603_s21  ;;  %v4235_v30 = vadd.f32 %v2089_v12, %v1840_v28  ;;  %v4613_v12 = vmov (!%p3814_p3), 0.0  }
 0x331   : > { %v4228_v17 = vadd.f32 %v4227_v48, %v2190_v16  ;;  %2265 = vrot.lane.b32.xlu0 %v2218_v10, %s4603_s21 }
 0x332   : > { %v2219_v19 = vmax.f32 %v4226_v14, 0.0  ;;  %v2093_v21 = vpop.f32.mrb[14].mxu0 }
 0x333   : > { %v2220_v56 = vmax.f32 %v4228_v17, 0.0  ;;  %v2095_v23 = vpop.f32.mrb[15].mxu0  ;;  %v2194_v57 = vpop.f32.mrb[10].mxu1  ;;  %v4237_v39 = vadd.f32 %v2093_v21, %v1845_v7 }
 0x334   : > { %v4230_v26 = vadd.f32 %v4229_v18, %v2194_v57  ;;  %v2196_v27 = vpop.f32.mrb[11].mxu1  ;;  %2267 = vrot.lane.b32.xlu1 %v2219_v19, %s4603_s21  ;;  %v4239_v44 = vadd.f32 %v2095_v23, %v1845_v7 }
 0x335   : > { %v4232_v61 = vadd.f32 %v4231_v22, %v2196_v27  ;;  %2269 = vrot.lane.b32.xlu0 %v2220_v56, %s4603_s21 }
 0x336   : > { %v2221_v2 = vmax.f32 %v4230_v26, 0.0 }
 0x337   : > { %v2222_v31 = vmax.f32 %v4232_v61, 0.0  ;;  %v2200_v33 = vpop.f32.mrb[12].mxu1 }
 0x338   : > { %v4234_v34 = vadd.f32 %v4233_v45, %v2200_v33  ;;  %v2202_v9 = vpop.f32.mrb[13].mxu1  ;;  %2271 = vrot.lane.b32.xlu1 %v2221_v2, %s4603_s21 }
 0x339   : > { %v4236_v38 = vadd.f32 %v4235_v30, %v2202_v9  ;;  %2273 = vrot.lane.b32.xlu0 %v2222_v31, %s4603_s21 }
 0x33a   : > { %v2223_v42 = vmax.f32 %v4234_v34, 0.0 }
 0x33b   : > { %v2224_v15 = vmax.f32 %v4236_v38, 0.0  ;;  %v2206_v20 = vpop.f32.mrb[14].mxu1 }
 0x33c   : > { %v4238_v46 = vadd.f32 %v4237_v39, %v2206_v20  ;;  %v2208_v47 = vpop.f32.mrb[15].mxu1  ;;  %2275 = vrot.lane.b32.xlu1 %v2223_v42, %s4603_s21 }
 0x33d   : > { %v4240_v50 = vadd.f32 %v4239_v44, %v2208_v47  ;;  %2277 = vrot.lane.b32.xlu0 %v2224_v15, %s4603_s21 }
 0x33e   : > { %v2225_v25 = vmax.f32 %v4238_v46, 0.0 }
 0x33f   : > { %v2226_v36 = vmax.f32 %v4240_v50, 0.0 }
 0x340   : > { %2279 = vrot.lane.b32.xlu1 %v2225_v25, %s4603_s21 }
 0x341   : > { %2281 = vrot.lane.b32.xlu0 %v2226_v36, %s4603_s21  ;;  %s5712_s21 = scalar_lea.vmem [#allocation6], %s4747_s14 }
 0x396   : > { %v2252_v24 = vpop.permute.xlu1 %2251 }
 0x397   : > { %2308 = vst.msk [vmem:[#allocation4] sm:$0xff] %vm2307_vm8, %v2252_v24  ;;  %v2254_v37 = vpop.permute.xlu0 %2253 }
 0x398   : > { %v2283_v40 = vsel %vm425_vm0, %v2252_v24, %v2254_v37  ;;  %2338 = vst.msk [vmem:[#allocation4] sm:$0xff] (!%p3814_p3), %vm2337_vm13, %v4613_v12 }
 0x399   : > { %2309 = vst.msk [vmem:[#allocation4 + $0x8] sm:$0xff] %vm525_vm1, %v2283_v40 }
 0x39a   : > { %2325 = vst.msk [vmem:[#allocation4 + $0x8] sm:$0xff] %vm2324_vm11, %v4601_v8  ;;  %v2256_v41 = vpop.permute.xlu1 %2255 }
 0x39b   : > { %2310 = vst.msk [vmem:[#allocation4 + $0x10] sm:$0xff] %vm2307_vm8, %v2256_v41  ;;  %v2258_v52 = vpop.permute.xlu0 %2257 }
 0x39c   : > { %v2284_v29 = vsel %vm425_vm0, %v2256_v41, %v2258_v52  ;;  %2339 = vst.msk [vmem:[#allocation4 + $0x10] sm:$0xff] (!%p3814_p3), %vm2337_vm13, %v4613_v12 }
 0x39d   : > { %2311 = vst.msk [vmem:[#allocation4 + $0x18] sm:$0xff] %vm525_vm1, %v2284_v29 }
 0x39e   : > { %2326 = vst.msk [vmem:[#allocation4 + $0x18] sm:$0xff] %vm2324_vm11, %v4601_v8  ;;  %v2260_v32 = vpop.permute.xlu1 %2259 }
 0x39f   : > { %2312 = vst.msk [vmem:[#allocation4 + $0x20] sm:$0xff] %vm2307_vm8, %v2260_v32  ;;  %v2262_v43 = vpop.permute.xlu0 %2261 }
 0x3a0   : > { %v2285_v54 = vsel %vm425_vm0, %v2260_v32, %v2262_v43  ;;  %2340 = vst.msk [vmem:[#allocation4 + $0x20] sm:$0xff] (!%p3814_p3), %vm2337_vm13, %v4613_v12 }
 0x3a1   : > { %2313 = vst.msk [vmem:[#allocation4 + $0x28] sm:$0xff] %vm525_vm1, %v2285_v54 }
 0x3a2   : > { %2327 = vst.msk [vmem:[#allocation4 + $0x28] sm:$0xff] %vm2324_vm11, %v4601_v8  ;;  %v2264_v55 = vpop.permute.xlu1 %2263 }
 0x3a3   : > { %2314 = vst.msk [vmem:[#allocation4 + $0x30] sm:$0xff] %vm2307_vm8, %v2264_v55  ;;  %v2266_v58 = vpop.permute.xlu0 %2265 }
 0x3a4   : > { %v2286_v59 = vsel %vm425_vm0, %v2264_v55, %v2266_v58  ;;  %2341 = vst.msk [vmem:[#allocation4 + $0x30] sm:$0xff] (!%p3814_p3), %vm2337_vm13, %v4613_v12 }
 0x3a5   : > { %2315 = vst.msk [vmem:[#allocation4 + $0x38] sm:$0xff] %vm525_vm1, %v2286_v59 }
 0x3a6   : > { %2328 = vst.msk [vmem:[#allocation4 + $0x38] sm:$0xff] %vm2324_vm11, %v4601_v8  ;;  %v2268_v60 = vpop.permute.xlu1 %2267 }
 0x3a7   : > { %2316 = vst.msk [vmem:[#allocation4 + $0x40] sm:$0xff] %vm2307_vm8, %v2268_v60  ;;  %v2270_v62 = vpop.permute.xlu0 %2269 }
 0x3a8   : > { %v2287_v63 = vsel %vm425_vm0, %v2268_v60, %v2270_v62  ;;  %2342 = vst.msk [vmem:[#allocation4 + $0x40] sm:$0xff] (!%p3814_p3), %vm2337_vm13, %v4613_v12 }
 0x3a9   : > { %2317 = vst.msk [vmem:[#allocation4 + $0x48] sm:$0xff] %vm525_vm1, %v2287_v63 }
 0x3aa   : > { %2329 = vst.msk [vmem:[#allocation4 + $0x48] sm:$0xff] %vm2324_vm11, %v4601_v8  ;;  %v2272_v0 = vpop.permute.xlu1 %2271 }
 0x3ab   : > { %2318 = vst.msk [vmem:[#allocation4 + $0x50] sm:$0xff] %vm2307_vm8, %v2272_v0  ;;  %v2274_v35 = vpop.permute.xlu0 %2273 }
 0x3ac   : > { %v2288_v1 = vsel %vm425_vm0, %v2272_v0, %v2274_v35  ;;  %2343 = vst.msk [vmem:[#allocation4 + $0x50] sm:$0xff] (!%p3814_p3), %vm2337_vm13, %v4613_v12 }
 0x3ad   : > { %2319 = vst.msk [vmem:[#allocation4 + $0x58] sm:$0xff] %vm525_vm1, %v2288_v1 }
 0x3ae   : > { %2330 = vst.msk [vmem:[#allocation4 + $0x58] sm:$0xff] %vm2324_vm11, %v4601_v8  ;;  %v2276_v3 = vpop.permute.xlu1 %2275 }
 0x3af   : > { %2320 = vst.msk [vmem:[#allocation4 + $0x60] sm:$0xff] %vm2307_vm8, %v2276_v3  ;;  %v2278_v4 = vpop.permute.xlu0 %2277 }
 0x3b0   : > { %v2289_v5 = vsel %vm425_vm0, %v2276_v3, %v2278_v4  ;;  %2336 = sbr.rel (%p3814_p3) target bundleno = 951 (0x3b7), region = 90  ;;  %2344 = vst.msk [vmem:[#allocation4 + $0x60] sm:$0xff] (!%p3814_p3), %vm2337_vm13, %v4613_v12 }
 0x3b1   : > { %2321 = vst.msk [vmem:[#allocation4 + $0x68] sm:$0xff] %vm525_vm1, %v2289_v5 }
 0x3b2   : > { %2331 = vst.msk [vmem:[#allocation4 + $0x68] sm:$0xff] %vm2324_vm11, %v4601_v8  ;;  %v2280_v6 = vpop.permute.xlu1 %2279 }
 0x3b3   : > { %2322 = vst.msk [vmem:[#allocation4 + $0x70] sm:$0xff] %vm2307_vm8, %v2280_v6  ;;  %v2282_v48 = vpop.permute.xlu0 %2281 }
 0x3b4   : > { %v2290_v10 = vsel %vm425_vm0, %v2280_v6, %v2282_v48  ;;  %2345 = vst.msk [vmem:[#allocation4 + $0x70] sm:$0xff] (!%p3814_p3), %vm2337_vm13, %v4613_v12 }
 0x3b5   : > { %2323 = vst.msk [vmem:[#allocation4 + $0x78] sm:$0xff] %vm525_vm1, %v2290_v10 }
 0x3b6   : > { %2332 = vst.msk [vmem:[#allocation4 + $0x78] sm:$0xff] %vm2324_vm11, %v4601_v8 }
 0x3b7 PF: > { %p3815_p4 = scmp.ne.s32.totalorder %s4583_s27, 3 }
 0x3b8   : > { %vm2350_vm0 = vcmask (!%p3815_p4), 269448   ;;  %v4614_v8 = vmov (!%p3815_p4), 0.0  }
 0x3b9   : > { %2349 = sbr.rel (%p3815_p4) target bundleno = 960 (0x3c0), region = 94  ;;  %2351 = vst.msk [vmem:[#allocation4 + $0x8] sm:$0xff] (!%p3815_p4), %vm2350_vm0, %v4614_v8  ;;  %2352 = vst.msk [vmem:[#allocation4 + $0x18] sm:$0xff] (!%p3815_p4), %vm2350_vm0, %v4614_v8 }
 0x3ba   : > { %2353 = vst.msk [vmem:[#allocation4 + $0x28] sm:$0xff] (!%p3815_p4), %vm2350_vm0, %v4614_v8  ;;  %2354 = vst.msk [vmem:[#allocation4 + $0x38] sm:$0xff] (!%p3815_p4), %vm2350_vm0, %v4614_v8 }
 0x3bb   : > { %2355 = vst.msk [vmem:[#allocation4 + $0x48] sm:$0xff] (!%p3815_p4), %vm2350_vm0, %v4614_v8  ;;  %2356 = vst.msk [vmem:[#allocation4 + $0x58] sm:$0xff] (!%p3815_p4), %vm2350_vm0, %v4614_v8 }
 0x3bc   : > { %2357 = vst.msk [vmem:[#allocation4 + $0x68] sm:$0xff] (!%p3815_p4), %vm2350_vm0, %v4614_v8  ;;  %2358 = vst.msk [vmem:[#allocation4 + $0x78] sm:$0xff] (!%p3815_p4), %vm2350_vm0, %v4614_v8 }
 0x3c0 PF: > { %v5716_v13 = vld [vmem:[#allocation4 + $0x10] sm:$0xff]  ;;  %v5718_v14 = vld [vmem:[#allocation4] sm:$0xff]  ;;  %4347 = vset.pattern.permute.xlu0 %v4612_v51  ;;  %4348 = vset.pattern.permute.xlu1 %v4612_v51  ;;  %v5726_v16 = vld [vmem:[#allocation4 + $0x18] sm:$0xff]  ;;  %s6411_s13 = smov 94   ;;  %s3825_s18 = sshll.u32 %s4587_s28, 5 }
 0x3c1   : > { %2507 = vrot.lane.b32.xlu1 %v5716_v13, %s4605_s29  ;;  %2503 = vrot.lane.b32.xlu0 %v5718_v14, %s4605_s29  ;;  %v5728_v49 = vld [vmem:[#allocation4 + $0x8] sm:$0xff]  ;;  %v5736_v18 = vld [vmem:[#allocation4 + $0x20] sm:$0xff]  ;;  %v5738_v51 = vld [vmem:[#allocation4 + $0x30] sm:$0xff]  ;;  %v4425_v42 = vpack.c.bf16 %v5716_v13, %v5718_v14  ;;  %s3662_s12 = sadd.s32 %s4583_s27, %s3825_s18  ;;  %s3665_s11 = sshll.u32 %s5712_s21, 4  ;;  %s6308_s11 = int_to_ptr.vmem [resolvable:$true] %s3665_s11 }
 0x3c2   : > { %v5734_v17 = vld [vmem:[#allocation4 + $0x28] sm:$0xff]  ;;  %v5744_v19 = vld [vmem:[#allocation4 + $0x38] sm:$0xff]  ;;  %v5752_v22 = vld [vmem:[#allocation4 + $0x40] sm:$0xff]  ;;  %v4431_v36 = vpack.c.bf16 %v5738_v51, %v5736_v18  ;;  %s3826_s28 = sshll.u32 %s3662_s12, 7 }
 0x3c3   : > { %v5750_v21 = vld [vmem:[#allocation4 + $0x48] sm:$0xff]  ;;  %v5754_v56 = vld [vmem:[#allocation4 + $0x50] sm:$0xff]  ;;  %v5760_v23 = vld [vmem:[#allocation4 + $0x58] sm:$0xff] }
 0x3c4   : > { %v5766_v57 = vld [vmem:[#allocation4 + $0x68] sm:$0xff]  ;;  %v5768_v26 = vld [vmem:[#allocation4 + $0x60] sm:$0xff]  ;;  %v5770_v27 = vld [vmem:[#allocation4 + $0x70] sm:$0xff]  ;;  %v4437_v43 = vpack.c.bf16 %v5754_v56, %v5752_v22 }
 0x3c5   : > { %2509 = vrot.lane.b32.xlu1 %v5726_v16, %s4605_s29  ;;  %2505 = vrot.lane.b32.xlu0 %v5728_v49, %s4605_s29  ;;  %v5776_v28 = vld [vmem:[#allocation4 + $0x78] sm:$0xff]  ;;  %v3128_v61 = vld [vmem:[%s6371_s5 + $0x8] sm:$0xff]  ;;  %v4443_v0 = vpack.c.bf16 %v5770_v27, %v5768_v26  ;;  %v3151_v53 = vld [vmem:[%s6371_s5 + $0xc0] sm:$0xff] }
 0x3c6   : > { %3375 = vmatprep.mubr.f32.mxu1 %v3128_v61 }
 0x3c9   : > { %2513 = vrot.lane.b32.xlu1 %v5734_v17, %s4605_s29  ;;  %2511 = vrot.lane.b32.xlu0 %v5736_v18, %s4605_s29 }
 0x3cd   : > { %2517 = vrot.lane.b32.xlu1 %v5744_v19, %s4605_s29  ;;  %2515 = vrot.lane.b32.xlu0 %v5738_v51, %s4605_s29 }
 0x3d1   : > { %2521 = vrot.lane.b32.xlu1 %v5750_v21, %s4605_s29  ;;  %2519 = vrot.lane.b32.xlu0 %v5752_v22, %s4605_s29 }
 0x3d5   : > { %2525 = vrot.lane.b32.xlu1 %v5760_v23, %s4605_s29  ;;  %2523 = vrot.lane.b32.xlu0 %v5754_v56, %s4605_s29 }
 0x3d9   : > { %2529 = vrot.lane.b32.xlu1 %v5766_v57, %s4605_s29  ;;  %2527 = vrot.lane.b32.xlu0 %v5768_v26, %s4605_s29 }
 0x3dd   : > { %2533 = vrot.lane.b32.xlu1 %v5776_v28, %s4605_s29  ;;  %2531 = vrot.lane.b32.xlu0 %v5770_v27, %s4605_s29  ;;  %s6306_s29 = scalar_lea.hbm %s6373_s7, %s3826_s28 }
 0x3e1   : > { %2601 = vrot.lane.b32.xlu1 %v5728_v49, %s4606_s30  ;;  %2599 = vrot.lane.b32.xlu0 %v5718_v14, %s4606_s30 }
 0x3e5   : > { %2605 = vrot.lane.b32.xlu1 %v5726_v16, %s4606_s30  ;;  %2603 = vrot.lane.b32.xlu0 %v5716_v13, %s4606_s30 }
 0x3e9   : > { %2417 = vrot.lane.b32.xlu1 %v5728_v49, %s4604_s0  ;;  %2415 = vrot.lane.b32.xlu0 %v5718_v14, %s4604_s0 }
 0x3ed   : > { %2421 = vrot.lane.b32.xlu1 %v5726_v16, %s4604_s0  ;;  %2419 = vrot.lane.b32.xlu0 %v5716_v13, %s4604_s0 }
 0x3f1   : > { %2609 = vrot.lane.b32.xlu1 %v5734_v17, %s4606_s30  ;;  %2607 = vrot.lane.b32.xlu0 %v5736_v18, %s4606_s30 }
 0x3f5   : > { %2613 = vrot.lane.b32.xlu1 %v5744_v19, %s4606_s30  ;;  %2611 = vrot.lane.b32.xlu0 %v5738_v51, %s4606_s30 }
 0x3f9   : > { %2425 = vrot.lane.b32.xlu1 %v5734_v17, %s4604_s0  ;;  %2423 = vrot.lane.b32.xlu0 %v5736_v18, %s4604_s0 }
 0x3fd   : > { %2429 = vrot.lane.b32.xlu1 %v5744_v19, %s4604_s0  ;;  %2427 = vrot.lane.b32.xlu0 %v5738_v51, %s4604_s0 }
 0x401   : > { %2617 = vrot.lane.b32.xlu1 %v5750_v21, %s4606_s30  ;;  %2615 = vrot.lane.b32.xlu0 %v5752_v22, %s4606_s30 }
 0x405   : > { %2621 = vrot.lane.b32.xlu1 %v5760_v23, %s4606_s30  ;;  %2619 = vrot.lane.b32.xlu0 %v5754_v56, %s4606_s30 }
 0x409   : > { %2433 = vrot.lane.b32.xlu1 %v5750_v21, %s4604_s0  ;;  %2431 = vrot.lane.b32.xlu0 %v5752_v22, %s4604_s0 }
 0x40d   : > { %2437 = vrot.lane.b32.xlu1 %v5760_v23, %s4604_s0  ;;  %2435 = vrot.lane.b32.xlu0 %v5754_v56, %s4604_s0 }
 0x411   : > { %2625 = vrot.lane.b32.xlu1 %v5766_v57, %s4606_s30  ;;  %2623 = vrot.lane.b32.xlu0 %v5768_v26, %s4606_s30 }
 0x415   : > { %2629 = vrot.lane.b32.xlu1 %v5776_v28, %s4606_s30  ;;  %2627 = vrot.lane.b32.xlu0 %v5770_v27, %s4606_s30  ;;  %s6408_s30 = smov 111  }
 0x419   : > { %2441 = vrot.lane.b32.xlu1 %v5766_v57, %s4604_s0  ;;  %2439 = vrot.lane.b32.xlu0 %v5768_v26, %s4604_s0 }
 0x41d   : > { %2445 = vrot.lane.b32.xlu1 %v5776_v28, %s4604_s0  ;;  %2443 = vrot.lane.b32.xlu0 %v5770_v27, %s4604_s0  ;;  %s6409_s0 = smov 110  }
 0x421   : > { %2881 = vrot.lane.b32.xlu1 %v5728_v49, %s4609_s9  ;;  %2879 = vrot.lane.b32.xlu0 %v5718_v14, %s4609_s9 }
 0x425   : > { %2885 = vrot.lane.b32.xlu1 %v5726_v16, %s4609_s9  ;;  %2883 = vrot.lane.b32.xlu0 %v5716_v13, %s4609_s9 }
 0x429   : > { %2697 = vrot.lane.b32.xlu1 %v5728_v49, %s6408_s30  ;;  %2695 = vrot.lane.b32.xlu0 %v5718_v14, %s6408_s30 }
 0x42d   : > { %2701 = vrot.lane.b32.xlu1 %v5726_v16, %s6408_s30  ;;  %2699 = vrot.lane.b32.xlu0 %v5716_v13, %s6408_s30 }
 0x431   : > { %2889 = vrot.lane.b32.xlu1 %v5734_v17, %s4609_s9  ;;  %2887 = vrot.lane.b32.xlu0 %v5736_v18, %s4609_s9 }
 0x433   : > { %v2508_v45 = vpop.permute.xlu1 %2507  ;;  %v2504_v2 = vpop.permute.xlu0 %2503 }
 0x435   : > { %2893 = vrot.lane.b32.xlu1 %v5744_v19, %s4609_s9  ;;  %2891 = vrot.lane.b32.xlu0 %v5738_v51, %s4609_s9 }
 0x437   : > { %v2510_v30 = vpop.permute.xlu1 %2509  ;;  %v2506_v31 = vpop.permute.xlu0 %2505 }
 0x438   : > { %v2536_v33 = vsel %vm864_vm12, %v2508_v45, %v2510_v30  ;;  %v2535_v34 = vsel %vm864_vm12, %v2504_v2, %v2506_v31 }
 0x439   : > { %2705 = vrot.lane.b32.xlu1 %v5734_v17, %s6408_s30  ;;  %2703 = vrot.lane.b32.xlu0 %v5736_v18, %s6408_s30  ;;  %v4422_v39 = vpack.c.bf16 %v2536_v33, %v2535_v34 }
 0x43b   : > { %v2514_v9 = vpop.permute.xlu1 %2513  ;;  %v2512_v7 = vpop.permute.xlu0 %2511  ;;  %4423 = vmatprep.subr.msk.bf16.mxu1 %vm5222_vm14, %v4422_v39 }
 0x43c   : > { %v2537_v38 = vsel %vm864_vm12, %v2512_v7, %v2514_v9  ;;  %4426 = vmatpush3.bf16.msk.msra.mxu1 %vm4952_vm9, %v4425_v42 }
 0x43d   : > { %2709 = vrot.lane.b32.xlu1 %v5744_v19, %s6408_s30  ;;  %2707 = vrot.lane.b32.xlu0 %v5738_v51, %s6408_s30 }
 0x43f   : > { %v2518_v44 = vpop.permute.xlu1 %2517  ;;  %v2516_v15 = vpop.permute.xlu0 %2515 }
 0x440   : > { %v2538_v20 = vsel %vm864_vm12, %v2516_v15, %v2518_v44 }
 0x441   : > { %2897 = vrot.lane.b32.xlu1 %v5750_v21, %s4609_s9  ;;  %2895 = vrot.lane.b32.xlu0 %v5752_v22, %s4609_s9  ;;  %v4428_v25 = vpack.c.bf16 %v2538_v20, %v2537_v38 }
 0x443   : > { %v2522_v46 = vpop.permute.xlu1 %2521  ;;  %v2520_v47 = vpop.permute.xlu0 %2519  ;;  %4429 = vmatprep.subr.msk.bf16.mxu1 %vm5222_vm14, %v4428_v25 }
 0x444   : > { %v2539_v50 = vsel %vm864_vm12, %v2520_v47, %v2522_v46  ;;  %4432 = vmatpush3.bf16.msk.msra.mxu1 %vm4952_vm9, %v4431_v36 }
 0x445   : > { %2901 = vrot.lane.b32.xlu1 %v5760_v23, %s4609_s9  ;;  %2899 = vrot.lane.b32.xlu0 %v5754_v56, %s4609_s9 }
 0x447   : > { %v2526_v24 = vpop.permute.xlu1 %2525  ;;  %v2524_v37 = vpop.permute.xlu0 %2523 }
 0x448   : > { %v2540_v40 = vsel %vm864_vm12, %v2524_v37, %v2526_v24 }
 0x449   : > { %2713 = vrot.lane.b32.xlu1 %v5750_v21, %s6408_s30  ;;  %2711 = vrot.lane.b32.xlu0 %v5752_v22, %s6408_s30  ;;  %v4434_v32 = vpack.c.bf16 %v2540_v40, %v2539_v50 }
 0x44b   : > { %v2530_v41 = vpop.permute.xlu1 %2529  ;;  %v2528_v52 = vpop.permute.xlu0 %2527  ;;  %4435 = vmatprep.subr.msk.bf16.mxu1 %vm5222_vm14, %v4434_v32 }
 0x44c   : > { %v2541_v29 = vsel %vm864_vm12, %v2528_v52, %v2530_v41  ;;  %4438 = vmatpush3.bf16.msk.msra.mxu1 %vm4952_vm9, %v4437_v43 }
 0x44d   : > { %2717 = vrot.lane.b32.xlu1 %v5760_v23, %s6408_s30  ;;  %2715 = vrot.lane.b32.xlu0 %v5754_v56, %s6408_s30 }
 0x44f   : > { %v2534_v54 = vpop.permute.xlu1 %2533  ;;  %v2532_v55 = vpop.permute.xlu0 %2531 }
 0x450   : > { %v2542_v58 = vsel %vm864_vm12, %v2532_v55, %v2534_v54 }
 0x451   : > { %2905 = vrot.lane.b32.xlu1 %v5766_v57, %s4609_s9  ;;  %2903 = vrot.lane.b32.xlu0 %v5768_v26, %s4609_s9  ;;  %v4440_v63 = vpack.c.bf16 %v2542_v58, %v2541_v29 }
 0x453   : > { %v2602_v59 = vpop.permute.xlu1 %2601  ;;  %v2600_v60 = vpop.permute.xlu0 %2599  ;;  %4441 = vmatprep.subr.msk.bf16.mxu1 %vm5222_vm14, %v4440_v63 }
 0x454   : > { %v2631_v62 = vsel %vm985_vm15, %v2600_v60, %v2602_v59  ;;  %4444 = vmatpush3.bf16.msk.msra.mxu1 %vm4952_vm9, %v4443_v0 }
 0x455   : > { %2909 = vrot.lane.b32.xlu1 %v5776_v28, %s4609_s9  ;;  %2907 = vrot.lane.b32.xlu0 %v5770_v27, %s4609_s9  ;;  %s6410_s9 = smov 95  }
 0x457   : > { %v2606_v35 = vpop.permute.xlu1 %2605  ;;  %v2604_v1 = vpop.permute.xlu0 %2603 }
 0x458   : > { %v2632_v3 = vsel %vm985_vm15, %v2604_v1, %v2606_v35 }
 0x459   : > { %2721 = vrot.lane.b32.xlu1 %v5766_v57, %s6408_s30  ;;  %2719 = vrot.lane.b32.xlu0 %v5768_v26, %s6408_s30  ;;  %v4446_v48 = vpack.c.bf16 %v2632_v3, %v2631_v62 }
 0x45b   : > { %v2418_v4 = vpop.permute.xlu1 %2417  ;;  %v2416_v5 = vpop.permute.xlu0 %2415  ;;  %4447 = vmatprep.subr.msk.bf16.mxu1 %vm4952_vm9, %v4446_v48 }
 0x45c   : > { %v2447_v6 = vsel %vm755_vm10, %v2416_v5, %v2418_v4 }
 0x45d   : > { %2725 = vrot.lane.b32.xlu1 %v5776_v28, %s6408_s30  ;;  %2723 = vrot.lane.b32.xlu0 %v5770_v27, %s6408_s30  ;;  %s6412_s30 = sand.u32 1, %s4575_s25  }
 0x45f   : > { %v2422_v10 = vpop.permute.xlu1 %2421  ;;  %v2420_v12 = vpop.permute.xlu0 %2419 }
 0x460   : > { %v2448_v8 = vsel %vm755_vm10, %v2420_v12, %v2422_v10 }
 0x461   : > { %2785 = vrot.lane.b32.xlu1 %v5728_v49, %s6409_s0  ;;  %2783 = vrot.lane.b32.xlu0 %v5718_v14, %s6409_s0  ;;  %v4147_v61 = vpack.c.bf16 %v2448_v8, %v2447_v6  ;;  %v3127_v8 = vld [vmem:[%s6371_s5] sm:$0xff] }
 0x463   : > { %v2610_v45 = vpop.permute.xlu1 %2609  ;;  %v2608_v2 = vpop.permute.xlu0 %2607  ;;  %4148 = vmatpush3.bf16.msra.mxu1 %v4147_v61 }
 0x464   : > { %v2633_v30 = vsel %vm985_vm15, %v2608_v2, %v2610_v45  ;;  %v3133_v45 = vld [vmem:[%s6371_s5 + $0x30] sm:$0xff] }
 0x465   : > { %2789 = vrot.lane.b32.xlu1 %v5726_v16, %s6409_s0  ;;  %2787 = vrot.lane.b32.xlu0 %v5716_v13, %s6409_s0 }
 0x467   : > { %v2614_v31 = vpop.permute.xlu1 %2613  ;;  %v2612_v33 = vpop.permute.xlu0 %2611 }
 0x468   : > { %v2634_v34 = vsel %vm985_vm15, %v2612_v33, %v2614_v31  ;;  %v3132_v31 = vld [vmem:[%s6371_s5 + $0x28] sm:$0xff] }
 0x469   : > { %2977 = vrot.lane.b32.xlu1 %v5728_v49, %s6410_s9  ;;  %2975 = vrot.lane.b32.xlu0 %v5718_v14, %s6410_s9  ;;  %v4449_v39 = vpack.c.bf16 %v2634_v34, %v2633_v30  ;;  %v3138_v34 = vld [vmem:[%s6371_s5 + $0x58] sm:$0xff] }
 0x46b   : > { %v2426_v9 = vpop.permute.xlu1 %2425  ;;  %v2424_v7 = vpop.permute.xlu0 %2423  ;;  %4450 = vmatprep.subr.msk.bf16.mxu1 %vm4952_vm9, %v4449_v39 }
 0x46c   : > { %v2449_v38 = vsel %vm755_vm10, %v2424_v7, %v2426_v9 }
 0x46d   : > { %2981 = vrot.lane.b32.xlu1 %v5726_v16, %s6410_s9  ;;  %2979 = vrot.lane.b32.xlu0 %v5716_v13, %s6410_s9 }
 0x46f   : > { %v2430_v42 = vpop.permute.xlu1 %2429  ;;  %v2428_v44 = vpop.permute.xlu0 %2427 }
 0x470   : > { %v2450_v15 = vsel %vm755_vm10, %v2428_v44, %v2430_v42  ;;  %v3143_v44 = vld [vmem:[%s6371_s5 + $0x80] sm:$0xff] }
 0x471   : > { %2793 = vrot.lane.b32.xlu1 %v5734_v17, %s6409_s0  ;;  %2791 = vrot.lane.b32.xlu0 %v5736_v18, %s6409_s0  ;;  %v4151_v20 = vpack.c.bf16 %v2450_v15, %v2449_v38  ;;  %v3137_v38 = vld [vmem:[%s6371_s5 + $0x50] sm:$0xff] }
 0x473   : > { %v2618_v46 = vpop.permute.xlu1 %2617  ;;  %v2616_v47 = vpop.permute.xlu0 %2615  ;;  %4152 = vmatpush3.bf16.msra.mxu1 %v4151_v20 }
 0x474   : > { %v2635_v50 = vsel %vm985_vm15, %v2616_v47, %v2618_v46  ;;  %v3142_v46 = vld [vmem:[%s6371_s5 + $0x78] sm:$0xff] }
 0x475   : > { %2797 = vrot.lane.b32.xlu1 %v5744_v19, %s6409_s0  ;;  %2795 = vrot.lane.b32.xlu0 %v5738_v51, %s6409_s0 }
 0x477   : > { %v2622_v25 = vpop.permute.xlu1 %2621  ;;  %v2620_v36 = vpop.permute.xlu0 %2619 }
 0x478   : > { %v2636_v24 = vsel %vm985_vm15, %v2620_v36, %v2622_v25 }
 0x479   : > { %2985 = vrot.lane.b32.xlu1 %v5734_v17, %s6410_s9  ;;  %2983 = vrot.lane.b32.xlu0 %v5736_v18, %s6410_s9  ;;  %v4452_v52 = vpack.c.bf16 %v2636_v24, %v2635_v50  ;;  %v3148_v50 = vld [vmem:[%s6371_s5 + $0xa8] sm:$0xff] }
 0x47b   : > { %v2434_v37 = vpop.permute.xlu1 %2433  ;;  %v2432_v40 = vpop.permute.xlu0 %2431  ;;  %4453 = vmatprep.subr.msk.bf16.mxu1 %vm4952_vm9, %v4452_v52  ;;  %v3152_v52 = vld [vmem:[%s6371_s5 + $0xc8] sm:$0xff] }
 0x47c   : > { %v2451_v41 = vsel %vm755_vm10, %v2432_v40, %v2434_v37  ;;  %v3147_v37 = vld [vmem:[%s6371_s5 + $0xa0] sm:$0xff] }
 0x47d   : > { %2989 = vrot.lane.b32.xlu1 %v5744_v19, %s6410_s9  ;;  %2987 = vrot.lane.b32.xlu0 %v5738_v51, %s6410_s9 }
 0x47f   : > { %v2438_v29 = vpop.permute.xlu1 %2437  ;;  %v2436_v32 = vpop.permute.xlu0 %2435 }
 0x480   : > { %v2452_v43 = vsel %vm755_vm10, %v2436_v32, %v2438_v29  ;;  %v3158_v32 = vld [vmem:[%s6371_s5 + $0xf8] sm:$0xff] }
 0x481   : > { %2801 = vrot.lane.b32.xlu1 %v5750_v21, %s6409_s0  ;;  %2799 = vrot.lane.b32.xlu0 %v5752_v22, %s6409_s0  ;;  %v4155_v54 = vpack.c.bf16 %v2452_v43, %v2451_v41  ;;  %v3153_v41 = vld [vmem:[%s6371_s5 + $0xd0] sm:$0xff] }
 0x482   : > { %v3157_v43 = vld [vmem:[%s6371_s5 + $0xf0] sm:$0xff] }
 0x483   : > { %v2626_v55 = vpop.permute.xlu1 %2625  ;;  %v2624_v58 = vpop.permute.xlu0 %2623  ;;  %4156 = vmatpush3.bf16.msra.mxu1 %v4155_v54 }
 0x484   : > { %v2637_v59 = vsel %vm985_vm15, %v2624_v58, %v2626_v55 }
 0x485   : > { %2805 = vrot.lane.b32.xlu1 %v5760_v23, %s6409_s0  ;;  %2803 = vrot.lane.b32.xlu0 %v5754_v56, %s6409_s0 }
 0x487   : > { %v2630_v60 = vpop.permute.xlu1 %2629  ;;  %v2628_v62 = vpop.permute.xlu0 %2627 }
 0x488   : > { %v2638_v63 = vsel %vm985_vm15, %v2628_v62, %v2630_v60  ;;  %v3130_v62 = vld [vmem:[%s6371_s5 + $0x18] sm:$0xff] }
 0x489   : > { %2993 = vrot.lane.b32.xlu1 %v5750_v21, %s6410_s9  ;;  %2991 = vrot.lane.b32.xlu0 %v5752_v22, %s6410_s9  ;;  %v4455_v3 = vpack.c.bf16 %v2638_v63, %v2637_v59  ;;  %v3162_v59 = vld [vmem:[%s6371_s5 + $0x118] sm:$0xff] }
 0x48b   : > { %v2442_v0 = vpop.permute.xlu1 %2441  ;;  %v2440_v35 = vpop.permute.xlu0 %2439  ;;  %4456 = vmatprep.subr.msk.bf16.mxu1 %vm4952_vm9, %v4455_v3 }
 0x48c   : > { %v2453_v1 = vsel %vm755_vm10, %v2440_v35, %v2442_v0 }
 0x48d   : > { %2997 = vrot.lane.b32.xlu1 %v5760_v23, %s6410_s9  ;;  %2995 = vrot.lane.b32.xlu0 %v5754_v56, %s6410_s9 }
 0x48f   : > { %v2446_v4 = vpop.permute.xlu1 %2445  ;;  %v2444_v5 = vpop.permute.xlu0 %2443 }
 0x490   : > { %v2454_v6 = vsel %vm755_vm10, %v2444_v5, %v2446_v4 }
 0x491   : > { %2809 = vrot.lane.b32.xlu1 %v5766_v57, %s6409_s0  ;;  %2807 = vrot.lane.b32.xlu0 %v5768_v26, %s6409_s0  ;;  %v4159_v48 = vpack.c.bf16 %v2454_v6, %v2453_v1 }
 0x493   : > { %v2882_v10 = vpop.permute.xlu1 %2881  ;;  %v2880_v12 = vpop.permute.xlu0 %2879  ;;  %4160 = vmatpush3.bf16.msra.mxu1 %v4159_v48 }
 0x494   : > { %v2911_v61 = vsel %vm1332_vm4, %v2880_v12, %v2882_v10  ;;  %v3239_v12 = vld [vmem:[%s6372_s6] sm:$0xff] }
 0x495   : > { %2813 = vrot.lane.b32.xlu1 %v5776_v28, %s6409_s0  ;;  %2811 = vrot.lane.b32.xlu0 %v5770_v27, %s6409_s0  ;;  %s6314_s0 = scalar_lea.sflag [#allocation7], %s6412_s30 }
 0x496   : > { %3376 = vmatmul.mubr.f32.vlgmr.msra.gmra.mrb[16].mxu1 %v3127_v8  ;;  %v3242_v8 = vld [vmem:[%s6372_s6 + $0x18] sm:$0xff] }
 0x497   : > { %v2886_v2 = vpop.permute.xlu1 %2885  ;;  %v2884_v30 = vpop.permute.xlu0 %2883  ;;  %3380 = vmatprep.mubr.f32.mxu1 %v3133_v45 }
 0x498   : > { %v2912_v33 = vsel %vm1332_vm4, %v2884_v30, %v2886_v2  ;;  %v3243_v30 = vld [vmem:[%s6372_s6 + $0x20] sm:$0xff] }
 0x499   : > { %3001 = vrot.lane.b32.xlu1 %v5766_v57, %s6410_s9  ;;  %2999 = vrot.lane.b32.xlu0 %v5768_v26, %s6410_s9  ;;  %v4458_v42 = vpack.c.bf16 %v2912_v33, %v2911_v61 }
 0x49a   : > { %3381 = vmatmul.mubr.f32.gmra.mrb[18].mxu1 %v3132_v31  ;;  %v3244_v31 = vld [vmem:[%s6372_s6 + $0x28] sm:$0xff] }
 0x49b   : > { %v2698_v9 = vpop.permute.xlu1 %2697  ;;  %v2696_v7 = vpop.permute.xlu0 %2695  ;;  %3385 = vmatprep.mubr.f32.mxu1 %v3138_v34  ;;  %4459 = vmatprep.subr.msk.bf16.mxu1 %vm4952_vm9, %v4458_v42 }
 0x49c   : > { %v2727_v39 = vsel %vm1106_vm2, %v2696_v7, %v2698_v9 }
 0x49d   : > { %3005 = vrot.lane.b32.xlu1 %v5776_v28, %s6410_s9  ;;  %3003 = vrot.lane.b32.xlu0 %v5770_v27, %s6410_s9 }
 0x49e   : > { %3386 = vmatmul.mubr.f32.gmra.mrb[20].mxu1 %v3137_v38  ;;  %v3245_v38 = vld [vmem:[%s6372_s6 + $0x30] sm:$0xff] }
 0x49f   : > { %v2702_v15 = vpop.permute.xlu1 %2701  ;;  %v2700_v20 = vpop.permute.xlu0 %2699  ;;  %3390 = vmatprep.mubr.f32.mxu1 %v3143_v44 }
 0x4a0   : > { %v2728_v47 = vsel %vm1106_vm2, %v2700_v20, %v2702_v15 }
 0x4a1   : > { %3065 = vrot.lane.b32.xlu1 %v5728_v49, %s6411_s13  ;;  %3063 = vrot.lane.b32.xlu0 %v5718_v14, %s6411_s13  ;;  %v4163_v25 = vpack.c.bf16 %v2728_v47, %v2727_v39  ;;  %v3246_v39 = vld [vmem:[%s6372_s6 + $0x38] sm:$0xff] }
 0x4a2   : > { %3391 = vmatmul.mubr.f32.gmra.mrb[22].mxu1 %v3142_v46 }
 0x4a3   : > { %v2890_v36 = vpop.permute.xlu1 %2889  ;;  %v2888_v24 = vpop.permute.xlu0 %2887  ;;  %4164 = vmatpush3.bf16.msra.mxu1 %v4163_v25  ;;  %3395 = vmatprep.mubr.f32.mxu1 %v3148_v50 }
 0x4a4   : > { %v2913_v40 = vsel %vm1332_vm4, %v2888_v24, %v2890_v36 }
 0x4a5   : > { %3069 = vrot.lane.b32.xlu1 %v5726_v16, %s6411_s13  ;;  %3067 = vrot.lane.b32.xlu0 %v5716_v13, %s6411_s13 }
 0x4a6   : > { %3396 = vmatmul.mubr.f32.gmra.mrb[24].mxu1 %v3147_v37 }
 0x4a7   : > { %v2894_v14 = vpop.permute.xlu1 %2893  ;;  %v2892_v49 = vpop.permute.xlu0 %2891  ;;  %3400 = vmatprep.mubr.f32.mxu1 %v3153_v41 }
 0x4a8   : > { %v2914_v29 = vsel %vm1332_vm4, %v2892_v49, %v2894_v14 }
 0x4a9   : > { %3073 = vrot.lane.b32.xlu1 %v5734_v17, %s6411_s13  ;;  %3071 = vrot.lane.b32.xlu0 %v5736_v18, %s6411_s13  ;;  %v4461_v55 = vpack.c.bf16 %v2914_v29, %v2913_v40  ;;  %v3163_v17 = vld [vmem:[%s6371_s5 + $0x120] sm:$0xff] }
 0x4aa   : > { %3401 = vmatmul.mubr.f32.gmra.mrb[26].mxu1 %v3152_v52 }
 0x4ab   : > { %v2706_v13 = vpop.permute.xlu1 %2705  ;;  %v2704_v16 = vpop.permute.xlu0 %2703  ;;  %3405 = vmatprep.mubr.f32.mxu1 %v3158_v32  ;;  %4462 = vmatprep.subr.msk.bf16.mxu1 %vm4952_vm9, %v4461_v55 }
 0x4ac   : > { %v2729_v54 = vsel %vm1106_vm2, %v2704_v16, %v2706_v13 }
 0x4ad   : > { %3077 = vrot.lane.b32.xlu1 %v5744_v19, %s6411_s13  ;;  %3075 = vrot.lane.b32.xlu0 %v5738_v51, %s6411_s13 }
 0x4ae   : > { %3406 = vmatmul.mubr.f32.gmra.mrb[28].mxu1 %v3157_v43 }
 0x4af   : > { %v2710_v18 = vpop.permute.xlu1 %2709  ;;  %v2708_v58 = vpop.permute.xlu0 %2707  ;;  %3410 = vmatprep.mubr.f32.mxu1 %v3163_v17 }
 0x4b0   : > { %v2730_v60 = vsel %vm1106_vm2, %v2708_v58, %v2710_v18 }
 0x4b1   : > { %3081 = vrot.lane.b32.xlu1 %v5750_v21, %s6411_s13  ;;  %3079 = vrot.lane.b32.xlu0 %v5752_v22, %s6411_s13  ;;  %v4167_v51 = vpack.c.bf16 %v2730_v60, %v2729_v54 }
 0x4b2   : > { %3411 = vmatmul.mubr.f32.gmra.mrb[30].mxu1 %v3162_v59 }
 0x4b3   : > { %v2898_v19 = vpop.permute.xlu1 %2897  ;;  %v2896_v63 = vpop.permute.xlu0 %2895  ;;  %4168 = vmatpush3.bf16.msra.mxu1 %v4167_v51  ;;  %3480 = vmatprep.mubr.f32.mxu1 %v3130_v62 }
 0x4b4   : > { %v2915_v0 = vsel %vm1332_vm4, %v2896_v63, %v2898_v19 }
 0x4b5   : > { %3085 = vrot.lane.b32.xlu1 %v5760_v23, %s6411_s13  ;;  %3083 = vrot.lane.b32.xlu0 %v5754_v56, %s6411_s13 }
 0x4b7   : > { %v2902_v35 = vpop.permute.xlu1 %2901  ;;  %v2900_v1 = vpop.permute.xlu0 %2899 }
 0x4b8   : > { %v2916_v21 = vsel %vm1332_vm4, %v2900_v1, %v2902_v35 }
 0x4b9   : > { %3089 = vrot.lane.b32.xlu1 %v5766_v57, %s6411_s13  ;;  %3087 = vrot.lane.b32.xlu0 %v5768_v26, %s6411_s13  ;;  %v4464_v5 = vpack.c.bf16 %v2916_v21, %v2915_v0 }
 0x4bb   : > { %v2714_v22 = vpop.permute.xlu1 %2713  ;;  %v2712_v3 = vpop.permute.xlu0 %2711  ;;  %4465 = vmatprep.subr.msk.bf16.mxu1 %vm4952_vm9, %v4464_v5 }
 0x4bc   : > { %v2731_v4 = vsel %vm1106_vm2, %v2712_v3, %v2714_v22 }
 0x4bd   : > { %3093 = vrot.lane.b32.xlu1 %v5776_v28, %s6411_s13  ;;  %3091 = vrot.lane.b32.xlu0 %v5770_v27, %s6411_s13  ;;  %v3240_v28 = vld [vmem:[%s6372_s6 + $0x8] sm:$0xff]  ;;  %v3241_v27 = vld [vmem:[%s6372_s6 + $0x10] sm:$0xff]  ;;  %s4615_s13 = smov [#allocation6]  }
 0x4be   : > { %s4509_s10 = sshll.u32 %s4615_s13, 4  ;;  %s4510_s10 = int_to_ptr.vmem [resolvable:$false] %s4509_s10 }
 0x4bf   : > { %v2718_v56 = vpop.permute.xlu1 %2717  ;;  %v2716_v23 = vpop.permute.xlu0 %2715  ;;  %s4511_s22 = scalar_lea.vmem %s4510_s10, 2048  ;;  %p4512_p10 = scmp.lt.s32.totalorder %s6308_s11, %s4510_s10 }
 0x4c0   : > { %v2732_v57 = vsel %vm1106_vm2, %v2716_v23, %v2718_v56 }
 0x4c1   : > { %v4171_v6 = vpack.c.bf16 %v2732_v57, %v2731_v4  ;;  %3249 = vperm.xlu0 %4347, %v3239_v12   ;;  %3254 = vperm.xlu1 %4348, %v3240_v28  }
 0x4c3   : > { %v2906_v26 = vpop.permute.xlu1 %2905  ;;  %v2904_v48 = vpop.permute.xlu0 %2903  ;;  %4172 = vmatpush3.bf16.msra.mxu1 %v4171_v6 }
 0x4c4   : > { %v2917_v10 = vsel %vm1332_vm4, %v2904_v48, %v2906_v26 }
 0x4c5   : > { %3259 = vperm.xlu1 %4348, %v3241_v27   ;;  %3264 = vperm.xlu0 %4347, %v3242_v8  }
 0x4c7   : > { %v2910_v61 = vpop.permute.xlu1 %2909  ;;  %v2908_v45 = vpop.permute.xlu0 %2907 }
 0x4c8   : > { %v2918_v2 = vsel %vm1332_vm4, %v2908_v45, %v2910_v61 }
 0x4c9   : > { %v4467_v7 = vpack.c.bf16 %v2918_v2, %v2917_v10  ;;  %3269 = vperm.xlu1 %4348, %v3243_v30   ;;  %3274 = vperm.xlu0 %4347, %v3244_v31  }
 0x4cb   : > { %v2722_v33 = vpop.permute.xlu1 %2721  ;;  %v2720_v34 = vpop.permute.xlu0 %2719  ;;  %4468 = vmatprep.subr.msk.bf16.mxu1 %vm4952_vm9, %v4467_v7 }
 0x4cc   : > { %v2733_v9 = vsel %vm1106_vm2, %v2720_v34, %v2722_v33 }
 0x4cd   : > { %3279 = vperm.xlu1 %4348, %v3245_v38   ;;  %3284 = vperm.xlu0 %4347, %v3246_v39  }
 0x4cf   : > { %v2726_v42 = vpop.permute.xlu1 %2725  ;;  %v2724_v44 = vpop.permute.xlu0 %2723 }
 0x4d0   : > { %v2734_v15 = vsel %vm1106_vm2, %v2724_v44, %v2726_v42  ;;  %v3129_v42 = vld [vmem:[%s6371_s5 + $0x10] sm:$0xff]  ;;  %v3135_v44 = vld [vmem:[%s6371_s5 + $0x40] sm:$0xff] }
 0x4d1   : > { %v4175_v20 = vpack.c.bf16 %v2734_v15, %v2733_v9 }
 0x4d3   : > { %v2786_v46 = vpop.permute.xlu1 %2785  ;;  %v2784_v11 = vpop.permute.xlu0 %2783  ;;  %4176 = vmatpush3.bf16.msra.mxu1 %v4175_v20 }
 0x4d4   : > { %v2815_v47 = vsel %vm1211_vm3, %v2784_v11, %v2786_v46  ;;  %v3134_v11 = vld [vmem:[%s6371_s5 + $0x38] sm:$0xff] }
 0x4d7   : > { %v2790_v50 = vpop.permute.xlu1 %2789  ;;  %v2788_v25 = vpop.permute.xlu0 %2787 }
 0x4d8   : > { %v2816_v36 = vsel %vm1211_vm3, %v2788_v25, %v2790_v50 }
 0x4d9   : > { %v4470_v16 = vpack.c.bf16 %v2816_v36, %v2815_v47  ;;  %v3140_v47 = vld [vmem:[%s6371_s5 + $0x68] sm:$0xff] }
 0x4db   : > { %v2978_v24 = vpop.permute.xlu1 %2977  ;;  %v2976_v37 = vpop.permute.xlu0 %2975 }
 0x4dc   : > { %v3007_v40 = vsel %vm1453_vm5, %v2976_v37, %v2978_v24  ;;  %v3139_v37 = vld [vmem:[%s6371_s5 + $0x60] sm:$0xff] }
 0x4df   : > { %v2982_v41 = vpop.permute.xlu1 %2981  ;;  %v2980_v14 = vpop.permute.xlu0 %2979 }
 0x4e0   : > { %v3008_v49 = vsel %vm1453_vm5, %v2980_v14, %v2982_v41 }
 0x4e1   : > { %v4177_v52 = vpack.c.bf16 %v3008_v49, %v3007_v40  ;;  %v3145_v40 = vld [vmem:[%s6371_s5 + $0x90] sm:$0xff] }
 0x4e3   : > { %v2794_v29 = vpop.permute.xlu1 %2793  ;;  %v2792_v32 = vpop.permute.xlu0 %2791  ;;  %4178 = vmatprep.subr.bf16.mxu1 %v4177_v52  ;;  %v3144_v52 = vld [vmem:[%s6371_s5 + $0x88] sm:$0xff] }
 0x4e4   : > { %v2817_v13 = vsel %vm1211_vm3, %v2792_v32, %v2794_v29  ;;  %4471 = vmatpush3.bf16.msk.msra.mxu1 %vm5222_vm14, %v4470_v16  ;;  %v3150_v29 = vld [vmem:[%s6371_s5 + $0xb8] sm:$0xff] }
 0x4e7   : > { %v2798_v43 = vpop.permute.xlu1 %2797  ;;  %v2796_v54 = vpop.permute.xlu0 %2795 }
 0x4e8   : > { %v2818_v55 = vsel %vm1211_vm3, %v2796_v54, %v2798_v43  ;;  %v3149_v54 = vld [vmem:[%s6371_s5 + $0xb0] sm:$0xff] }
 0x4e9   : > { %v4473_v35 = vpack.c.bf16 %v2818_v55, %v2817_v13  ;;  %v3155_v55 = vld [vmem:[%s6371_s5 + $0xe0] sm:$0xff] }
 0x4eb   : > { %v2986_v17 = vpop.permute.xlu1 %2985  ;;  %v2984_v18 = vpop.permute.xlu0 %2983 }
 0x4ec   : > { %v3009_v58 = vsel %vm1453_vm5, %v2984_v18, %v2986_v17 }
 0x4ef   : > { %v2990_v59 = vpop.permute.xlu1 %2989  ;;  %v2988_v60 = vpop.permute.xlu0 %2987 }
 0x4f0   : > { %v3010_v62 = vsel %vm1453_vm5, %v2988_v60, %v2990_v59  ;;  %v3154_v59 = vld [vmem:[%s6371_s5 + $0xd8] sm:$0xff]  ;;  %v3160_v60 = vld [vmem:[%s6371_s5 + $0x108] sm:$0xff] }
 0x4f1   : > { %v4181_v51 = vpack.c.bf16 %v3010_v62, %v3009_v58 }
 0x4f3   : > { %v2802_v19 = vpop.permute.xlu1 %2801  ;;  %v2800_v63 = vpop.permute.xlu0 %2799  ;;  %4182 = vmatprep.subr.bf16.mxu1 %v4181_v51 }
 0x4f4   : > { %v2819_v0 = vsel %vm1211_vm3, %v2800_v63, %v2802_v19  ;;  %4474 = vmatpush3.bf16.msk.msra.mxu1 %vm5222_vm14, %v4473_v35  ;;  %v3165_v35 = vld [vmem:[%s6371_s5 + $0x130] sm:$0xff] }
 0x4f7   : > { %v2806_v1 = vpop.permute.xlu1 %2805  ;;  %v2804_v21 = vpop.permute.xlu0 %2803 }
 0x4f8   : > { %v2820_v22 = vsel %vm1211_vm3, %v2804_v21, %v2806_v1 }
 0x4f9   : > { %v4476_v12 = vpack.c.bf16 %v2820_v22, %v2819_v0  ;;  %v3159_v0 = vld [vmem:[%s6371_s5 + $0x100] sm:$0xff] }
 0x4fb   : > { %v2994_v3 = vpop.permute.xlu1 %2993  ;;  %v2992_v4 = vpop.permute.xlu0 %2991 }
 0x4fc   : > { %v3011_v5 = vsel %vm1453_vm5, %v2992_v4, %v2994_v3  ;;  %v3164_v3 = vld [vmem:[%s6371_s5 + $0x128] sm:$0xff]  ;;  %v3131_v4 = vld [vmem:[%s6371_s5 + $0x20] sm:$0xff] }
 0x4ff   : > { %v2998_v56 = vpop.permute.xlu1 %2997  ;;  %v2996_v23 = vpop.permute.xlu0 %2995 }
 0x500   : > { %v3012_v57 = vsel %vm1453_vm5, %v2996_v23, %v2998_v56  ;;  %v3136_v56 = vld [vmem:[%s6371_s5 + $0x48] sm:$0xff]  ;;  %v3141_v23 = vld [vmem:[%s6371_s5 + $0x70] sm:$0xff] }
 0x501   : > { %v4185_v6 = vpack.c.bf16 %v3012_v57, %v3011_v5  ;;  %v3146_v57 = vld [vmem:[%s6371_s5 + $0x98] sm:$0xff] }
 0x503   : > { %v2810_v26 = vpop.permute.xlu1 %2809  ;;  %v2808_v48 = vpop.permute.xlu0 %2807  ;;  %4186 = vmatprep.subr.bf16.mxu1 %v4185_v6  ;;  %v3156_v6 = vld [vmem:[%s6371_s5 + $0xe8] sm:$0xff] }
 0x504   : > { %v2821_v10 = vsel %vm1211_vm3, %v2808_v48, %v2810_v26  ;;  %4477 = vmatpush3.bf16.msk.msra.mxu1 %vm5222_vm14, %v4476_v12  ;;  %v3161_v26 = vld [vmem:[%s6371_s5 + $0x110] sm:$0xff]  ;;  %v3166_v48 = vld [vmem:[%s6371_s5 + $0x138] sm:$0xff] }
 0x507   : > { %v2814_v28 = vpop.permute.xlu1 %2813  ;;  %v2812_v27 = vpop.permute.xlu0 %2811 }
 0x508   : > { %v2822_v8 = vsel %vm1211_vm3, %v2812_v27, %v2814_v28 }
 0x509   : > { %v4479_v39 = vpack.c.bf16 %v2822_v8, %v2821_v10 }
 0x50b   : > { %v3002_v61 = vpop.permute.xlu1 %3001  ;;  %v3000_v45 = vpop.permute.xlu0 %2999 }
 0x50c   : > { %v3013_v2 = vsel %vm1453_vm5, %v3000_v45, %v3002_v61 }
 0x50f   : > { %v3006_v30 = vpop.permute.xlu1 %3005  ;;  %v3004_v31 = vpop.permute.xlu0 %3003 }
 0x510   : > { %v3014_v33 = vsel %vm1453_vm5, %v3004_v31, %v3006_v30 }
 0x511   : > { %v4189_v34 = vpack.c.bf16 %v3014_v33, %v3013_v2 }
 0x513   : > { %v3066_v9 = vpop.permute.xlu1 %3065  ;;  %v3064_v7 = vpop.permute.xlu0 %3063  ;;  %4190 = vmatprep.subr.bf16.mxu1 %v4189_v34 }
 0x514   : > { %v3095_v38 = vsel %vm1558_vm6, %v3064_v7, %v3066_v9  ;;  %4480 = vmatpush3.bf16.msk.msra.mxu1 %vm5222_vm14, %v4479_v39 }
 0x517   : > { %v3070_v15 = vpop.permute.xlu1 %3069  ;;  %v3068_v20 = vpop.permute.xlu0 %3067  ;;  %3481 = vmatmul.mubr.f32.vlgmr.msra.gmra.mrb[32].mxu1 %v3129_v42 }
 0x518   : > { %v3096_v46 = vsel %vm1558_vm6, %v3068_v20, %v3070_v15  ;;  %3485 = vmatprep.mubr.f32.mxu1 %v3135_v44 }
 0x519   : > { %v4482_v24 = vpack.c.bf16 %v3096_v46, %v3095_v38 }
 0x51b   : > { %v3074_v50 = vpop.permute.xlu1 %3073  ;;  %v3072_v25 = vpop.permute.xlu0 %3071  ;;  %3486 = vmatmul.mubr.f32.gmra.mrb[34].mxu1 %v3134_v11  ;;  %4483 = vmatprep.subr.msk.bf16.mxu1 %vm5222_vm14, %v4482_v24 }
 0x51c   : > { %v3097_v36 = vsel %vm1558_vm6, %v3072_v25, %v3074_v50  ;;  %3490 = vmatprep.mubr.f32.mxu1 %v3140_v47  ;;  %4486 = vmatpush3.bf16.msk.msra.mxu1 %vm5222_vm14, %v4482_v24 }
 0x51f   : > { %v3078_v41 = vpop.permute.xlu1 %3077  ;;  %v3076_v14 = vpop.permute.xlu0 %3075  ;;  %3491 = vmatmul.mubr.f32.gmra.mrb[36].mxu1 %v3139_v37 }
 0x520   : > { %v3098_v49 = vsel %vm1558_vm6, %v3076_v14, %v3078_v41  ;;  %3495 = vmatprep.mubr.f32.mxu1 %v3145_v40 }
 0x521   : > { %v4488_v43 = vpack.c.bf16 %v3098_v49, %v3097_v36 }
 0x523   : > { %v3082_v32 = vpop.permute.xlu1 %3081  ;;  %v3080_v13 = vpop.permute.xlu0 %3079  ;;  %3496 = vmatmul.mubr.f32.gmra.mrb[38].mxu1 %v3144_v52  ;;  %4489 = vmatprep.subr.msk.bf16.mxu1 %vm5222_vm14, %v4488_v43 }
 0x524   : > { %v3099_v16 = vsel %vm1558_vm6, %v3080_v13, %v3082_v32  ;;  %3500 = vmatprep.mubr.f32.mxu1 %v3150_v29  ;;  %4492 = vmatpush3.bf16.msk.msra.mxu1 %vm5222_vm14, %v4488_v43 }
 0x527   : > { %v3086_v17 = vpop.permute.xlu1 %3085  ;;  %v3084_v18 = vpop.permute.xlu0 %3083  ;;  %3501 = vmatmul.mubr.f32.gmra.mrb[40].mxu1 %v3149_v54 }
 0x528   : > { %v3100_v58 = vsel %vm1558_vm6, %v3084_v18, %v3086_v17  ;;  %3505 = vmatprep.mubr.f32.mxu1 %v3155_v55 }
 0x529   : > { %v4494_v63 = vpack.c.bf16 %v3100_v58, %v3099_v16 }
 0x52b   : > { %v3090_v62 = vpop.permute.xlu1 %3089  ;;  %v3088_v51 = vpop.permute.xlu0 %3087  ;;  %3506 = vmatmul.mubr.f32.gmra.mrb[42].mxu1 %v3154_v59  ;;  %4495 = vmatprep.subr.msk.bf16.mxu1 %vm5222_vm14, %v4494_v63 }
 0x52c   : > { %v3101_v19 = vsel %vm1558_vm6, %v3088_v51, %v3090_v62  ;;  %3510 = vmatprep.mubr.f32.mxu1 %v3160_v60  ;;  %4498 = vmatpush3.bf16.msk.msra.mxu1 %vm5222_vm14, %v4494_v63 }
 0x52f   : > { %v3094_v1 = vpop.permute.xlu1 %3093  ;;  %v3092_v21 = vpop.permute.xlu0 %3091  ;;  %3511 = vmatmul.mubr.f32.gmra.mrb[44].mxu1 %v3159_v0 }
 0x530   : > { %v3102_v22 = vsel %vm1558_vm6, %v3092_v21, %v3094_v1  ;;  %3515 = vmatprep.mubr.f32.mxu1 %v3165_v35 }
 0x531   : > { %v4500_v5 = vpack.c.bf16 %v3102_v22, %v3101_v19 }
 0x533   : > { %3516 = vmatmul.mubr.f32.gmra.mrb[46].mxu1 %v3164_v3  ;;  %4501 = vmatprep.subr.msk.bf16.mxu1 %vm5222_vm14, %v4500_v5 }
 0x534   : > { %3973 = vmatprep.mubr.msk.f32.mxu1 %vm1847_vm7, %v3131_v4  ;;  %4504 = vmatpush3.bf16.msk.msra.mxu1 %vm5222_vm14, %v4500_v5 }
 0x537   : > { %3974 = vmatmul.mubr.msk.f32.vlgmr.msra.gmra.mrb[48].mxu1 %vm1847_vm7, %v3136_v56 }
 0x538   : > { %3976 = vmatprep.mubr.msk.f32.mxu1 %vm1847_vm7, %v3141_v23 }
 0x53b   : > { %3977 = vmatmul.mubr.msk.f32.gmra.mrb[50].mxu1 %vm1847_vm7, %v3146_v57 }
 0x53c   : > { %3979 = vmatprep.mubr.msk.f32.mxu1 %vm1847_vm7, %v3151_v53 }
 0x53f   : > { %3980 = vmatmul.mubr.msk.f32.gmra.mrb[52].mxu1 %vm1847_vm7, %v3156_v6 }
 0x540   : > { %3982 = vmatprep.mubr.msk.f32.mxu1 %vm1847_vm7, %v3161_v26  ;;  %v3250_v25 = vpop.permute.xlu0 %3249  ;;  %v3255_v24 = vpop.permute.xlu1 %3254 }
 0x543   : > { %3983 = vmatmul.mubr.msk.f32.gmra.mrb[54].mxu1 %vm1847_vm7, %v3166_v48 }
 0x544   : > { %v3260_v13 = vpop.permute.xlu1 %3259  ;;  %v3265_v18 = vpop.permute.xlu0 %3264 }
 0x548   : > { %v3270_v19 = vpop.permute.xlu1 %3269  ;;  %v3275_v22 = vpop.permute.xlu0 %3274 }
 0x54c   : > { %v3280_v57 = vpop.permute.xlu1 %3279 }
 0x569   : > { %v3861_v10 = vpop.f32.mrb[16].mxu1 }
 0x56a   : > { %v3862_v12 = vpop.f32.mrb[17].mxu1 }
 0x56b   : > { %v3863_v28 = vadd.f32 %v3862_v12, %v3861_v10  ;;  %v3285_v12 = vpop.permute.xlu0 %3284 }
 0x56d   : > { %v3864_v27 = vpop.f32.mrb[18].mxu1  ;;  %v3378_v40 = vadd.f32 %v3863_v28, %v3250_v25 }
 0x56e   : > { %v3865_v8 = vpop.f32.mrb[19].mxu1 }
 0x56f   : > { %v3866_v61 = vadd.f32 %v3865_v8, %v3864_v27 }
 0x571   : > { %v3867_v45 = vpop.f32.mrb[20].mxu1  ;;  %v3383_v29 = vadd.f32 %v3866_v61, %v3255_v24 }
 0x572   : > { %v3868_v2 = vpop.f32.mrb[21].mxu1 }
 0x573   : > { %v3869_v30 = vadd.f32 %v3868_v2, %v3867_v45 }
 0x575   : > { %v3870_v31 = vpop.f32.mrb[22].mxu1  ;;  %v3388_v55 = vadd.f32 %v3869_v30, %v3260_v13 }
 0x576   : > { %v3871_v33 = vpop.f32.mrb[23].mxu1 }
 0x577   : > { %v3872_v34 = vadd.f32 %v3871_v33, %v3870_v31  ;;  %v3627_v31 = vld [vmem:[%s4784_s19 + $0x8] sm:$0xff] }
 0x579   : > { %v3873_v9 = vpop.f32.mrb[24].mxu1  ;;  %v3393_v62 = vadd.f32 %v3872_v34, %v3265_v18 }
 0x57a   : > { %v3874_v7 = vpop.f32.mrb[25].mxu1 }
 0x57b   : > { %v3875_v38 = vadd.f32 %v3874_v7, %v3873_v9  ;;  %v3626_v9 = vld [vmem:[%s4784_s19] sm:$0xff] }
 0x57d   : > { %v3876_v39 = vpop.f32.mrb[26].mxu1  ;;  %v3398_v1 = vadd.f32 %v3875_v38, %v3270_v19 }
 0x57e   : > { %v3877_v42 = vpop.f32.mrb[27].mxu1 }
 0x57f   : > { %v3878_v44 = vadd.f32 %v3877_v42, %v3876_v39 }
 0x581   : > { %v3879_v15 = vpop.f32.mrb[28].mxu1  ;;  %v3403_v56 = vadd.f32 %v3878_v44, %v3275_v22  ;;  %v3629_v44 = vld [vmem:[%s4784_s19 + $0x18] sm:$0xff] }
 0x582   : > { %v3880_v20 = vpop.f32.mrb[29].mxu1 }
 0x583   : > { %v3881_v46 = vadd.f32 %v3880_v20, %v3879_v15 }
 0x585   : > { %v3882_v11 = vpop.f32.mrb[30].mxu1  ;;  %v3408_v48 = vadd.f32 %v3881_v46, %v3280_v57  ;;  %v3628_v46 = vld [vmem:[%s4784_s19 + $0x10] sm:$0xff] }
 0x586   : > { %v3883_v47 = vpop.f32.mrb[31].mxu1 }
 0x587   : > { %v3884_v50 = vadd.f32 %v3883_v47, %v3882_v11 }
 0x589   : > { %v3413_v61 = vadd.f32 %v3884_v50, %v3285_v12 }
 0x5ea   : > { %v3917_v36 = vpop.f32.mrb[32].mxu1 }
 0x5eb   : > { %v3918_v37 = vpop.f32.mrb[33].mxu1 }
 0x5ec   : > { %v3919_v41 = vadd.f32 %v3918_v37, %v3917_v36  ;;  %v3631_v36 = vld [vmem:[%s4784_s19 + $0x28] sm:$0xff] }
 0x5ee   : > { %v3920_v14 = vpop.f32.mrb[34].mxu1  ;;  %v3483_v49 = vadd.f32 %v3919_v41, %v3378_v40  ;;  %v3630_v40 = vld [vmem:[%s4784_s19 + $0x20] sm:$0xff] }
 0x5ef   : > { %v3921_v52 = vpop.f32.mrb[35].mxu1 }
 0x5f0   : > { %v3922_v32 = vadd.f32 %v3921_v52, %v3920_v14 }
 0x5f2   : > { %v3923_v16 = vpop.f32.mrb[36].mxu1  ;;  %v3488_v43 = vadd.f32 %v3922_v32, %v3383_v29  ;;  %v3633_v29 = vld [vmem:[%s4784_s19 + $0x38] sm:$0xff] }
 0x5f3   : > { %v3924_v54 = vpop.f32.mrb[37].mxu1 }
 0x5f4   : > { %v3925_v17 = vadd.f32 %v3924_v54, %v3923_v16  ;;  %v3632_v16 = vld [vmem:[%s4784_s19 + $0x30] sm:$0xff]  ;;  %s4505_s19 = scalar_lea.vmem %s6308_s11, 1024 }
 0x5f5   : > { %p4506_p5 = scmp.ne.s32.totalorder %s6308_s11, %s4505_s19  ;;  %p4513_p11 = scmp.lt.s32.totalorder %s4511_s22, %s4505_s19 }
 0x5f6   : > { %v3926_v58 = vpop.f32.mrb[38].mxu1  ;;  %v3493_v59 = vadd.f32 %v3925_v17, %v3388_v55 }
 0x5f7   : > { %v3927_v60 = vpop.f32.mrb[39].mxu1  ;;  %p4507_p6 = pnand %p4506_p5, %p4719_p8  ;;  %p4514_p12 = por %p4513_p11, %p4512_p10 }
 0x5f8   : > { %v3928_v51 = vadd.f32 %v3927_v60, %v3926_v58 }
 0x5f9   : > { %p4508_p7 = pneg %p4507_p6 }
 0x5fa   : > { %v3929_v63 = vpop.f32.mrb[40].mxu1  ;;  %v3498_v0 = vadd.f32 %v3928_v51, %v3393_v62 }
 0x5fb   : > { %v3930_v35 = vpop.f32.mrb[41].mxu1  ;;  %p4515_p13 = pnand %p4514_p12, %p4508_p7 }
 0x5fc   : > { %v3931_v21 = vadd.f32 %v3930_v35, %v3929_v63 }
 0x5fe   : > { %v3932_v3 = vpop.f32.mrb[42].mxu1  ;;  %v3503_v4 = vadd.f32 %v3931_v21, %v3398_v1 }
 0x5ff   : > { %v3933_v5 = vpop.f32.mrb[43].mxu1 }
 0x600   : > { %v3934_v23 = vadd.f32 %v3933_v5, %v3932_v3 }
 0x602   : > { %v3935_v53 = vpop.f32.mrb[44].mxu1  ;;  %v3508_v6 = vadd.f32 %v3934_v23, %v3403_v56 }
 0x603   : > { %v3936_v26 = vpop.f32.mrb[45].mxu1 }
 0x604   : > { %v3937_v10 = vadd.f32 %v3936_v26, %v3935_v53 }
 0x606   : > { %v3938_v28 = vpop.f32.mrb[46].mxu1  ;;  %v3513_v27 = vadd.f32 %v3937_v10, %v3408_v48 }
 0x607   : > { %v3939_v8 = vpop.f32.mrb[47].mxu1 }
 0x608   : > { %v3940_v45 = vadd.f32 %v3939_v8, %v3938_v28 }
 0x60a   : > { %v3518_v2 = vadd.f32 %v3940_v45, %v3413_v61  ;;  %v3975_v30 = vpop.f32.mrb[48].mxu1 }
 0x60b   : > { %v3593_v33 = vadd.f32 %v3975_v30, %v3488_v43  ;;  %v3587_v34 = vpop.f32.mrb[49].mxu1 }
 0x60c   : > { %v3588_v7 = vadd.f32 %v3587_v34, %v3483_v49 }
 0x60d   : > { %v3635_v38 = vadd.f32 %v3627_v31, %v3593_v33 }
 0x60e   : > { %v3634_v39 = vadd.f32 %v3626_v9, %v3588_v7  ;;  %v3978_v42 = vpop.f32.mrb[50].mxu1 }
 0x60f   : > { %3643 = vst [vmem:[%s5712_s21 + $0x8] sm:$0xff] %v3635_v38  ;;  %v3603_v15 = vadd.f32 %v3978_v42, %v3498_v0  ;;  %v3597_v20 = vpop.f32.mrb[51].mxu1 }
 0x610   : > { %3642 = vst [vmem:[%s5712_s21] sm:$0xff] %v3634_v39  ;;  %v3598_v11 = vadd.f32 %v3597_v20, %v3493_v59 }
 0x611   : > { %v3637_v47 = vadd.f32 %v3629_v44, %v3603_v15 }
 0x612   : > { %v3636_v50 = vadd.f32 %v3628_v46, %v3598_v11  ;;  %v3981_v25 = vpop.f32.mrb[52].mxu1 }
 0x613   : > { %3645 = vst [vmem:[%s5712_s21 + $0x18] sm:$0xff] %v3637_v47  ;;  %v3613_v24 = vadd.f32 %v3981_v25, %v3508_v6  ;;  %v3607_v37 = vpop.f32.mrb[53].mxu1 }
 0x614   : > { %3644 = vst [vmem:[%s5712_s21 + $0x10] sm:$0xff] %v3636_v50  ;;  %v3608_v41 = vadd.f32 %v3607_v37, %v3503_v4 }
 0x615   : > { %v3639_v14 = vadd.f32 %v3631_v36, %v3613_v24 }
 0x616   : > { %v3638_v49 = vadd.f32 %v3630_v40, %v3608_v41  ;;  %v3984_v52 = vpop.f32.mrb[54].mxu1 }
 0x617   : > { %3647 = vst [vmem:[%s5712_s21 + $0x28] sm:$0xff] %v3639_v14  ;;  %v3623_v32 = vadd.f32 %v3984_v52, %v3518_v2  ;;  %v3617_v13 = vpop.f32.mrb[55].mxu1 }
 0x618   : > { %3646 = vst [vmem:[%s5712_s21 + $0x20] sm:$0xff] %v3638_v49  ;;  %v3618_v43 = vadd.f32 %v3617_v13, %v3513_v27 }
 0x619   : > { %v3641_v54 = vadd.f32 %v3633_v29, %v3623_v32 }
 0x61a   : > { %v3640_v55 = vadd.f32 %v3632_v16, %v3618_v43 }
 0x61b   : > { %3649 = vst [vmem:[%s5712_s21 + $0x38] sm:$0xff] %v3641_v54 }
 0x61c   : > { %3648 = vst [vmem:[%s5712_s21 + $0x30] sm:$0xff] %v3640_v55 }
 0x61d   : > { %4518 = shalt.err (!%p4515_p13)
}
 0x61e   : > { %s4519_s21 = scalar_lea.hbm %s6306_s29, 1024  ;;  %s4523_s9 = scalar_lea.hbm %s6373_s7, 8192 }
 0x61f   : > { %p4520_p0 = scmp.ne.s32.totalorder %s6306_s29, %s4519_s21  ;;  %p4524_p3 = scmp.lt.u32.totalorder %s6306_s29, %s6373_s7 }
 0x620   : > { %p4525_p4 = scmp.lt.u32.totalorder %s4523_s9, %s4519_s21  ;;  %p4527_p6 = scmp.lt.u32.totalorder %s4519_s21, %s6306_s29 }
 0x621   : > { %p4521_p1 = pnand %p4520_p0, %p4719_p8 }
 0x622   : > { %p4526_p5 = por %p4525_p4, %p4524_p3 }
 0x623   : > { %p4522_p2 = pneg %p4521_p1 }
 0x624   : > { %p4528_p7 = por %p4527_p6, %p4526_p5 }
 0x626   : > { %p4529_p10 = pnand %p4528_p7, %p4522_p2 }
 0x628   : > { %4532 = shalt.err (!%p4529_p10)
}
 0x629   : > { %s4616_s28 = smov 128   ;;  %s4617_s27 = smov 512  }
 0x62a   : > { %s4618_s14 = smov 8  }
 0x62b   : > { %4257 = dma.vmem_to_hbm [thread:$0]  (%p4719_p8), %s6308_s11, 1024, %s6306_s29, %s6314_s0, %s4616_s28, %s4617_s27, %s4618_s14  }
 0x62c PF: > { %p4263_p11 = scmp.ge.s32.totalorder %s4599_s8, 2  ;;  %s3680_s30 = sand.u32 1, %s4571_s24  }
 0x62d   : > { %s3681_s19 = scalar_lea.sflag [#allocation7], %s3680_s30 }
 0x62e   : > { %p4260_p12 = pnand %p4263_p11, %p4723_p9 }
 0x630   : > { %4566 = dma.done.wait (!%p4260_p12), %s3681_s19, 1024  }
 0x631   : > { %4568 = vsyncadd (!%p4260_p12), %s3681_s19, 4294966272  ;;  %s20_s8 = sadd.s32 1, %s4599_s8   ;;  %s6413_s27 = sld [smem:[#allocation9_spill]] }
 0x632   : > { %p17_p13 = scmp.ge.s32.totalorder %s20_s8, 10   ;;  %s6414_s28 = sld [smem:[#allocation10_spill]] }
 0x633   : > { %s6415_s29 = sld [smem:[#allocation11_spill]]  ;;  %s6416_s30 = sld [smem:[#allocation12_spill]] }
 0x634   : > { %s6417_s24 = smov %s4575_s25  ;;  %s6418_s25 = smov %s4579_s26 }
 0x635   : > { %s6419_s26 = smov %s4731_s20  ;;  %19 = sbr.rel (!%p17_p13) target bundleno = 7 (0x7), region = 140 }
 0x63c   :  { %3686 = vsyncpa [#allocation7], 1 }
 0x63d   :  { %3688 = vsyncpa [#allocation7 + $0x1], 1 }

</bundles_post_ra>
